<compile_context>
chip_gen: v5e
topology: v5e:2x2
jax: 0.10.0
libtpu: 0.0.40
codegen_flags: <defaults>
</compile_context>

<pallas_src>
import functools
import math

import jax
import jax.numpy as jnp
from jax.experimental import pallas as pl
from jax.experimental.pallas import tpu as pltpu

EPS = 1e-5  # nn.BatchNorm2d default eps


def _sizes(iw):
    """Static sizes derived from the input width (k=2, s=1, p=1 convs)."""
    h1 = iw + 1                       # conv1 spatial extent (17)
    wp1 = iw + 2                      # zero-padded sensor width (18)
    r1 = h1 * wp1                     # conv1 flat rows incl. wrap col (306)
    rx = r1 + wp1 + 1                 # padded-sensor flat rows needed (325)
    p1n = h1 // 2                     # pool1 spatial extent (8)
    wp2 = p1n + 2                     # padded pool1 width / conv2 row pitch (10)
    h2 = p1n + 1                      # conv2 spatial extent (9)
    l2 = ((h2 - 1) * (wp2 + 1) + 1 + 7) // 8 * 8   # conv2 matmul rows (96)
    np1 = (l2 + wp2 + 1 + 7) // 8 * 8              # pool1 buffer rows (112)
    p2n = h2 // 2                     # pool2 spatial extent (4)
    feat = p2n * p2n * 64             # flattened conv feature size (1024)
    return dict(h1=h1, wp1=wp1, r1=r1, rx=rx, p1n=p1n, wp2=wp2, h2=h2,
                l2=l2, np1=np1, p2n=p2n, feat=feat)


# ---------------------------------------------------------------------------
# Fused Pallas kernel: one batch tile per grid step, everything in VMEM
# ---------------------------------------------------------------------------
def _actor_kernel(xb_ref, tgt_ref,
                  cw1_ref, cb1_ref, cw2_ref, cb2_ref,
                  fw0_ref, fb0_ref, fw1_ref, fb1_ref, fw2_ref, fb2_ref,
                  o_ref,
                  c1_ref, p1_ref, lhs_ref, c2_ref, p2f_ref,
                  *, iw):
    z = _sizes(iw)
    wp1, r1 = z['wp1'], z['r1']
    p1n, wp2, l2, p2n, feat = z['p1n'], z['wp2'], z['l2'], z['p2n'], z['feat']
    bt = xb_ref.shape[0]
    f32 = jnp.float32

    # ---- layer 1: Conv2d(1,32,k=2,s=1,p=1) + folded BN + ReLU, on the VPU --
    # xb rows hold the zero-padded sensor (pre-broadcast to 32 lanes) at
    # flat index i*wp1 + j; conv output row r = i*wp1 + j (j == wp1-1 garbage).
    acc1 = (xb_ref[:, pl.ds(0, r1), :] * cw1_ref[0, :]
            + xb_ref[:, pl.ds(1, r1), :] * cw1_ref[1, :]
            + xb_ref[:, pl.ds(wp1, r1), :] * cw1_ref[2, :]
            + xb_ref[:, pl.ds(wp1 + 1, r1), :] * cw1_ref[3, :]
            + cb1_ref[...])
    c1_ref[...] = jnp.maximum(acc1, 0.0)                      # (bt, r1, 32)

    # ---- MaxPool2d(2,2) (floor) -> zero-padded pool1 grid (row pitch wp2) --
    p1_ref[...] = jnp.zeros(p1_ref.shape, f32)
    for ph in range(p1n):
        r00 = c1_ref[:, pl.ds((2 * ph) * wp1, p1n, 2), :]
        r01 = c1_ref[:, pl.ds((2 * ph) * wp1 + 1, p1n, 2), :]
        r10 = c1_ref[:, pl.ds((2 * ph + 1) * wp1, p1n, 2), :]
        r11 = c1_ref[:, pl.ds((2 * ph + 1) * wp1 + 1, p1n, 2), :]
        p1_ref[:, pl.ds((ph + 1) * wp2 + 1, p1n), :] = jnp.maximum(
            jnp.maximum(r00, r01), jnp.maximum(r10, r11))      # (bt, p1n, 32)

    # ---- layer 2: Conv2d(32,64,k=2,s=1,p=1) + folded BN + ReLU, on the MXU -
    # The 4 taps are concatenated on the lane axis -> one K=128 contraction.
    lhs_ref[:, :, 0:32] = p1_ref[:, pl.ds(0, l2), :]           # tap (0,0)
    lhs_ref[:, :, 32:64] = p1_ref[:, pl.ds(1, l2), :]          # tap (0,1)
    lhs_ref[:, :, 64:96] = p1_ref[:, pl.ds(wp2, l2), :]        # tap (1,0)
    lhs_ref[:, :, 96:128] = p1_ref[:, pl.ds(wp2 + 1, l2), :]   # tap (1,1)
    for b in range(bt):   # fixed tile unroll (bt <= 8), independent of B
        mm = jnp.dot(lhs_ref[b], cw2_ref[...], preferred_element_type=f32)
        c2_ref[b] = jnp.maximum(mm + cb2_ref[...], 0.0)        # (l2, 64)

    # ---- MaxPool2d(2,2) (floor) -> lane-dense (bt, feat) feature row -------
    # Feature order is (pool-position-major, channel-minor); fc1's columns are
    # pre-permuted at prep time to match torch's NCHW flatten exactly.
    for pi in range(p2n):
        q00 = c2_ref[:, pl.ds((2 * pi) * wp2, p2n, 2), :]
        q01 = c2_ref[:, pl.ds((2 * pi) * wp2 + 1, p2n, 2), :]
        q10 = c2_ref[:, pl.ds((2 * pi + 1) * wp2, p2n, 2), :]
        q11 = c2_ref[:, pl.ds((2 * pi + 1) * wp2 + 1, p2n, 2), :]
        row = jnp.maximum(jnp.maximum(q00, q01), jnp.maximum(q10, q11))
        for pj in range(p2n):
            k = (pi * p2n + pj) * 64
            p2f_ref[:, k:k + 64] = row[:, pj, :]               # (bt, 64)

    # ---- fc0 (K=2) on the VPU, written straight into the fc1 input row -----
    yout = jnp.maximum(tgt_ref[:, 0:1] * fw0_ref[0, :]
                       + tgt_ref[:, 1:2] * fw0_ref[1, :] + fb0_ref[...], 0.0)
    p2f_ref[:, feat:feat + 128] = yout                         # (bt, 128)

    # ---- fc1 (single K = feat+128 matmul) + ReLU, fc2 + tanh ---------------
    h = jnp.maximum(
        jnp.dot(p2f_ref[...], fw1_ref[...], preferred_element_type=f32)
        + fb1_ref[...], 0.0)                                   # (bt, nh)
    out = jnp.dot(h, fw2_ref[...], preferred_element_type=f32) + fb2_ref[...]
    o_ref[...] = jnp.tanh(out)                                 # (bt, na)


# ---------------------------------------------------------------------------
# Host-side parameter preparation (one-time): BN folding + weight re-layout
# ---------------------------------------------------------------------------
def prepare_params(p):
    """Fold eval-mode BN into the convs and re-lay-out the matmul weights."""
    s1 = p['bn1_g'] * jax.lax.rsqrt(p['bn1_v'] + EPS)
    s2 = p['bn2_g'] * jax.lax.rsqrt(p['bn2_v'] + EPS)

    cw1 = p['conv1_w'][:, 0].reshape(32, 4).T * s1[None, :]             # (4,32)
    cb1 = ((p['conv1_b'] - p['bn1_m']) * s1 + p['bn1_b']).reshape(1, 32)

    # conv2 weights as one K=128 matrix: row = (dh*2+dw)*32 + cin.
    cw2 = jnp.transpose(p['conv2_w'], (2, 3, 1, 0)).reshape(128, 64) * s2[None, :]
    cb2 = ((p['conv2_b'] - p['bn2_m']) * s2 + p['bn2_b']).reshape(1, 64)

    nh = p['fc1_w'].shape[0]
    feat = p['fc1_w'].shape[1] - 128
    p2n = int(math.isqrt(feat // 64))
    # torch flattens NCHW (c*P*P + h*P + w); the kernel produces features in
    # (h, w, c) order, so permute fc1's conv columns once here and append the
    # fc0-output columns -> a single (feat+128, nh) fc1 weight.
    fw1x = p['fc1_w'][:, :feat].reshape(nh, 64, p2n, p2n)
    fw1x = jnp.transpose(fw1x, (2, 3, 1, 0)).reshape(p2n * p2n * 64, nh)
    fw1 = jnp.concatenate([fw1x, p['fc1_w'][:, feat:].T], axis=0)

    return {
        'cw1': cw1, 'cb1': cb1, 'cw2': cw2, 'cb2': cb2,
        'fw0': p['fc0_w'].T, 'fb0': p['fc0_b'].reshape(1, -1),
        'fw1': fw1, 'fb1': p['fc1_b'].reshape(1, -1),
        'fw2': p['fc2_w'].T, 'fb2': p['fc2_b'].reshape(1, -1),
    }


# ---------------------------------------------------------------------------
# Forward wrapper: batch-tiled parallel grid, weights resident across steps
# ---------------------------------------------------------------------------
def actor_forward(prep, sensor_nchw, target, *, batch_tile=8):
    """Pallas equivalent of ActorConvNet.forward({'sensor':..., 'target':...})."""
    B = sensor_nchw.shape[0]
    iw = sensor_nchw.shape[2]
    z = _sizes(iw)
    wp1, rx, r1 = z['wp1'], z['rx'], z['r1']
    l2, np1, feat = z['l2'], z['np1'], z['feat']
    na = prep['fw2'].shape[1]

    bt = min(batch_tile, B)
    bp = -(-B // bt) * bt            # batch padded to a multiple of the tile
    nb = bp // bt

    # Zero-pad the single-channel sensor, flatten (h, w) -> rows, and
    # pre-broadcast across the 32 conv1 output channels (lane-dense input).
    xpad = jnp.pad(sensor_nchw[:, 0], ((0, bp - B), (1, 1), (1, 1)))
    xflat = jnp.pad(xpad.reshape(bp, wp1 * wp1), ((0, 0), (0, 1)))
    xb = jnp.broadcast_to(xflat[:, :, None], (bp, rx, 32))
    tgt = jnp.pad(target, ((0, bp - B), (0, 0)))

    def full_spec(a):
        idx = (0,) * a.ndim
        return pl.BlockSpec(a.shape, lambda i, _idx=idx: _idx)

    weights = (prep['cw1'], prep['cb1'], prep['cw2'], prep['cb2'],
               prep['fw0'], prep['fb0'], prep['fw1'], prep['fb1'],
               prep['fw2'], prep['fb2'])

    kernel = functools.partial(_actor_kernel, iw=iw)
    out = pl.pallas_call(
        kernel,
        out_shape=jax.ShapeDtypeStruct((bp, na), jnp.float32),
        grid=(nb,),
        in_specs=[pl.BlockSpec((bt, rx, 32), lambda i: (i, 0, 0)),
                  pl.BlockSpec((bt, 2), lambda i: (i, 0))]
                 + [full_spec(w) for w in weights],
        out_specs=pl.BlockSpec((bt, na), lambda i: (i, 0)),
        scratch_shapes=[
            pltpu.VMEM((bt, r1, 32), jnp.float32),          # conv1+ReLU rows
            pltpu.VMEM((bt, np1, 32), jnp.float32),         # zero-padded pool1
            pltpu.VMEM((bt, l2, 128), jnp.float32),         # conv2 K=128 LHS
            pltpu.VMEM((bt, l2, 64), jnp.float32),          # conv2+ReLU rows
            pltpu.VMEM((bt, feat + 128), jnp.float32),      # fc1 input row
        ],
        compiler_params=pltpu.CompilerParams(
            dimension_semantics=("parallel",),
            vmem_limit_bytes=32 * 1024 * 1024),
    )(xb, tgt, *weights)
    return out[:B]


# ---------------------------------------------------------------------------
# Deterministic parameter initialization (synthetic, torch layouts/shapes)
# ---------------------------------------------------------------------------
def init_params(key, input_width=16, num_hidden=32, num_action=2):
    h1 = (input_width + 1) // 2
    h2 = (h1 + 1) // 2
    feat = 64 * h2 * h2  # featureSize()

    def xavier(k, shape, fan_in, fan_out):
        bound = math.sqrt(6.0 / (fan_in + fan_out))
        return jax.random.uniform(k, shape, jnp.float32, -bound, bound)

    ks = jax.random.split(key, 24)
    p = {}
    p['conv1_w'] = xavier(ks[0], (32, 1, 2, 2), 1 * 4, 32 * 4)
    p['conv1_b'] = xavier(ks[1], (32,), 1 * 4, 32 * 4)
    p['bn1_g'] = 1.0 + 0.1 * jax.random.normal(ks[2], (32,), jnp.float32)
    p['bn1_b'] = 0.1 * jax.random.normal(ks[3], (32,), jnp.float32)
    p['bn1_m'] = 0.1 * jax.random.normal(ks[4], (32,), jnp.float32)
    p['bn1_v'] = 1.0 + 0.1 * jnp.abs(jax.random.normal(ks[5], (32,), jnp.float32))

    p['conv2_w'] = xavier(ks[6], (64, 32, 2, 2), 32 * 4, 64 * 4)
    p['conv2_b'] = xavier(ks[7], (64,), 32 * 4, 64 * 4)
    p['bn2_g'] = 1.0 + 0.1 * jax.random.normal(ks[8], (64,), jnp.float32)
    p['bn2_b'] = 0.1 * jax.random.normal(ks[9], (64,), jnp.float32)
    p['bn2_m'] = 0.1 * jax.random.normal(ks[10], (64,), jnp.float32)
    p['bn2_v'] = 1.0 + 0.1 * jnp.abs(jax.random.normal(ks[11], (64,), jnp.float32))

    p['fc0_w'] = xavier(ks[12], (128, 2), 2, 128)
    p['fc0_b'] = xavier(ks[13], (128,), 2, 128)
    p['fc1_w'] = xavier(ks[14], (num_hidden, feat + 128), feat + 128, num_hidden)
    p['fc1_b'] = xavier(ks[15], (num_hidden,), feat + 128, num_hidden)
    p['fc2_w'] = xavier(ks[16], (num_action, num_hidden), num_hidden, num_action)
    p['fc2_b'] = xavier(ks[17], (num_action,), num_hidden, num_action)
    return p


# ---------------------------------------------------------------------------
# Pure-JAX reference (mirrors the torch forward, NCHW throughout)
# ---------------------------------------------------------------------------
def reference_forward(p, sensor, target):
    P = jax.lax.Precision.HIGHEST

    def block(x, w, b, g, bt, m, v):
        y = jax.lax.conv_general_dilated(
            x, w, (1, 1), [(1, 1), (1, 1)],
            dimension_numbers=('NCHW', 'OIHW', 'NCHW'), precision=P)
        y = y + b.reshape(1, -1, 1, 1)
        y = ((y - m.reshape(1, -1, 1, 1))
             * jax.lax.rsqrt(v.reshape(1, -1, 1, 1) + EPS)
             * g.reshape(1, -1, 1, 1) + bt.reshape(1, -1, 1, 1))
        y = jnp.maximum(y, 0.0)
        return jax.lax.reduce_window(y, -jnp.inf, jax.lax.max,
                                     (1, 1, 2, 2), (1, 1, 2, 2), 'VALID')

    x = block(sensor, p['conv1_w'], p['conv1_b'],
              p['bn1_g'], p['bn1_b'], p['bn1_m'], p['bn1_v'])
    x = block(x, p['conv2_w'], p['conv2_b'],
              p['bn2_g'], p['bn2_b'], p['bn2_m'], p['bn2_v'])
    xf = x.reshape(x.shape[0], -1)
    yout = jnp.maximum(jnp.dot(target, p['fc0_w'].T, precision=P) + p['fc0_b'], 0.0)
    h = jnp.concatenate([xf, yout], axis=1)
    h = jnp.maximum(jnp.dot(h, p['fc1_w'].T, precision=P) + p['fc1_b'], 0.0)
    return jnp.tanh(jnp.dot(h, p['fc2_w'].T, precision=P) + p['fc2_b'])


if __name__ == "__main__":
    key = jax.random.PRNGKey(0)
    k_params, k_sensor, k_target = jax.random.split(key, 3)

    input_width, num_hidden, num_action, batch = 16, 32, 2, 2
    params = init_params(k_params, input_width, num_hidden, num_action)
    prep = prepare_params(params)   # one-time BN folding / weight re-layout

    sensor = jax.random.normal(k_sensor, (batch, 1, input_width, input_width),
                               jnp.float32)   # state['sensor'], NCHW
    target = jax.random.normal(k_target, (batch, 2), jnp.float32)  # state['target']

    out = jax.jit(actor_forward)(prep, sensor, target)
    out = jax.block_until_ready(out)

    ref = reference_forward(params, sensor, target)
    assert out.shape == (batch, num_action)
    assert bool(jnp.all(jnp.isfinite(out)))
    max_err = float(jnp.max(jnp.abs(out - ref)))
    assert max_err < 5e-3, f"mismatch vs reference: {max_err}"

    print("KERNEL_OK")
</pallas_src>

<mosaic_0001>
module attributes {stable_mosaic.version = 11 : i64} {
  func.func @_actor_kernel(%arg0: i32, %arg1: memref<2x325x32xf32, #tpu.memory_space<vmem>>, %arg2: memref<2x2xf32, #tpu.memory_space<vmem>>, %arg3: memref<4x32xf32, #tpu.memory_space<vmem>>, %arg4: memref<1x32xf32, #tpu.memory_space<vmem>>, %arg5: memref<128x64xf32, #tpu.memory_space<vmem>>, %arg6: memref<1x64xf32, #tpu.memory_space<vmem>>, %arg7: memref<2x128xf32, #tpu.memory_space<vmem>>, %arg8: memref<1x128xf32, #tpu.memory_space<vmem>>, %arg9: memref<1152x32xf32, #tpu.memory_space<vmem>>, %arg10: memref<1x32xf32, #tpu.memory_space<vmem>>, %arg11: memref<32x2xf32, #tpu.memory_space<vmem>>, %arg12: memref<1x2xf32, #tpu.memory_space<vmem>>, %arg13: memref<2x2xf32, #tpu.memory_space<vmem>>, %arg14: memref<2x306x32xf32, #tpu.memory_space<vmem>>, %arg15: memref<2x112x32xf32, #tpu.memory_space<vmem>>, %arg16: memref<2x96x128xf32, #tpu.memory_space<vmem>>, %arg17: memref<2x96x64xf32, #tpu.memory_space<vmem>>, %arg18: memref<2x1152xf32, #tpu.memory_space<vmem>>) attributes {dimension_semantics = [#tpu.dimension_semantics<parallel>], iteration_bounds = array<i64: 1>, scalar_prefetch = 0 : i64, scratch_operands = 5 : i64, tpu.core_type = #tpu.core_type<tc>, window_params = [{transform_indices = @transform_0, window_bounds = array<i64: 2, 325, 32>}, {transform_indices = @transform_1, window_bounds = array<i64: 2, 2>}, {pipeline_mode = #tpu.pipeline_mode<synchronous>, transform_indices = @transform_2, window_bounds = array<i64: 4, 32>}, {pipeline_mode = #tpu.pipeline_mode<synchronous>, transform_indices = @transform_3, window_bounds = array<i64: 1, 32>}, {pipeline_mode = #tpu.pipeline_mode<synchronous>, transform_indices = @transform_4, window_bounds = array<i64: 128, 64>}, {pipeline_mode = #tpu.pipeline_mode<synchronous>, transform_indices = @transform_5, window_bounds = array<i64: 1, 64>}, {pipeline_mode = #tpu.pipeline_mode<synchronous>, transform_indices = @transform_6, window_bounds = array<i64: 2, 128>}, {pipeline_mode = #tpu.pipeline_mode<synchronous>, transform_indices = @transform_7, window_bounds = array<i64: 1, 128>}, {pipeline_mode = #tpu.pipeline_mode<synchronous>, transform_indices = @transform_8, window_bounds = array<i64: 1152, 32>}, {pipeline_mode = #tpu.pipeline_mode<synchronous>, transform_indices = @transform_9, window_bounds = array<i64: 1, 32>}, {pipeline_mode = #tpu.pipeline_mode<synchronous>, transform_indices = @transform_10, window_bounds = array<i64: 32, 2>}, {pipeline_mode = #tpu.pipeline_mode<synchronous>, transform_indices = @transform_11, window_bounds = array<i64: 1, 2>}, {transform_indices = @transform_12, window_bounds = array<i64: 2, 2>}]} {
    %c0 = arith.constant 0 : index
    %c0_0 = arith.constant 0 : index
    %c0_1 = arith.constant 0 : index
    %0 = vector.load %arg1[%c0, %c0_0, %c0_1] : memref<2x325x32xf32, #tpu.memory_space<vmem>>, vector<2x306x32xf32>
    %c0_2 = arith.constant 0 : index
    %c0_3 = arith.constant 0 : index
    %1 = vector.load %arg3[%c0_2, %c0_3] : memref<4x32xf32, #tpu.memory_space<vmem>>, vector<1x32xf32>
    %2 = vector.shape_cast %1 : vector<1x32xf32> to vector<32xf32>
    %3 = vector.shape_cast %2 : vector<32xf32> to vector<1x1x32xf32>
    %4 = vector.broadcast %3 : vector<1x1x32xf32> to vector<2x306x32xf32>
    %5 = arith.mulf %0, %4 : vector<2x306x32xf32>
    %c0_4 = arith.constant 0 : index
    %c1 = arith.constant 1 : index
    %c0_5 = arith.constant 0 : index
    %6 = vector.load %arg1[%c0_4, %c1, %c0_5] : memref<2x325x32xf32, #tpu.memory_space<vmem>>, vector<2x306x32xf32>
    %c1_6 = arith.constant 1 : index
    %c0_7 = arith.constant 0 : index
    %7 = vector.load %arg3[%c1_6, %c0_7] : memref<4x32xf32, #tpu.memory_space<vmem>>, vector<1x32xf32>
    %8 = vector.shape_cast %7 : vector<1x32xf32> to vector<32xf32>
    %9 = vector.shape_cast %8 : vector<32xf32> to vector<1x1x32xf32>
    %10 = vector.broadcast %9 : vector<1x1x32xf32> to vector<2x306x32xf32>
    %11 = arith.mulf %6, %10 : vector<2x306x32xf32>
    %12 = arith.addf %5, %11 : vector<2x306x32xf32>
    %c0_8 = arith.constant 0 : index
    %c18 = arith.constant 18 : index
    %c0_9 = arith.constant 0 : index
    %13 = vector.load %arg1[%c0_8, %c18, %c0_9] : memref<2x325x32xf32, #tpu.memory_space<vmem>>, vector<2x306x32xf32>
    %c2 = arith.constant 2 : index
    %c0_10 = arith.constant 0 : index
    %14 = vector.load %arg3[%c2, %c0_10] : memref<4x32xf32, #tpu.memory_space<vmem>>, vector<1x32xf32>
    %15 = vector.shape_cast %14 : vector<1x32xf32> to vector<32xf32>
    %16 = vector.shape_cast %15 : vector<32xf32> to vector<1x1x32xf32>
    %17 = vector.broadcast %16 : vector<1x1x32xf32> to vector<2x306x32xf32>
    %18 = arith.mulf %13, %17 : vector<2x306x32xf32>
    %19 = arith.addf %12, %18 : vector<2x306x32xf32>
    %c0_11 = arith.constant 0 : index
    %c19 = arith.constant 19 : index
    %c0_12 = arith.constant 0 : index
    %20 = vector.load %arg1[%c0_11, %c19, %c0_12] : memref<2x325x32xf32, #tpu.memory_space<vmem>>, vector<2x306x32xf32>
    %c3 = arith.constant 3 : index
    %c0_13 = arith.constant 0 : index
    %21 = vector.load %arg3[%c3, %c0_13] : memref<4x32xf32, #tpu.memory_space<vmem>>, vector<1x32xf32>
    %22 = vector.shape_cast %21 : vector<1x32xf32> to vector<32xf32>
    %23 = vector.shape_cast %22 : vector<32xf32> to vector<1x1x32xf32>
    %24 = vector.broadcast %23 : vector<1x1x32xf32> to vector<2x306x32xf32>
    %25 = arith.mulf %20, %24 : vector<2x306x32xf32>
    %26 = arith.addf %19, %25 : vector<2x306x32xf32>
    %c0_14 = arith.constant 0 : index
    %c0_15 = arith.constant 0 : index
    %27 = vector.load %arg4[%c0_14, %c0_15] : memref<1x32xf32, #tpu.memory_space<vmem>>, vector<1x32xf32>
    %28 = vector.shape_cast %27 : vector<1x32xf32> to vector<1x1x32xf32>
    %29 = vector.broadcast %28 : vector<1x1x32xf32> to vector<2x306x32xf32>
    %30 = arith.addf %26, %29 : vector<2x306x32xf32>
    %cst = arith.constant 0.000000e+00 : f32
    %31 = vector.broadcast %cst : f32 to vector<2x306x32xf32>
    %32 = arith.maximumf %30, %31 : vector<2x306x32xf32>
    %c0_16 = arith.constant 0 : index
    %c0_17 = arith.constant 0 : index
    %c0_18 = arith.constant 0 : index
    %33 = vector.load %arg14[%c0_16, %c0_17, %c0_18] : memref<2x306x32xf32, #tpu.memory_space<vmem>>, vector<2x306x32xf32>
    tpu.vector_store %arg14[%c0_16, %c0_17, %c0_18], %32 {strides = array<i32>} : memref<2x306x32xf32, #tpu.memory_space<vmem>>, vector<2x306x32xf32>,
    %cst_19 = arith.constant 0.000000e+00 : f32
    %34 = vector.broadcast %cst_19 : f32 to vector<2x112x32xf32>
    %c0_20 = arith.constant 0 : index
    %c0_21 = arith.constant 0 : index
    %c0_22 = arith.constant 0 : index
    %35 = vector.load %arg15[%c0_20, %c0_21, %c0_22] : memref<2x112x32xf32, #tpu.memory_space<vmem>>, vector<2x112x32xf32>
    tpu.vector_store %arg15[%c0_20, %c0_21, %c0_22], %34 {strides = array<i32>} : memref<2x112x32xf32, #tpu.memory_space<vmem>>, vector<2x112x32xf32>,
    %c0_23 = arith.constant 0 : index
    %c0_24 = arith.constant 0 : index
    %c0_25 = arith.constant 0 : index
    %36 = tpu.strided_load %arg14[%c0_23, %c0_24, %c0_25] {strides = array<i32: 1, 2, 1>} : memref<2x306x32xf32, #tpu.memory_space<vmem>>, vector<2x8x32xf32>
    %c0_26 = arith.constant 0 : index
    %c1_27 = arith.constant 1 : index
    %c0_28 = arith.constant 0 : index
    %37 = tpu.strided_load %arg14[%c0_26, %c1_27, %c0_28] {strides = array<i32: 1, 2, 1>} : memref<2x306x32xf32, #tpu.memory_space<vmem>>, vector<2x8x32xf32>
    %c0_29 = arith.constant 0 : index
    %c18_30 = arith.constant 18 : index
    %c0_31 = arith.constant 0 : index
    %38 = tpu.strided_load %arg14[%c0_29, %c18_30, %c0_31] {strides = array<i32: 1, 2, 1>} : memref<2x306x32xf32, #tpu.memory_space<vmem>>, vector<2x8x32xf32>
    %c0_32 = arith.constant 0 : index
    %c19_33 = arith.constant 19 : index
    %c0_34 = arith.constant 0 : index
    %39 = tpu.strided_load %arg14[%c0_32, %c19_33, %c0_34] {strides = array<i32: 1, 2, 1>} : memref<2x306x32xf32, #tpu.memory_space<vmem>>, vector<2x8x32xf32>
    %40 = arith.maximumf %36, %37 : vector<2x8x32xf32>
    %41 = arith.maximumf %38, %39 : vector<2x8x32xf32>
    %42 = arith.maximumf %40, %41 : vector<2x8x32xf32>
    %c0_35 = arith.constant 0 : index
    %c11 = arith.constant 11 : index
    %c0_36 = arith.constant 0 : index
    %43 = vector.load %arg15[%c0_35, %c11, %c0_36] : memref<2x112x32xf32, #tpu.memory_space<vmem>>, vector<2x8x32xf32>
    tpu.vector_store %arg15[%c0_35, %c11, %c0_36], %42 {strides = array<i32>} : memref<2x112x32xf32, #tpu.memory_space<vmem>>, vector<2x8x32xf32>,
    %c0_37 = arith.constant 0 : index
    %c36 = arith.constant 36 : index
    %c0_38 = arith.constant 0 : index
    %44 = tpu.strided_load %arg14[%c0_37, %c36, %c0_38] {strides = array<i32: 1, 2, 1>} : memref<2x306x32xf32, #tpu.memory_space<vmem>>, vector<2x8x32xf32>
    %c0_39 = arith.constant 0 : index
    %c37 = arith.constant 37 : index
    %c0_40 = arith.constant 0 : index
    %45 = tpu.strided_load %arg14[%c0_39, %c37, %c0_40] {strides = array<i32: 1, 2, 1>} : memref<2x306x32xf32, #tpu.memory_space<vmem>>, vector<2x8x32xf32>
    %c0_41 = arith.constant 0 : index
    %c54 = arith.constant 54 : index
    %c0_42 = arith.constant 0 : index
    %46 = tpu.strided_load %arg14[%c0_41, %c54, %c0_42] {strides = array<i32: 1, 2, 1>} : memref<2x306x32xf32, #tpu.memory_space<vmem>>, vector<2x8x32xf32>
    %c0_43 = arith.constant 0 : index
    %c55 = arith.constant 55 : index
    %c0_44 = arith.constant 0 : index
    %47 = tpu.strided_load %arg14[%c0_43, %c55, %c0_44] {strides = array<i32: 1, 2, 1>} : memref<2x306x32xf32, #tpu.memory_space<vmem>>, vector<2x8x32xf32>
    %48 = arith.maximumf %44, %45 : vector<2x8x32xf32>
    %49 = arith.maximumf %46, %47 : vector<2x8x32xf32>
    %50 = arith.maximumf %48, %49 : vector<2x8x32xf32>
    %c0_45 = arith.constant 0 : index
    %c21 = arith.constant 21 : index
    %c0_46 = arith.constant 0 : index
    %51 = vector.load %arg15[%c0_45, %c21, %c0_46] : memref<2x112x32xf32, #tpu.memory_space<vmem>>, vector<2x8x32xf32>
    tpu.vector_store %arg15[%c0_45, %c21, %c0_46], %50 {strides = array<i32>} : memref<2x112x32xf32, #tpu.memory_space<vmem>>, vector<2x8x32xf32>,
    %c0_47 = arith.constant 0 : index
    %c72 = arith.constant 72 : index
    %c0_48 = arith.constant 0 : index
    %52 = tpu.strided_load %arg14[%c0_47, %c72, %c0_48] {strides = array<i32: 1, 2, 1>} : memref<2x306x32xf32, #tpu.memory_space<vmem>>, vector<2x8x32xf32>
    %c0_49 = arith.constant 0 : index
    %c73 = arith.constant 73 : index
    %c0_50 = arith.constant 0 : index
    %53 = tpu.strided_load %arg14[%c0_49, %c73, %c0_50] {strides = array<i32: 1, 2, 1>} : memref<2x306x32xf32, #tpu.memory_space<vmem>>, vector<2x8x32xf32>
    %c0_51 = arith.constant 0 : index
    %c90 = arith.constant 90 : index
    %c0_52 = arith.constant 0 : index
    %54 = tpu.strided_load %arg14[%c0_51, %c90, %c0_52] {strides = array<i32: 1, 2, 1>} : memref<2x306x32xf32, #tpu.memory_space<vmem>>, vector<2x8x32xf32>
    %c0_53 = arith.constant 0 : index
    %c91 = arith.constant 91 : index
    %c0_54 = arith.constant 0 : index
    %55 = tpu.strided_load %arg14[%c0_53, %c91, %c0_54] {strides = array<i32: 1, 2, 1>} : memref<2x306x32xf32, #tpu.memory_space<vmem>>, vector<2x8x32xf32>
    %56 = arith.maximumf %52, %53 : vector<2x8x32xf32>
    %57 = arith.maximumf %54, %55 : vector<2x8x32xf32>
    %58 = arith.maximumf %56, %57 : vector<2x8x32xf32>
    %c0_55 = arith.constant 0 : index
    %c31 = arith.constant 31 : index
    %c0_56 = arith.constant 0 : index
    %59 = vector.load %arg15[%c0_55, %c31, %c0_56] : memref<2x112x32xf32, #tpu.memory_space<vmem>>, vector<2x8x32xf32>
    tpu.vector_store %arg15[%c0_55, %c31, %c0_56], %58 {strides = array<i32>} : memref<2x112x32xf32, #tpu.memory_space<vmem>>, vector<2x8x32xf32>,
    %c0_57 = arith.constant 0 : index
    %c108 = arith.constant 108 : index
    %c0_58 = arith.constant 0 : index
    %60 = tpu.strided_load %arg14[%c0_57, %c108, %c0_58] {strides = array<i32: 1, 2, 1>} : memref<2x306x32xf32, #tpu.memory_space<vmem>>, vector<2x8x32xf32>
    %c0_59 = arith.constant 0 : index
    %c109 = arith.constant 109 : index
    %c0_60 = arith.constant 0 : index
    %61 = tpu.strided_load %arg14[%c0_59, %c109, %c0_60] {strides = array<i32: 1, 2, 1>} : memref<2x306x32xf32, #tpu.memory_space<vmem>>, vector<2x8x32xf32>
    %c0_61 = arith.constant 0 : index
    %c126 = arith.constant 126 : index
    %c0_62 = arith.constant 0 : index
    %62 = tpu.strided_load %arg14[%c0_61, %c126, %c0_62] {strides = array<i32: 1, 2, 1>} : memref<2x306x32xf32, #tpu.memory_space<vmem>>, vector<2x8x32xf32>
    %c0_63 = arith.constant 0 : index
    %c127 = arith.constant 127 : index
    %c0_64 = arith.constant 0 : index
    %63 = tpu.strided_load %arg14[%c0_63, %c127, %c0_64] {strides = array<i32: 1, 2, 1>} : memref<2x306x32xf32, #tpu.memory_space<vmem>>, vector<2x8x32xf32>
    %64 = arith.maximumf %60, %61 : vector<2x8x32xf32>
    %65 = arith.maximumf %62, %63 : vector<2x8x32xf32>
    %66 = arith.maximumf %64, %65 : vector<2x8x32xf32>
    %c0_65 = arith.constant 0 : index
    %c41 = arith.constant 41 : index
    %c0_66 = arith.constant 0 : index
    %67 = vector.load %arg15[%c0_65, %c41, %c0_66] : memref<2x112x32xf32, #tpu.memory_space<vmem>>, vector<2x8x32xf32>
    tpu.vector_store %arg15[%c0_65, %c41, %c0_66], %66 {strides = array<i32>} : memref<2x112x32xf32, #tpu.memory_space<vmem>>, vector<2x8x32xf32>,
    %c0_67 = arith.constant 0 : index
    %c144 = arith.constant 144 : index
    %c0_68 = arith.constant 0 : index
    %68 = tpu.strided_load %arg14[%c0_67, %c144, %c0_68] {strides = array<i32: 1, 2, 1>} : memref<2x306x32xf32, #tpu.memory_space<vmem>>, vector<2x8x32xf32>
    %c0_69 = arith.constant 0 : index
    %c145 = arith.constant 145 : index
    %c0_70 = arith.constant 0 : index
    %69 = tpu.strided_load %arg14[%c0_69, %c145, %c0_70] {strides = array<i32: 1, 2, 1>} : memref<2x306x32xf32, #tpu.memory_space<vmem>>, vector<2x8x32xf32>
    %c0_71 = arith.constant 0 : index
    %c162 = arith.constant 162 : index
    %c0_72 = arith.constant 0 : index
    %70 = tpu.strided_load %arg14[%c0_71, %c162, %c0_72] {strides = array<i32: 1, 2, 1>} : memref<2x306x32xf32, #tpu.memory_space<vmem>>, vector<2x8x32xf32>
    %c0_73 = arith.constant 0 : index
    %c163 = arith.constant 163 : index
    %c0_74 = arith.constant 0 : index
    %71 = tpu.strided_load %arg14[%c0_73, %c163, %c0_74] {strides = array<i32: 1, 2, 1>} : memref<2x306x32xf32, #tpu.memory_space<vmem>>, vector<2x8x32xf32>
    %72 = arith.maximumf %68, %69 : vector<2x8x32xf32>
    %73 = arith.maximumf %70, %71 : vector<2x8x32xf32>
    %74 = arith.maximumf %72, %73 : vector<2x8x32xf32>
    %c0_75 = arith.constant 0 : index
    %c51 = arith.constant 51 : index
    %c0_76 = arith.constant 0 : index
    %75 = vector.load %arg15[%c0_75, %c51, %c0_76] : memref<2x112x32xf32, #tpu.memory_space<vmem>>, vector<2x8x32xf32>
    tpu.vector_store %arg15[%c0_75, %c51, %c0_76], %74 {strides = array<i32>} : memref<2x112x32xf32, #tpu.memory_space<vmem>>, vector<2x8x32xf32>,
    %c0_77 = arith.constant 0 : index
    %c180 = arith.constant 180 : index
    %c0_78 = arith.constant 0 : index
    %76 = tpu.strided_load %arg14[%c0_77, %c180, %c0_78] {strides = array<i32: 1, 2, 1>} : memref<2x306x32xf32, #tpu.memory_space<vmem>>, vector<2x8x32xf32>
    %c0_79 = arith.constant 0 : index
    %c181 = arith.constant 181 : index
    %c0_80 = arith.constant 0 : index
    %77 = tpu.strided_load %arg14[%c0_79, %c181, %c0_80] {strides = array<i32: 1, 2, 1>} : memref<2x306x32xf32, #tpu.memory_space<vmem>>, vector<2x8x32xf32>
    %c0_81 = arith.constant 0 : index
    %c198 = arith.constant 198 : index
    %c0_82 = arith.constant 0 : index
    %78 = tpu.strided_load %arg14[%c0_81, %c198, %c0_82] {strides = array<i32: 1, 2, 1>} : memref<2x306x32xf32, #tpu.memory_space<vmem>>, vector<2x8x32xf32>
    %c0_83 = arith.constant 0 : index
    %c199 = arith.constant 199 : index
    %c0_84 = arith.constant 0 : index
    %79 = tpu.strided_load %arg14[%c0_83, %c199, %c0_84] {strides = array<i32: 1, 2, 1>} : memref<2x306x32xf32, #tpu.memory_space<vmem>>, vector<2x8x32xf32>
    %80 = arith.maximumf %76, %77 : vector<2x8x32xf32>
    %81 = arith.maximumf %78, %79 : vector<2x8x32xf32>
    %82 = arith.maximumf %80, %81 : vector<2x8x32xf32>
    %c0_85 = arith.constant 0 : index
    %c61 = arith.constant 61 : index
    %c0_86 = arith.constant 0 : index
    %83 = vector.load %arg15[%c0_85, %c61, %c0_86] : memref<2x112x32xf32, #tpu.memory_space<vmem>>, vector<2x8x32xf32>
    tpu.vector_store %arg15[%c0_85, %c61, %c0_86], %82 {strides = array<i32>} : memref<2x112x32xf32, #tpu.memory_space<vmem>>, vector<2x8x32xf32>,
    %c0_87 = arith.constant 0 : index
    %c216 = arith.constant 216 : index
    %c0_88 = arith.constant 0 : index
    %84 = tpu.strided_load %arg14[%c0_87, %c216, %c0_88] {strides = array<i32: 1, 2, 1>} : memref<2x306x32xf32, #tpu.memory_space<vmem>>, vector<2x8x32xf32>
    %c0_89 = arith.constant 0 : index
    %c217 = arith.constant 217 : index
    %c0_90 = arith.constant 0 : index
    %85 = tpu.strided_load %arg14[%c0_89, %c217, %c0_90] {strides = array<i32: 1, 2, 1>} : memref<2x306x32xf32, #tpu.memory_space<vmem>>, vector<2x8x32xf32>
    %c0_91 = arith.constant 0 : index
    %c234 = arith.constant 234 : index
    %c0_92 = arith.constant 0 : index
    %86 = tpu.strided_load %arg14[%c0_91, %c234, %c0_92] {strides = array<i32: 1, 2, 1>} : memref<2x306x32xf32, #tpu.memory_space<vmem>>, vector<2x8x32xf32>
    %c0_93 = arith.constant 0 : index
    %c235 = arith.constant 235 : index
    %c0_94 = arith.constant 0 : index
    %87 = tpu.strided_load %arg14[%c0_93, %c235, %c0_94] {strides = array<i32: 1, 2, 1>} : memref<2x306x32xf32, #tpu.memory_space<vmem>>, vector<2x8x32xf32>
    %88 = arith.maximumf %84, %85 : vector<2x8x32xf32>
    %89 = arith.maximumf %86, %87 : vector<2x8x32xf32>
    %90 = arith.maximumf %88, %89 : vector<2x8x32xf32>
    %c0_95 = arith.constant 0 : index
    %c71 = arith.constant 71 : index
    %c0_96 = arith.constant 0 : index
    %91 = vector.load %arg15[%c0_95, %c71, %c0_96] : memref<2x112x32xf32, #tpu.memory_space<vmem>>, vector<2x8x32xf32>
    tpu.vector_store %arg15[%c0_95, %c71, %c0_96], %90 {strides = array<i32>} : memref<2x112x32xf32, #tpu.memory_space<vmem>>, vector<2x8x32xf32>,
    %c0_97 = arith.constant 0 : index
    %c252 = arith.constant 252 : index
    %c0_98 = arith.constant 0 : index
    %92 = tpu.strided_load %arg14[%c0_97, %c252, %c0_98] {strides = array<i32: 1, 2, 1>} : memref<2x306x32xf32, #tpu.memory_space<vmem>>, vector<2x8x32xf32>
    %c0_99 = arith.constant 0 : index
    %c253 = arith.constant 253 : index
    %c0_100 = arith.constant 0 : index
    %93 = tpu.strided_load %arg14[%c0_99, %c253, %c0_100] {strides = array<i32: 1, 2, 1>} : memref<2x306x32xf32, #tpu.memory_space<vmem>>, vector<2x8x32xf32>
    %c0_101 = arith.constant 0 : index
    %c270 = arith.constant 270 : index
    %c0_102 = arith.constant 0 : index
    %94 = tpu.strided_load %arg14[%c0_101, %c270, %c0_102] {strides = array<i32: 1, 2, 1>} : memref<2x306x32xf32, #tpu.memory_space<vmem>>, vector<2x8x32xf32>
    %c0_103 = arith.constant 0 : index
    %c271 = arith.constant 271 : index
    %c0_104 = arith.constant 0 : index
    %95 = tpu.strided_load %arg14[%c0_103, %c271, %c0_104] {strides = array<i32: 1, 2, 1>} : memref<2x306x32xf32, #tpu.memory_space<vmem>>, vector<2x8x32xf32>
    %96 = arith.maximumf %92, %93 : vector<2x8x32xf32>
    %97 = arith.maximumf %94, %95 : vector<2x8x32xf32>
    %98 = arith.maximumf %96, %97 : vector<2x8x32xf32>
    %c0_105 = arith.constant 0 : index
    %c81 = arith.constant 81 : index
    %c0_106 = arith.constant 0 : index
    %99 = vector.load %arg15[%c0_105, %c81, %c0_106] : memref<2x112x32xf32, #tpu.memory_space<vmem>>, vector<2x8x32xf32>
    tpu.vector_store %arg15[%c0_105, %c81, %c0_106], %98 {strides = array<i32>} : memref<2x112x32xf32, #tpu.memory_space<vmem>>, vector<2x8x32xf32>,
    %c0_107 = arith.constant 0 : index
    %c0_108 = arith.constant 0 : index
    %c0_109 = arith.constant 0 : index
    %100 = vector.load %arg15[%c0_107, %c0_108, %c0_109] : memref<2x112x32xf32, #tpu.memory_space<vmem>>, vector<2x96x32xf32>
    %c0_110 = arith.constant 0 : index
    %c0_111 = arith.constant 0 : index
    %c0_112 = arith.constant 0 : index
    %101 = vector.load %arg16[%c0_110, %c0_111, %c0_112] : memref<2x96x128xf32, #tpu.memory_space<vmem>>, vector<2x96x32xf32>
    tpu.vector_store %arg16[%c0_110, %c0_111, %c0_112], %100 {strides = array<i32>} : memref<2x96x128xf32, #tpu.memory_space<vmem>>, vector<2x96x32xf32>,
    %c0_113 = arith.constant 0 : index
    %c1_114 = arith.constant 1 : index
    %c0_115 = arith.constant 0 : index
    %102 = vector.load %arg15[%c0_113, %c1_114, %c0_115] : memref<2x112x32xf32, #tpu.memory_space<vmem>>, vector<2x96x32xf32>
    %c0_116 = arith.constant 0 : index
    %c0_117 = arith.constant 0 : index
    %c32 = arith.constant 32 : index
    %103 = vector.load %arg16[%c0_116, %c0_117, %c32] : memref<2x96x128xf32, #tpu.memory_space<vmem>>, vector<2x96x32xf32>
    tpu.vector_store %arg16[%c0_116, %c0_117, %c32], %102 {strides = array<i32>} : memref<2x96x128xf32, #tpu.memory_space<vmem>>, vector<2x96x32xf32>,
    %c0_118 = arith.constant 0 : index
    %c10 = arith.constant 10 : index
    %c0_119 = arith.constant 0 : index
    %104 = vector.load %arg15[%c0_118, %c10, %c0_119] : memref<2x112x32xf32, #tpu.memory_space<vmem>>, vector<2x96x32xf32>
    %c0_120 = arith.constant 0 : index
    %c0_121 = arith.constant 0 : index
    %c64 = arith.constant 64 : index
    %105 = vector.load %arg16[%c0_120, %c0_121, %c64] : memref<2x96x128xf32, #tpu.memory_space<vmem>>, vector<2x96x32xf32>
    tpu.vector_store %arg16[%c0_120, %c0_121, %c64], %104 {strides = array<i32>} : memref<2x96x128xf32, #tpu.memory_space<vmem>>, vector<2x96x32xf32>,
    %c0_122 = arith.constant 0 : index
    %c11_123 = arith.constant 11 : index
    %c0_124 = arith.constant 0 : index
    %106 = vector.load %arg15[%c0_122, %c11_123, %c0_124] : memref<2x112x32xf32, #tpu.memory_space<vmem>>, vector<2x96x32xf32>
    %c0_125 = arith.constant 0 : index
    %c0_126 = arith.constant 0 : index
    %c96 = arith.constant 96 : index
    %107 = vector.load %arg16[%c0_125, %c0_126, %c96] : memref<2x96x128xf32, #tpu.memory_space<vmem>>, vector<2x96x32xf32>
    tpu.vector_store %arg16[%c0_125, %c0_126, %c96], %106 {strides = array<i32>} : memref<2x96x128xf32, #tpu.memory_space<vmem>>, vector<2x96x32xf32>,
    %c0_127 = arith.constant 0 : index
    %c0_128 = arith.constant 0 : index
    %c0_129 = arith.constant 0 : index
    %108 = vector.load %arg16[%c0_127, %c0_128, %c0_129] : memref<2x96x128xf32, #tpu.memory_space<vmem>>, vector<1x96x128xf32>
    %109 = vector.shape_cast %108 : vector<1x96x128xf32> to vector<96x128xf32>
    %c0_130 = arith.constant 0 : index
    %c0_131 = arith.constant 0 : index
    %110 = vector.load %arg5[%c0_130, %c0_131] : memref<128x64xf32, #tpu.memory_space<vmem>>, vector<128x64xf32>
    %cst_132 = arith.constant dense<0.000000e+00> : vector<96x64xf32>
    %111 = tpu.matmul %109, %110, %cst_132 {dimension_numbers = #tpu.dot_dimension_numbers<[1], [0], [0], [1], [0, 0, 1, 1], [], []>} : vector<96x128xf32>, vector<128x64xf32>, vector<96x64xf32> -> vector<96x64xf32>
    %c0_133 = arith.constant 0 : index
    %c0_134 = arith.constant 0 : index
    %112 = vector.load %arg6[%c0_133, %c0_134] : memref<1x64xf32, #tpu.memory_space<vmem>>, vector<1x64xf32>
    %113 = vector.broadcast %112 : vector<1x64xf32> to vector<96x64xf32>
    %114 = arith.addf %111, %113 : vector<96x64xf32>
    %cst_135 = arith.constant 0.000000e+00 : f32
    %115 = vector.broadcast %cst_135 : f32 to vector<96x64xf32>
    %116 = arith.maximumf %114, %115 : vector<96x64xf32>
    %c0_136 = arith.constant 0 : index
    %c0_137 = arith.constant 0 : index
    %c0_138 = arith.constant 0 : index
    %117 = vector.load %arg17[%c0_136, %c0_137, %c0_138] : memref<2x96x64xf32, #tpu.memory_space<vmem>>, vector<1x96x64xf32>
    %118 = vector.shape_cast %117 : vector<1x96x64xf32> to vector<96x64xf32>
    %119 = vector.shape_cast %116 : vector<96x64xf32> to vector<1x96x64xf32>
    tpu.vector_store %arg17[%c0_136, %c0_137, %c0_138], %119 {strides = array<i32>} : memref<2x96x64xf32, #tpu.memory_space<vmem>>, vector<1x96x64xf32>,
    %c1_139 = arith.constant 1 : index
    %c0_140 = arith.constant 0 : index
    %c0_141 = arith.constant 0 : index
    %120 = vector.load %arg16[%c1_139, %c0_140, %c0_141] : memref<2x96x128xf32, #tpu.memory_space<vmem>>, vector<1x96x128xf32>
    %121 = vector.shape_cast %120 : vector<1x96x128xf32> to vector<96x128xf32>
    %c0_142 = arith.constant 0 : index
    %c0_143 = arith.constant 0 : index
    %122 = vector.load %arg5[%c0_142, %c0_143] : memref<128x64xf32, #tpu.memory_space<vmem>>, vector<128x64xf32>
    %cst_144 = arith.constant dense<0.000000e+00> : vector<96x64xf32>
    %123 = tpu.matmul %121, %122, %cst_144 {dimension_numbers = #tpu.dot_dimension_numbers<[1], [0], [0], [1], [0, 0, 1, 1], [], []>} : vector<96x128xf32>, vector<128x64xf32>, vector<96x64xf32> -> vector<96x64xf32>
    %c0_145 = arith.constant 0 : index
    %c0_146 = arith.constant 0 : index
    %124 = vector.load %arg6[%c0_145, %c0_146] : memref<1x64xf32, #tpu.memory_space<vmem>>, vector<1x64xf32>
    %125 = vector.broadcast %124 : vector<1x64xf32> to vector<96x64xf32>
    %126 = arith.addf %123, %125 : vector<96x64xf32>
    %cst_147 = arith.constant 0.000000e+00 : f32
    %127 = vector.broadcast %cst_147 : f32 to vector<96x64xf32>
    %128 = arith.maximumf %126, %127 : vector<96x64xf32>
    %c1_148 = arith.constant 1 : index
    %c0_149 = arith.constant 0 : index
    %c0_150 = arith.constant 0 : index
    %129 = vector.load %arg17[%c1_148, %c0_149, %c0_150] : memref<2x96x64xf32, #tpu.memory_space<vmem>>, vector<1x96x64xf32>
    %130 = vector.shape_cast %129 : vector<1x96x64xf32> to vector<96x64xf32>
    %131 = vector.shape_cast %128 : vector<96x64xf32> to vector<1x96x64xf32>
    tpu.vector_store %arg17[%c1_148, %c0_149, %c0_150], %131 {strides = array<i32>} : memref<2x96x64xf32, #tpu.memory_space<vmem>>, vector<1x96x64xf32>,
    %c0_151 = arith.constant 0 : index
    %c0_152 = arith.constant 0 : index
    %c0_153 = arith.constant 0 : index
    %132 = tpu.strided_load %arg17[%c0_151, %c0_152, %c0_153] {strides = array<i32: 1, 2, 1>} : memref<2x96x64xf32, #tpu.memory_space<vmem>>, vector<2x4x64xf32>
    %c0_154 = arith.constant 0 : index
    %c1_155 = arith.constant 1 : index
    %c0_156 = arith.constant 0 : index
    %133 = tpu.strided_load %arg17[%c0_154, %c1_155, %c0_156] {strides = array<i32: 1, 2, 1>} : memref<2x96x64xf32, #tpu.memory_space<vmem>>, vector<2x4x64xf32>
    %c0_157 = arith.constant 0 : index
    %c10_158 = arith.constant 10 : index
    %c0_159 = arith.constant 0 : index
    %134 = tpu.strided_load %arg17[%c0_157, %c10_158, %c0_159] {strides = array<i32: 1, 2, 1>} : memref<2x96x64xf32, #tpu.memory_space<vmem>>, vector<2x4x64xf32>
    %c0_160 = arith.constant 0 : index
    %c11_161 = arith.constant 11 : index
    %c0_162 = arith.constant 0 : index
    %135 = tpu.strided_load %arg17[%c0_160, %c11_161, %c0_162] {strides = array<i32: 1, 2, 1>} : memref<2x96x64xf32, #tpu.memory_space<vmem>>, vector<2x4x64xf32>
    %136 = arith.maximumf %132, %133 : vector<2x4x64xf32>
    %137 = arith.maximumf %134, %135 : vector<2x4x64xf32>
    %138 = arith.maximumf %136, %137 : vector<2x4x64xf32>
    %139 = vector.extract_strided_slice %138 {offsets = [0, 0, 0], sizes = [2, 1, 64], strides = [1, 1, 1]} : vector<2x4x64xf32> to vector<2x1x64xf32>
    %140 = vector.shape_cast %139 : vector<2x1x64xf32> to vector<2x64xf32>
    %c0_163 = arith.constant 0 : index
    %c0_164 = arith.constant 0 : index
    %141 = vector.load %arg18[%c0_163, %c0_164] : memref<2x1152xf32, #tpu.memory_space<vmem>>, vector<2x64xf32>
    tpu.vector_store %arg18[%c0_163, %c0_164], %140 {strides = array<i32>} : memref<2x1152xf32, #tpu.memory_space<vmem>>, vector<2x64xf32>,
    %142 = vector.extract_strided_slice %138 {offsets = [0, 1, 0], sizes = [2, 1, 64], strides = [1, 1, 1]} : vector<2x4x64xf32> to vector<2x1x64xf32>
    %143 = vector.shape_cast %142 : vector<2x1x64xf32> to vector<2x64xf32>
    %c0_165 = arith.constant 0 : index
    %c64_166 = arith.constant 64 : index
    %144 = vector.load %arg18[%c0_165, %c64_166] : memref<2x1152xf32, #tpu.memory_space<vmem>>, vector<2x64xf32>
    tpu.vector_store %arg18[%c0_165, %c64_166], %143 {strides = array<i32>} : memref<2x1152xf32, #tpu.memory_space<vmem>>, vector<2x64xf32>,
    %145 = vector.extract_strided_slice %138 {offsets = [0, 2, 0], sizes = [2, 1, 64], strides = [1, 1, 1]} : vector<2x4x64xf32> to vector<2x1x64xf32>
    %146 = vector.shape_cast %145 : vector<2x1x64xf32> to vector<2x64xf32>
    %c0_167 = arith.constant 0 : index
    %c128 = arith.constant 128 : index
    %147 = vector.load %arg18[%c0_167, %c128] : memref<2x1152xf32, #tpu.memory_space<vmem>>, vector<2x64xf32>
    tpu.vector_store %arg18[%c0_167, %c128], %146 {strides = array<i32>} : memref<2x1152xf32, #tpu.memory_space<vmem>>, vector<2x64xf32>,
    %148 = vector.extract_strided_slice %138 {offsets = [0, 3, 0], sizes = [2, 1, 64], strides = [1, 1, 1]} : vector<2x4x64xf32> to vector<2x1x64xf32>
    %149 = vector.shape_cast %148 : vector<2x1x64xf32> to vector<2x64xf32>
    %c0_168 = arith.constant 0 : index
    %c192 = arith.constant 192 : index
    %150 = vector.load %arg18[%c0_168, %c192] : memref<2x1152xf32, #tpu.memory_space<vmem>>, vector<2x64xf32>
    tpu.vector_store %arg18[%c0_168, %c192], %149 {strides = array<i32>} : memref<2x1152xf32, #tpu.memory_space<vmem>>, vector<2x64xf32>,
    %c0_169 = arith.constant 0 : index
    %c20 = arith.constant 20 : index
    %c0_170 = arith.constant 0 : index
    %151 = tpu.strided_load %arg17[%c0_169, %c20, %c0_170] {strides = array<i32: 1, 2, 1>} : memref<2x96x64xf32, #tpu.memory_space<vmem>>, vector<2x4x64xf32>
    %c0_171 = arith.constant 0 : index
    %c21_172 = arith.constant 21 : index
    %c0_173 = arith.constant 0 : index
    %152 = tpu.strided_load %arg17[%c0_171, %c21_172, %c0_173] {strides = array<i32: 1, 2, 1>} : memref<2x96x64xf32, #tpu.memory_space<vmem>>, vector<2x4x64xf32>
    %c0_174 = arith.constant 0 : index
    %c30 = arith.constant 30 : index
    %c0_175 = arith.constant 0 : index
    %153 = tpu.strided_load %arg17[%c0_174, %c30, %c0_175] {strides = array<i32: 1, 2, 1>} : memref<2x96x64xf32, #tpu.memory_space<vmem>>, vector<2x4x64xf32>
    %c0_176 = arith.constant 0 : index
    %c31_177 = arith.constant 31 : index
    %c0_178 = arith.constant 0 : index
    %154 = tpu.strided_load %arg17[%c0_176, %c31_177, %c0_178] {strides = array<i32: 1, 2, 1>} : memref<2x96x64xf32, #tpu.memory_space<vmem>>, vector<2x4x64xf32>
    %155 = arith.maximumf %151, %152 : vector<2x4x64xf32>
    %156 = arith.maximumf %153, %154 : vector<2x4x64xf32>
    %157 = arith.maximumf %155, %156 : vector<2x4x64xf32>
    %158 = vector.extract_strided_slice %157 {offsets = [0, 0, 0], sizes = [2, 1, 64], strides = [1, 1, 1]} : vector<2x4x64xf32> to vector<2x1x64xf32>
    %159 = vector.shape_cast %158 : vector<2x1x64xf32> to vector<2x64xf32>
    %c0_179 = arith.constant 0 : index
    %c256 = arith.constant 256 : index
    %160 = vector.load %arg18[%c0_179, %c256] : memref<2x1152xf32, #tpu.memory_space<vmem>>, vector<2x64xf32>
    tpu.vector_store %arg18[%c0_179, %c256], %159 {strides = array<i32>} : memref<2x1152xf32, #tpu.memory_space<vmem>>, vector<2x64xf32>,
    %161 = vector.extract_strided_slice %157 {offsets = [0, 1, 0], sizes = [2, 1, 64], strides = [1, 1, 1]} : vector<2x4x64xf32> to vector<2x1x64xf32>
    %162 = vector.shape_cast %161 : vector<2x1x64xf32> to vector<2x64xf32>
    %c0_180 = arith.constant 0 : index
    %c320 = arith.constant 320 : index
    %163 = vector.load %arg18[%c0_180, %c320] : memref<2x1152xf32, #tpu.memory_space<vmem>>, vector<2x64xf32>
    tpu.vector_store %arg18[%c0_180, %c320], %162 {strides = array<i32>} : memref<2x1152xf32, #tpu.memory_space<vmem>>, vector<2x64xf32>,
    %164 = vector.extract_strided_slice %157 {offsets = [0, 2, 0], sizes = [2, 1, 64], strides = [1, 1, 1]} : vector<2x4x64xf32> to vector<2x1x64xf32>
    %165 = vector.shape_cast %164 : vector<2x1x64xf32> to vector<2x64xf32>
    %c0_181 = arith.constant 0 : index
    %c384 = arith.constant 384 : index
    %166 = vector.load %arg18[%c0_181, %c384] : memref<2x1152xf32, #tpu.memory_space<vmem>>, vector<2x64xf32>
    tpu.vector_store %arg18[%c0_181, %c384], %165 {strides = array<i32>} : memref<2x1152xf32, #tpu.memory_space<vmem>>, vector<2x64xf32>,
    %167 = vector.extract_strided_slice %157 {offsets = [0, 3, 0], sizes = [2, 1, 64], strides = [1, 1, 1]} : vector<2x4x64xf32> to vector<2x1x64xf32>
    %168 = vector.shape_cast %167 : vector<2x1x64xf32> to vector<2x64xf32>
    %c0_182 = arith.constant 0 : index
    %c448 = arith.constant 448 : index
    %169 = vector.load %arg18[%c0_182, %c448] : memref<2x1152xf32, #tpu.memory_space<vmem>>, vector<2x64xf32>
    tpu.vector_store %arg18[%c0_182, %c448], %168 {strides = array<i32>} : memref<2x1152xf32, #tpu.memory_space<vmem>>, vector<2x64xf32>,
    %c0_183 = arith.constant 0 : index
    %c40 = arith.constant 40 : index
    %c0_184 = arith.constant 0 : index
    %170 = tpu.strided_load %arg17[%c0_183, %c40, %c0_184] {strides = array<i32: 1, 2, 1>} : memref<2x96x64xf32, #tpu.memory_space<vmem>>, vector<2x4x64xf32>
    %c0_185 = arith.constant 0 : index
    %c41_186 = arith.constant 41 : index
    %c0_187 = arith.constant 0 : index
    %171 = tpu.strided_load %arg17[%c0_185, %c41_186, %c0_187] {strides = array<i32: 1, 2, 1>} : memref<2x96x64xf32, #tpu.memory_space<vmem>>, vector<2x4x64xf32>
    %c0_188 = arith.constant 0 : index
    %c50 = arith.constant 50 : index
    %c0_189 = arith.constant 0 : index
    %172 = tpu.strided_load %arg17[%c0_188, %c50, %c0_189] {strides = array<i32: 1, 2, 1>} : memref<2x96x64xf32, #tpu.memory_space<vmem>>, vector<2x4x64xf32>
    %c0_190 = arith.constant 0 : index
    %c51_191 = arith.constant 51 : index
    %c0_192 = arith.constant 0 : index
    %173 = tpu.strided_load %arg17[%c0_190, %c51_191, %c0_192] {strides = array<i32: 1, 2, 1>} : memref<2x96x64xf32, #tpu.memory_space<vmem>>, vector<2x4x64xf32>
    %174 = arith.maximumf %170, %171 : vector<2x4x64xf32>
    %175 = arith.maximumf %172, %173 : vector<2x4x64xf32>
    %176 = arith.maximumf %174, %175 : vector<2x4x64xf32>
    %177 = vector.extract_strided_slice %176 {offsets = [0, 0, 0], sizes = [2, 1, 64], strides = [1, 1, 1]} : vector<2x4x64xf32> to vector<2x1x64xf32>
    %178 = vector.shape_cast %177 : vector<2x1x64xf32> to vector<2x64xf32>
    %c0_193 = arith.constant 0 : index
    %c512 = arith.constant 512 : index
    %179 = vector.load %arg18[%c0_193, %c512] : memref<2x1152xf32, #tpu.memory_space<vmem>>, vector<2x64xf32>
    tpu.vector_store %arg18[%c0_193, %c512], %178 {strides = array<i32>} : memref<2x1152xf32, #tpu.memory_space<vmem>>, vector<2x64xf32>,
    %180 = vector.extract_strided_slice %176 {offsets = [0, 1, 0], sizes = [2, 1, 64], strides = [1, 1, 1]} : vector<2x4x64xf32> to vector<2x1x64xf32>
    %181 = vector.shape_cast %180 : vector<2x1x64xf32> to vector<2x64xf32>
    %c0_194 = arith.constant 0 : index
    %c576 = arith.constant 576 : index
    %182 = vector.load %arg18[%c0_194, %c576] : memref<2x1152xf32, #tpu.memory_space<vmem>>, vector<2x64xf32>
    tpu.vector_store %arg18[%c0_194, %c576], %181 {strides = array<i32>} : memref<2x1152xf32, #tpu.memory_space<vmem>>, vector<2x64xf32>,
    %183 = vector.extract_strided_slice %176 {offsets = [0, 2, 0], sizes = [2, 1, 64], strides = [1, 1, 1]} : vector<2x4x64xf32> to vector<2x1x64xf32>
    %184 = vector.shape_cast %183 : vector<2x1x64xf32> to vector<2x64xf32>
    %c0_195 = arith.constant 0 : index
    %c640 = arith.constant 640 : index
    %185 = vector.load %arg18[%c0_195, %c640] : memref<2x1152xf32, #tpu.memory_space<vmem>>, vector<2x64xf32>
    tpu.vector_store %arg18[%c0_195, %c640], %184 {strides = array<i32>} : memref<2x1152xf32, #tpu.memory_space<vmem>>, vector<2x64xf32>,
    %186 = vector.extract_strided_slice %176 {offsets = [0, 3, 0], sizes = [2, 1, 64], strides = [1, 1, 1]} : vector<2x4x64xf32> to vector<2x1x64xf32>
    %187 = vector.shape_cast %186 : vector<2x1x64xf32> to vector<2x64xf32>
    %c0_196 = arith.constant 0 : index
    %c704 = arith.constant 704 : index
    %188 = vector.load %arg18[%c0_196, %c704] : memref<2x1152xf32, #tpu.memory_space<vmem>>, vector<2x64xf32>
    tpu.vector_store %arg18[%c0_196, %c704], %187 {strides = array<i32>} : memref<2x1152xf32, #tpu.memory_space<vmem>>, vector<2x64xf32>,
    %c0_197 = arith.constant 0 : index
    %c60 = arith.constant 60 : index
    %c0_198 = arith.constant 0 : index
    %189 = tpu.strided_load %arg17[%c0_197, %c60, %c0_198] {strides = array<i32: 1, 2, 1>} : memref<2x96x64xf32, #tpu.memory_space<vmem>>, vector<2x4x64xf32>
    %c0_199 = arith.constant 0 : index
    %c61_200 = arith.constant 61 : index
    %c0_201 = arith.constant 0 : index
    %190 = tpu.strided_load %arg17[%c0_199, %c61_200, %c0_201] {strides = array<i32: 1, 2, 1>} : memref<2x96x64xf32, #tpu.memory_space<vmem>>, vector<2x4x64xf32>
    %c0_202 = arith.constant 0 : index
    %c70 = arith.constant 70 : index
    %c0_203 = arith.constant 0 : index
    %191 = tpu.strided_load %arg17[%c0_202, %c70, %c0_203] {strides = array<i32: 1, 2, 1>} : memref<2x96x64xf32, #tpu.memory_space<vmem>>, vector<2x4x64xf32>
    %c0_204 = arith.constant 0 : index
    %c71_205 = arith.constant 71 : index
    %c0_206 = arith.constant 0 : index
    %192 = tpu.strided_load %arg17[%c0_204, %c71_205, %c0_206] {strides = array<i32: 1, 2, 1>} : memref<2x96x64xf32, #tpu.memory_space<vmem>>, vector<2x4x64xf32>
    %193 = arith.maximumf %189, %190 : vector<2x4x64xf32>
    %194 = arith.maximumf %191, %192 : vector<2x4x64xf32>
    %195 = arith.maximumf %193, %194 : vector<2x4x64xf32>
    %196 = vector.extract_strided_slice %195 {offsets = [0, 0, 0], sizes = [2, 1, 64], strides = [1, 1, 1]} : vector<2x4x64xf32> to vector<2x1x64xf32>
    %197 = vector.shape_cast %196 : vector<2x1x64xf32> to vector<2x64xf32>
    %c0_207 = arith.constant 0 : index
    %c768 = arith.constant 768 : index
    %198 = vector.load %arg18[%c0_207, %c768] : memref<2x1152xf32, #tpu.memory_space<vmem>>, vector<2x64xf32>
    tpu.vector_store %arg18[%c0_207, %c768], %197 {strides = array<i32>} : memref<2x1152xf32, #tpu.memory_space<vmem>>, vector<2x64xf32>,
    %199 = vector.extract_strided_slice %195 {offsets = [0, 1, 0], sizes = [2, 1, 64], strides = [1, 1, 1]} : vector<2x4x64xf32> to vector<2x1x64xf32>
    %200 = vector.shape_cast %199 : vector<2x1x64xf32> to vector<2x64xf32>
    %c0_208 = arith.constant 0 : index
    %c832 = arith.constant 832 : index
    %201 = vector.load %arg18[%c0_208, %c832] : memref<2x1152xf32, #tpu.memory_space<vmem>>, vector<2x64xf32>
    tpu.vector_store %arg18[%c0_208, %c832], %200 {strides = array<i32>} : memref<2x1152xf32, #tpu.memory_space<vmem>>, vector<2x64xf32>,
    %202 = vector.extract_strided_slice %195 {offsets = [0, 2, 0], sizes = [2, 1, 64], strides = [1, 1, 1]} : vector<2x4x64xf32> to vector<2x1x64xf32>
    %203 = vector.shape_cast %202 : vector<2x1x64xf32> to vector<2x64xf32>
    %c0_209 = arith.constant 0 : index
    %c896 = arith.constant 896 : index
    %204 = vector.load %arg18[%c0_209, %c896] : memref<2x1152xf32, #tpu.memory_space<vmem>>, vector<2x64xf32>
    tpu.vector_store %arg18[%c0_209, %c896], %203 {strides = array<i32>} : memref<2x1152xf32, #tpu.memory_space<vmem>>, vector<2x64xf32>,
    %205 = vector.extract_strided_slice %195 {offsets = [0, 3, 0], sizes = [2, 1, 64], strides = [1, 1, 1]} : vector<2x4x64xf32> to vector<2x1x64xf32>
    %206 = vector.shape_cast %205 : vector<2x1x64xf32> to vector<2x64xf32>
    %c0_210 = arith.constant 0 : index
    %c960 = arith.constant 960 : index
    %207 = vector.load %arg18[%c0_210, %c960] : memref<2x1152xf32, #tpu.memory_space<vmem>>, vector<2x64xf32>
    tpu.vector_store %arg18[%c0_210, %c960], %206 {strides = array<i32>} : memref<2x1152xf32, #tpu.memory_space<vmem>>, vector<2x64xf32>,
    %c0_211 = arith.constant 0 : index
    %c0_212 = arith.constant 0 : index
    %208 = vector.load %arg2[%c0_211, %c0_212] : memref<2x2xf32, #tpu.memory_space<vmem>>, vector<2x1xf32>
    %c0_213 = arith.constant 0 : index
    %c0_214 = arith.constant 0 : index
    %209 = vector.load %arg7[%c0_213, %c0_214] : memref<2x128xf32, #tpu.memory_space<vmem>>, vector<1x128xf32>
    %210 = vector.shape_cast %209 : vector<1x128xf32> to vector<128xf32>
    %211 = vector.shape_cast %210 : vector<128xf32> to vector<1x128xf32>
    %212 = vector.broadcast %208 : vector<2x1xf32> to vector<2x128xf32>
    %213 = vector.broadcast %211 : vector<1x128xf32> to vector<2x128xf32>
    %214 = arith.mulf %212, %213 : vector<2x128xf32>
    %c0_215 = arith.constant 0 : index
    %c1_216 = arith.constant 1 : index
    %215 = vector.load %arg2[%c0_215, %c1_216] : memref<2x2xf32, #tpu.memory_space<vmem>>, vector<2x1xf32>
    %c1_217 = arith.constant 1 : index
    %c0_218 = arith.constant 0 : index
    %216 = vector.load %arg7[%c1_217, %c0_218] : memref<2x128xf32, #tpu.memory_space<vmem>>, vector<1x128xf32>
    %217 = vector.shape_cast %216 : vector<1x128xf32> to vector<128xf32>
    %218 = vector.shape_cast %217 : vector<128xf32> to vector<1x128xf32>
    %219 = vector.broadcast %215 : vector<2x1xf32> to vector<2x128xf32>
    %220 = vector.broadcast %218 : vector<1x128xf32> to vector<2x128xf32>
    %221 = arith.mulf %219, %220 : vector<2x128xf32>
    %222 = arith.addf %214, %221 : vector<2x128xf32>
    %c0_219 = arith.constant 0 : index
    %c0_220 = arith.constant 0 : index
    %223 = vector.load %arg8[%c0_219, %c0_220] : memref<1x128xf32, #tpu.memory_space<vmem>>, vector<1x128xf32>
    %224 = vector.broadcast %223 : vector<1x128xf32> to vector<2x128xf32>
    %225 = arith.addf %222, %224 : vector<2x128xf32>
    %cst_221 = arith.constant 0.000000e+00 : f32
    %226 = vector.broadcast %cst_221 : f32 to vector<2x128xf32>
    %227 = arith.maximumf %225, %226 : vector<2x128xf32>
    %c0_222 = arith.constant 0 : index
    %c1024 = arith.constant 1024 : index
    %228 = vector.load %arg18[%c0_222, %c1024] : memref<2x1152xf32, #tpu.memory_space<vmem>>, vector<2x128xf32>
    tpu.vector_store %arg18[%c0_222, %c1024], %227 {strides = array<i32>} : memref<2x1152xf32, #tpu.memory_space<vmem>>, vector<2x128xf32>,
    %c0_223 = arith.constant 0 : index
    %c0_224 = arith.constant 0 : index
    %229 = vector.load %arg18[%c0_223, %c0_224] : memref<2x1152xf32, #tpu.memory_space<vmem>>, vector<2x1152xf32>
    %c0_225 = arith.constant 0 : index
    %c0_226 = arith.constant 0 : index
    %230 = vector.load %arg9[%c0_225, %c0_226] : memref<1152x32xf32, #tpu.memory_space<vmem>>, vector<1152x32xf32>
    %cst_227 = arith.constant dense<0.000000e+00> : vector<2x32xf32>
    %231 = tpu.matmul %229, %230, %cst_227 {dimension_numbers = #tpu.dot_dimension_numbers<[1], [0], [0], [1], [0, 0, 1, 1], [], []>} : vector<2x1152xf32>, vector<1152x32xf32>, vector<2x32xf32> -> vector<2x32xf32>
    %c0_228 = arith.constant 0 : index
    %c0_229 = arith.constant 0 : index
    %232 = vector.load %arg10[%c0_228, %c0_229] : memref<1x32xf32, #tpu.memory_space<vmem>>, vector<1x32xf32>
    %233 = vector.broadcast %232 : vector<1x32xf32> to vector<2x32xf32>
    %234 = arith.addf %231, %233 : vector<2x32xf32>
    %cst_230 = arith.constant 0.000000e+00 : f32
    %235 = vector.broadcast %cst_230 : f32 to vector<2x32xf32>
    %236 = arith.maximumf %234, %235 : vector<2x32xf32>
    %c0_231 = arith.constant 0 : index
    %c0_232 = arith.constant 0 : index
    %237 = vector.load %arg11[%c0_231, %c0_232] : memref<32x2xf32, #tpu.memory_space<vmem>>, vector<32x2xf32>
    %cst_233 = arith.constant dense<0.000000e+00> : vector<2x2xf32>
    %238 = tpu.matmul %236, %237, %cst_233 {dimension_numbers = #tpu.dot_dimension_numbers<[1], [0], [0], [1], [0, 0, 1, 1], [], []>} : vector<2x32xf32>, vector<32x2xf32>, vector<2x2xf32> -> vector<2x2xf32>
    %c0_234 = arith.constant 0 : index
    %c0_235 = arith.constant 0 : index
    %239 = vector.load %arg12[%c0_234, %c0_235] : memref<1x2xf32, #tpu.memory_space<vmem>>, vector<1x2xf32>
    %240 = vector.broadcast %239 : vector<1x2xf32> to vector<2x2xf32>
    %241 = arith.addf %238, %240 : vector<2x2xf32>
    %242 = math.tanh %241 : vector<2x2xf32>
    %c0_236 = arith.constant 0 : index
    %c0_237 = arith.constant 0 : index
    %243 = vector.load %arg13[%c0_236, %c0_237] : memref<2x2xf32, #tpu.memory_space<vmem>>, vector<2x2xf32>
    tpu.vector_store %arg13[%c0_236, %c0_237], %242 {strides = array<i32>} : memref<2x2xf32, #tpu.memory_space<vmem>>, vector<2x2xf32>,
    return
  }
  func.func @transform_0(%arg0: i32) -> (i32, i32, i32) {
    %c0_i32 = arith.constant 0 : i32
    %c0_i32_0 = arith.constant 0 : i32
    %c0_i32_1 = arith.constant 0 : i32
    return %arg0, %c0_i32, %c0_i32_0 : i32, i32, i32
  }
  func.func @transform_1(%arg0: i32) -> (i32, i32) {
    %c0_i32 = arith.constant 0 : i32
    %c0_i32_0 = arith.constant 0 : i32
    return %arg0, %c0_i32 : i32, i32
  }
  func.func @transform_2(%arg0: i32) -> (i32, i32) {
    %c0_i32 = arith.constant 0 : i32
    %c0_i32_0 = arith.constant 0 : i32
    %c0_i32_1 = arith.constant 0 : i32
    return %c0_i32, %c0_i32_0 : i32, i32
  }
  func.func @transform_3(%arg0: i32) -> (i32, i32) {
    %c0_i32 = arith.constant 0 : i32
    %c0_i32_0 = arith.constant 0 : i32
    %c0_i32_1 = arith.constant 0 : i32
    return %c0_i32, %c0_i32_0 : i32, i32
  }
  func.func @transform_4(%arg0: i32) -> (i32, i32) {
    %c0_i32 = arith.constant 0 : i32
    %c0_i32_0 = arith.constant 0 : i32
    %c0_i32_1 = arith.constant 0 : i32
    return %c0_i32, %c0_i32_0 : i32, i32
  }
  func.func @transform_5(%arg0: i32) -> (i32, i32) {
    %c0_i32 = arith.constant 0 : i32
    %c0_i32_0 = arith.constant 0 : i32
    %c0_i32_1 = arith.constant 0 : i32
    return %c0_i32, %c0_i32_0 : i32, i32
  }
  func.func @transform_6(%arg0: i32) -> (i32, i32) {
    %c0_i32 = arith.constant 0 : i32
    %c0_i32_0 = arith.constant 0 : i32
    %c0_i32_1 = arith.constant 0 : i32
    return %c0_i32, %c0_i32_0 : i32, i32
  }
  func.func @transform_7(%arg0: i32) -> (i32, i32) {
    %c0_i32 = arith.constant 0 : i32
    %c0_i32_0 = arith.constant 0 : i32
    %c0_i32_1 = arith.constant 0 : i32
    return %c0_i32, %c0_i32_0 : i32, i32
  }
  func.func @transform_8(%arg0: i32) -> (i32, i32) {
    %c0_i32 = arith.constant 0 : i32
    %c0_i32_0 = arith.constant 0 : i32
    %c0_i32_1 = arith.constant 0 : i32
    return %c0_i32, %c0_i32_0 : i32, i32
  }
  func.func @transform_9(%arg0: i32) -> (i32, i32) {
    %c0_i32 = arith.constant 0 : i32
    %c0_i32_0 = arith.constant 0 : i32
    %c0_i32_1 = arith.constant 0 : i32
    return %c0_i32, %c0_i32_0 : i32, i32
  }
  func.func @transform_10(%arg0: i32) -> (i32, i32) {
    %c0_i32 = arith.constant 0 : i32
    %c0_i32_0 = arith.constant 0 : i32
    %c0_i32_1 = arith.constant 0 : i32
    return %c0_i32, %c0_i32_0 : i32, i32
  }
  func.func @transform_11(%arg0: i32) -> (i32, i32) {
    %c0_i32 = arith.constant 0 : i32
    %c0_i32_0 = arith.constant 0 : i32
    %c0_i32_1 = arith.constant 0 : i32
    return %c0_i32, %c0_i32_0 : i32, i32
  }
  func.func @transform_12(%arg0: i32) -> (i32, i32) {
    %c0_i32 = arith.constant 0 : i32
    %c0_i32_0 = arith.constant 0 : i32
    return %arg0, %c0_i32 : i32, i32
  }
}

</mosaic_0001>

<bundles_post_ra>
// kernel: actor_forward.1
= control target key start
LH: loop header
LB: loop body
LE: loop exit
PB: predicated region body
PF: predicated region fallthrough
CT: control target
= control target key end

     0   :  { %vm1068_vm0 = vcmask 261120   ;;  %v2876_v2 = vmov 0.0   ;;  %s2877_s13 = smov 32   ;;  %s2878_s26 = smov 96   ;;  %s5263_s0 = inlined_call_operand.vmem [shape: f32[2,325,32], index: 0, kind: input, shape index: {}]   ;;  %s5264_s1 = inlined_call_operand.vmem [shape: f32[2,2], index: 1, kind: input, shape index: {}]   ;;  %s5265_s2 = inlined_call_operand.vmem [shape: f32[4,32], index: 2, kind: input, shape index: {}]   ;;  %s5266_s3 = inlined_call_operand.vmem [shape: f32[1,32], index: 3, kind: input, shape index: {}]   ;;  %s5267_s4 = inlined_call_operand.vmem [shape: f32[128,64], index: 4, kind: input, shape index: {}]   ;;  %s5268_s5 = inlined_call_operand.vmem [shape: f32[1,64], index: 5, kind: input, shape index: {}]   ;;  %s5269_s6 = inlined_call_operand.vmem [shape: f32[2,128], index: 6, kind: input, shape index: {}]   ;;  %s5270_s7 = inlined_call_operand.vmem [shape: f32[1,128], index: 7, kind: input, shape index: {}]   ;;  %s5271_s8 = inlined_call_operand.vmem [shape: f32[1152,32], index: 8, kind: input, shape index: {}]   ;;  %s5272_s9 = inlined_call_operand.vmem [shape: f32[1,32], index: 9, kind: input, shape index: {}]   ;;  %s5273_s10 = inlined_call_operand.vmem [shape: f32[32,2], index: 10, kind: input, shape index: {}]   ;;  %s5274_s11 = inlined_call_operand.vmem [shape: f32[1,2], index: 11, kind: input, shape index: {}]   ;;  %s5275_s12 = inlined_call_operand.hbm [shape: f32[2,2], index: 12, kind: output, shape index: {}]  }
   0x1   :  { %v42_v0 = vld [vmem:[%s5263_s0] sm:$0xff]  ;;  %v43_v1 = vld [vmem:[%s5263_s0 + $0x8] sm:$0xff]  ;;  %1162 = vst.msk [vmem:[#allocation3 + $0x70] sm:$0xff] %vm1068_vm0, %v2876_v2  ;;  %v44_v3 = vld [vmem:[%s5263_s0 + $0x10] sm:$0xff]  ;;  %s2879_s27 = smov 64  }
   0x2   :  { %v45_v4 = vld [vmem:[%s5263_s0 + $0x18] sm:$0xff]  ;;  %1163 = vst.msk [vmem:[#allocation3 + $0x78] sm:$0xff] %vm1068_vm0, %v2876_v2  ;;  %v46_v5 = vld [vmem:[%s5263_s0 + $0x20] sm:$0xff]  ;;  %v201_v8 = vld [vmem:[%s5263_s0 + $0x9] sm:$0xff] }
   0x3   :  { %v2970_v6 = vld [vmem:[%s5265_s2] ss:$0 sm:$0xff]  ;;  %v200_v7 = vld [vmem:[%s5263_s0 + $0x1] sm:$0xff]  ;;  %1148 = vst.msk [vmem:[#allocation3] sm:$0xff] %vm1068_vm0, %v2876_v2  ;;  %v202_v9 = vld [vmem:[%s5263_s0 + $0x11] sm:$0xff] }
   0x4   :  { %v203_v10 = vld [vmem:[%s5263_s0 + $0x19] sm:$0xff]  ;;  %1149 = vst.msk [vmem:[#allocation3 + $0x8] sm:$0xff] %vm1068_vm0, %v2876_v2  ;;  %v122_v11 = vmul.f32 %v2970_v6, %v42_v0  ;;  %v123_v12 = vmul.f32 %v2970_v6, %v43_v1  ;;  %v124_v13 = vmul.f32 %v2970_v6, %v44_v3  ;;  %v125_v14 = vmul.f32 %v2970_v6, %v45_v4  ;;  %v204_v15 = vld [vmem:[%s5263_s0 + $0x21] sm:$0xff]  ;;  %v439_v25 = vld [vmem:[%s5263_s0 + $0x2a] sm:$0xff] }
   0x5   :  { %v2998_v16 = vld [vmem:[%s5265_s2 + $0x1] ss:$0 sm:$0xff]  ;;  %1150 = vst.msk [vmem:[#allocation3 + $0x10] sm:$0xff] %vm1068_vm0, %v2876_v2  ;;  %v126_v17 = vmul.f32 %v2970_v6, %v46_v5  ;;  %v436_v18 = vld [vmem:[%s5263_s0 + $0x12] sm:$0xff]  ;;  %v438_v20 = vld [vmem:[%s5263_s0 + $0x22] sm:$0xff] }
   0x6   :  { %v437_v19 = vld [vmem:[%s5263_s0 + $0x1a] sm:$0xff]  ;;  %1151 = vst.msk [vmem:[#allocation3 + $0x18] sm:$0xff] %vm1068_vm0, %v2876_v2  ;;  %v280_v21 = vmul.f32 %v2998_v16, %v200_v7  ;;  %v281_v22 = vmul.f32 %v2998_v16, %v201_v8  ;;  %v282_v23 = vmul.f32 %v2998_v16, %v202_v9  ;;  %v283_v24 = vmul.f32 %v2998_v16, %v203_v10  ;;  %v3024_v26 = vld [vmem:[%s5265_s2 + $0x2] ss:$0 sm:$0xff]  ;;  %v440_v28 = vld [vmem:[%s5263_s0 + $0x32] sm:$0xff] }
   0x7   :  { %1152 = vst.msk [vmem:[#allocation3 + $0x20] sm:$0xff] %vm1068_vm0, %v2876_v2  ;;  %v284_v27 = vmul.f32 %v2998_v16, %v204_v15  ;;  %v672_v29 = vld [vmem:[%s5263_s0 + $0x13] sm:$0xff]  ;;  %v673_v30 = vld [vmem:[%s5263_s0 + $0x1b] sm:$0xff]  ;;  %v674_v35 = vld [vmem:[%s5263_s0 + $0x23] sm:$0xff]  ;;  %v516_v39 = vmul.f32 %v3024_v26, %v436_v18  ;;  %v517_v40 = vmul.f32 %v3024_v26, %v437_v19  ;;  %v518_v41 = vmul.f32 %v3024_v26, %v438_v20 }
   0x8   :  { %1153 = vst.msk [vmem:[#allocation3 + $0x28] sm:$0xff] %vm1068_vm0, %v2876_v2  ;;  %v358_v31 = vadd.f32 %v280_v21, %v122_v11  ;;  %v359_v32 = vadd.f32 %v281_v22, %v123_v12  ;;  %v360_v33 = vadd.f32 %v282_v23, %v124_v13  ;;  %v361_v34 = vadd.f32 %v283_v24, %v125_v14  ;;  %v675_v36 = vld [vmem:[%s5263_s0 + $0x2b] sm:$0xff]  ;;  %v3054_v42 = vld [vmem:[%s5265_s2 + $0x3] ss:$0 sm:$0xff]  ;;  %v676_v45 = vld [vmem:[%s5263_s0 + $0x33] sm:$0xff] }
   0x9   :  { %v1427_v37 = vld [vmem:[#allocation3 + $0x71] sm:$0xff]  ;;  %1154 = vst.msk [vmem:[#allocation3 + $0x30] sm:$0xff] %vm1068_vm0, %v2876_v2  ;;  %v362_v38 = vadd.f32 %v284_v27, %v126_v17  ;;  %v519_v43 = vmul.f32 %v3024_v26, %v439_v25  ;;  %v520_v44 = vmul.f32 %v3024_v26, %v440_v28  ;;  %v3067_v46 = vld [vmem:[%s5266_s3] ss:$0 sm:$0xff]  ;;  %v752_v52 = vmul.f32 %v3054_v42, %v672_v29  ;;  %v49_v54 = vld [vmem:[%s5263_s0 + $0x38] sm:$0xff] }
   0xa   :  { %1487 = vrot.lane.b32.xlu1 %v1427_v37, %s2877_s13  ;;  %1155 = vst.msk [vmem:[#allocation3 + $0x38] sm:$0xff] %vm1068_vm0, %v2876_v2  ;;  %v47_v47 = vld [vmem:[%s5263_s0 + $0x28] sm:$0xff]  ;;  %v594_v49 = vadd.f32 %v516_v39, %v358_v31  ;;  %v595_v50 = vadd.f32 %v517_v40, %v359_v32  ;;  %v596_v51 = vadd.f32 %v518_v41, %v360_v33  ;;  %v48_v53 = vld [vmem:[%s5263_s0 + $0x30] sm:$0xff]  ;;  %v50_v62 = vld [vmem:[%s5263_s0 + $0x40] sm:$0xff] }
   0xb   :  { %1156 = vst.msk [vmem:[#allocation3 + $0x40] sm:$0xff] %vm1068_vm0, %v2876_v2  ;;  %v1415_v48 = vld [vmem:[#allocation3 + $0x1] sm:$0xff]  ;;  %v597_v55 = vadd.f32 %v519_v43, %v361_v34  ;;  %v598_v56 = vadd.f32 %v520_v44, %v362_v38  ;;  %v753_v57 = vmul.f32 %v3054_v42, %v673_v30  ;;  %v754_v58 = vmul.f32 %v3054_v42, %v674_v35  ;;  %v205_v63 = vld [vmem:[%s5263_s0 + $0x29] sm:$0xff]  ;;  %v206_v0 = vld [vmem:[%s5263_s0 + $0x31] sm:$0xff] }
   0xc   :  { %1157 = vst.msk [vmem:[#allocation3 + $0x48] sm:$0xff] %vm1068_vm0, %v2876_v2  ;;  %1463 = vrot.lane.b32.xlu0 %v1415_v48, %s2877_s13  ;;  %v755_v59 = vmul.f32 %v3054_v42, %v675_v36  ;;  %v756_v60 = vmul.f32 %v3054_v42, %v676_v45  ;;  %v830_v61 = vadd.f32 %v752_v52, %v594_v49  ;;  %v207_v11 = vld [vmem:[%s5263_s0 + $0x39] sm:$0xff]  ;;  %v208_v12 = vld [vmem:[%s5263_s0 + $0x41] sm:$0xff]  ;;  %v443_v24 = vld [vmem:[%s5263_s0 + $0x4a] sm:$0xff] }
   0xd   :  { %1158 = vst.msk [vmem:[#allocation3 + $0x50] sm:$0xff] %vm1068_vm0, %v2876_v2  ;;  %v831_v1 = vadd.f32 %v753_v57, %v595_v50  ;;  %v127_v3 = vmul.f32 %v2970_v6, %v47_v47  ;;  %v128_v4 = vmul.f32 %v2970_v6, %v48_v53  ;;  %v129_v5 = vmul.f32 %v2970_v6, %v49_v54  ;;  %v441_v22 = vld [vmem:[%s5263_s0 + $0x3a] sm:$0xff]  ;;  %v442_v23 = vld [vmem:[%s5263_s0 + $0x42] sm:$0xff]  ;;  %v444_v30 = vld [vmem:[%s5263_s0 + $0x52] sm:$0xff] }
   0xe   :  { %1159 = vst.msk [vmem:[#allocation3 + $0x58] sm:$0xff] %vm1068_vm0, %v2876_v2  ;;  %v832_v7 = vadd.f32 %v754_v58, %v596_v51  ;;  %v833_v8 = vadd.f32 %v755_v59, %v597_v55  ;;  %v834_v9 = vadd.f32 %v756_v60, %v598_v56  ;;  %v3107_v10 = vadd.f32 %v3067_v46, %v830_v61  ;;  %v677_v31 = vld [vmem:[%s5263_s0 + $0x3b] sm:$0xff]  ;;  %v678_v32 = vld [vmem:[%s5263_s0 + $0x43] sm:$0xff]  ;;  %v679_v37 = vld [vmem:[%s5263_s0 + $0x4b] sm:$0xff] }
   0xf   :  { %1160 = vst.msk [vmem:[#allocation3 + $0x60] sm:$0xff] %vm1068_vm0, %v2876_v2  ;;  %v3118_v13 = vadd.f32 %v3067_v46, %v831_v1  ;;  %v130_v14 = vmul.f32 %v2970_v6, %v50_v62  ;;  %v285_v15 = vmul.f32 %v2998_v16, %v205_v63  ;;  %v286_v17 = vmul.f32 %v2998_v16, %v206_v0  ;;  %v680_v38 = vld [vmem:[%s5263_s0 + $0x53] sm:$0xff]  ;;  %v81_v44 = vld [vmem:[%s5263_s0 + $0x148] sm:$0xff]  ;;  %v84_v52 = vld [vmem:[%s5263_s0 + $0x160] sm:$0xff] }
  0x10   :  { %1161 = vst.msk [vmem:[#allocation3 + $0x68] sm:$0xff] %vm1068_vm0, %v2876_v2  ;;  %v3126_v18 = vadd.f32 %v3067_v46, %v832_v7  ;;  %v3129_v19 = vadd.f32 %v3067_v46, %v833_v8  ;;  %v3132_v20 = vadd.f32 %v3067_v46, %v834_v9  ;;  %v990_v21 = vmax.f32 %v3107_v10, 0.0  ;;  %v82_v45 = vld [vmem:[%s5263_s0 + $0x150] sm:$0xff]  ;;  %v83_v51 = vld [vmem:[%s5263_s0 + $0x158] sm:$0xff]  ;;  %v85_v57 = vld [vmem:[%s5263_s0 + $0x168] sm:$0xff] }
  0x11   :  { %1164 = vst.msk [vmem:[#allocation3 + $0x80] sm:$0xff] %vm1068_vm0, %v2876_v2  ;;  %v991_v25 = vmax.f32 %v3118_v13, 0.0  ;;  %v287_v27 = vmul.f32 %v2998_v16, %v207_v11  ;;  %v288_v28 = vmul.f32 %v2998_v16, %v208_v12  ;;  %v363_v29 = vadd.f32 %v285_v15, %v127_v3  ;;  %v86_v58 = vld [vmem:[%s5263_s0 + $0x170] sm:$0xff]  ;;  %v87_v61 = vld [vmem:[%s5263_s0 + $0x178] sm:$0xff]  ;;  %v88_v62 = vld [vmem:[%s5263_s0 + $0x180] sm:$0xff] }
  0x12   :  { %1165 = vst.msk [vmem:[#allocation3 + $0x88] sm:$0xff] %vm1068_vm0, %v2876_v2  ;;  %v992_v33 = vmax.f32 %v3126_v18, 0.0  ;;  %v993_v34 = vmax.f32 %v3129_v19, 0.0  ;;  %v994_v35 = vmax.f32 %v3132_v20, 0.0  ;;  %v364_v36 = vadd.f32 %v286_v17, %v128_v4  ;;  %v89_v4 = vld [vmem:[%s5263_s0 + $0x188] sm:$0xff]  ;;  %v240_v15 = vld [vmem:[%s5263_s0 + $0x151] sm:$0xff] }
  0x13   :  { %1166 = vst.msk [vmem:[#allocation3 + $0x90] sm:$0xff] %vm1068_vm0, %v2876_v2  ;;  %v365_v39 = vadd.f32 %v287_v27, %v129_v5  ;;  %v366_v40 = vadd.f32 %v288_v28, %v130_v14  ;;  %v521_v41 = vmul.f32 %v3024_v26, %v441_v22  ;;  %v522_v43 = vmul.f32 %v3024_v26, %v442_v23  ;;  %v239_v8 = vld [vmem:[%s5263_s0 + $0x149] sm:$0xff]  ;;  %v241_v17 = vld [vmem:[%s5263_s0 + $0x159] sm:$0xff]  ;;  %v242_v28 = vld [vmem:[%s5263_s0 + $0x161] sm:$0xff] }
  0x14   :  { %1167 = vst.msk [vmem:[#allocation3 + $0x98] sm:$0xff] %vm1068_vm0, %v2876_v2  ;;  %v523_v47 = vmul.f32 %v3024_v26, %v443_v24  ;;  %v524_v48 = vmul.f32 %v3024_v26, %v444_v30  ;;  %v757_v49 = vmul.f32 %v3054_v42, %v677_v31  ;;  %v758_v50 = vmul.f32 %v3054_v42, %v678_v32  ;;  %v244_v30 = vld [vmem:[%s5263_s0 + $0x171] sm:$0xff]  ;;  %v711_v20 = vld [vmem:[%s5263_s0 + $0x15b] sm:$0xff] }
  0x15   :  { %1168 = vst.msk [vmem:[#allocation3 + $0xa0] sm:$0xff] %vm1068_vm0, %v2876_v2  ;;  %v599_v53 = vadd.f32 %v521_v41, %v363_v29  ;;  %v600_v54 = vadd.f32 %v522_v43, %v364_v36  ;;  %v759_v55 = vmul.f32 %v3054_v42, %v679_v37  ;;  %v760_v56 = vmul.f32 %v3054_v42, %v680_v38  ;;  %v243_v29 = vld [vmem:[%s5263_s0 + $0x169] sm:$0xff]  ;;  %v245_v37 = vld [vmem:[%s5263_s0 + $0x179] sm:$0xff]  ;;  %v246_v38 = vld [vmem:[%s5263_s0 + $0x181] sm:$0xff] }
  0x16   :  { %1169 = vst.msk [vmem:[#allocation3 + $0xa8] sm:$0xff] %vm1068_vm0, %v2876_v2  ;;  %v601_v59 = vadd.f32 %v523_v47, %v365_v39  ;;  %v602_v60 = vadd.f32 %v524_v48, %v366_v40  ;;  %v161_v63 = vmul.f32 %v2970_v6, %v81_v44  ;;  %v162_v0 = vmul.f32 %v2970_v6, %v82_v45  ;;  %v247_v39 = vld [vmem:[%s5263_s0 + $0x189] sm:$0xff]  ;;  %v478_v13 = vld [vmem:[%s5263_s0 + $0x172] sm:$0xff] }
  0x17   :  { %1170 = vst.msk [vmem:[#allocation3 + $0xb0] sm:$0xff] %vm1068_vm0, %v2876_v2  ;;  %v835_v1 = vadd.f32 %v757_v49, %v599_v53  ;;  %v836_v3 = vadd.f32 %v758_v50, %v600_v54  ;;  %v163_v5 = vmul.f32 %v2970_v6, %v83_v51  ;;  %v164_v7 = vmul.f32 %v2970_v6, %v84_v52  ;;  %v476_v53 = vld [vmem:[%s5263_s0 + $0x162] sm:$0xff]  ;;  %v477_v54 = vld [vmem:[%s5263_s0 + $0x16a] sm:$0xff] }
  0x18   :  { %1171 = vst.msk [vmem:[#allocation3 + $0xb8] sm:$0xff] %vm1068_vm0, %v2876_v2  ;;  %v837_v9 = vadd.f32 %v759_v55, %v601_v59  ;;  %v838_v11 = vadd.f32 %v760_v56, %v602_v60  ;;  %v165_v12 = vmul.f32 %v2970_v6, %v85_v57  ;;  %v166_v14 = vmul.f32 %v2970_v6, %v86_v58  ;;  %v479_v58 = vld [vmem:[%s5263_s0 + $0x17a] sm:$0xff]  ;;  %v480_v59 = vld [vmem:[%s5263_s0 + $0x182] sm:$0xff]  ;;  %v481_v60 = vld [vmem:[%s5263_s0 + $0x18a] sm:$0xff] }
  0x19   :  { %1172 = vst.msk [vmem:[#allocation3 + $0xc0] sm:$0xff] %vm1068_vm0, %v2876_v2  ;;  %v917_v22 = vadd.f32 %v3067_v46, %v835_v1  ;;  %v918_v23 = vadd.f32 %v3067_v46, %v836_v3  ;;  %v167_v24 = vmul.f32 %v2970_v6, %v87_v61  ;;  %v168_v27 = vmul.f32 %v2970_v6, %v88_v62 }
  0x1a   :  { %1173 = vst.msk [vmem:[#allocation3 + $0xc8] sm:$0xff] %vm1068_vm0, %v2876_v2  ;;  %v919_v31 = vadd.f32 %v3067_v46, %v837_v9  ;;  %v3250_v32 = vadd.f32 %v3067_v46, %v838_v11  ;;  %v169_v36 = vmul.f32 %v2970_v6, %v89_v4  ;;  %v319_v40 = vmul.f32 %v2998_v16, %v239_v8 }
  0x1b   :  { %1174 = vst.msk [vmem:[#allocation3 + $0xd0] sm:$0xff] %vm1068_vm0, %v2876_v2  ;;  %v995_v41 = vmax.f32 %v917_v22, 0.0  ;;  %v996_v43 = vmax.f32 %v918_v23, 0.0  ;;  %v320_v44 = vmul.f32 %v2998_v16, %v240_v15  ;;  %v321_v45 = vmul.f32 %v2998_v16, %v241_v17  ;;  %v713_v15 = vld [vmem:[%s5263_s0 + $0x16b] sm:$0xff]  ;;  %v714_v17 = vld [vmem:[%s5263_s0 + $0x173] sm:$0xff]  ;;  %v715_v22 = vld [vmem:[%s5263_s0 + $0x17b] sm:$0xff] }
  0x1c   :  { %1175 = vst.msk [vmem:[#allocation3 + $0xd8] sm:$0xff] %vm1068_vm0, %v2876_v2  ;;  %v997_v47 = vmax.f32 %v919_v31, 0.0  ;;  %v998_v48 = vmax.f32 %v3250_v32, 0.0  ;;  %v322_v49 = vmul.f32 %v2998_v16, %v242_v28  ;;  %v323_v50 = vmul.f32 %v2998_v16, %v243_v29  ;;  %v475_v2 = vld [vmem:[%s5263_s0 + $0x15a] sm:$0xff]  ;;  %v716_v29 = vld [vmem:[%s5263_s0 + $0x183] sm:$0xff] }
  0x1d   :  { %1069 = vst.msk [vmem:[#allocation2] sm:$0xff] %vm1068_vm0, %v990_v21  ;;  %v324_v51 = vmul.f32 %v2998_v16, %v244_v30  ;;  %v325_v10 = vmul.f32 %v2998_v16, %v245_v37  ;;  %v326_v21 = vmul.f32 %v2998_v16, %v246_v38  ;;  %v327_v52 = vmul.f32 %v2998_v16, %v247_v39  ;;  %v717_v30 = vld [vmem:[%s5263_s0 + $0x18b] sm:$0xff]  ;;  %v718_v31 = vld [vmem:[%s5263_s0 + $0x193] sm:$0xff] }
  0x1e   :  { %1070 = vst.msk [vmem:[#allocation2 + $0x8] sm:$0xff] %vm1068_vm0, %v991_v25  ;;  %v397_v25 = vadd.f32 %v319_v40, %v161_v63  ;;  %v398_v55 = vadd.f32 %v320_v44, %v162_v0  ;;  %v399_v56 = vadd.f32 %v321_v45, %v163_v5  ;;  %v400_v57 = vadd.f32 %v322_v49, %v164_v7  ;;  %v482_v63 = vld [vmem:[%s5263_s0 + $0x192] sm:$0xff]  ;;  %v483_v0 = vld [vmem:[%s5263_s0 + $0x19a] sm:$0xff] }
  0x1f   :  { %1071 = vst.msk [vmem:[#allocation2 + $0x10] sm:$0xff] %vm1068_vm0, %v992_v33  ;;  %v401_v18 = vadd.f32 %v323_v50, %v165_v12  ;;  %v402_v33 = vadd.f32 %v324_v51, %v166_v14  ;;  %v403_v61 = vadd.f32 %v325_v10, %v167_v24  ;;  %v404_v62 = vadd.f32 %v326_v21, %v168_v27  ;;  %v719_v40 = vld [vmem:[%s5263_s0 + $0x19b] sm:$0xff] }
  0x20   :  { %1072 = vst.msk [vmem:[#allocation2 + $0x18] sm:$0xff] %vm1068_vm0, %v993_v34  ;;  %v405_v1 = vadd.f32 %v327_v52, %v169_v36  ;;  %v555_v19 = vmul.f32 %v3024_v26, %v475_v2  ;;  %v556_v34 = vmul.f32 %v3024_v26, %v476_v53  ;;  %v557_v3 = vmul.f32 %v3024_v26, %v477_v54 }
  0x21   :  { %1073 = vst.msk [vmem:[#allocation2 + $0x20] sm:$0xff] %vm1068_vm0, %v994_v35  ;;  %v558_v4 = vmul.f32 %v3024_v26, %v478_v13  ;;  %v559_v5 = vmul.f32 %v3024_v26, %v479_v58  ;;  %v560_v7 = vmul.f32 %v3024_v26, %v480_v59  ;;  %v561_v8 = vmul.f32 %v3024_v26, %v481_v60  ;;  %v712_v35 = vld [vmem:[%s5263_s0 + $0x163] sm:$0xff] }
  0x22   :  { %1074 = vst.msk [vmem:[#allocation2 + $0x28] sm:$0xff] %vm1068_vm0, %v995_v41  ;;  %v562_v9 = vmul.f32 %v3024_v26, %v482_v63  ;;  %v563_v11 = vmul.f32 %v3024_v26, %v483_v0  ;;  %v633_v12 = vadd.f32 %v555_v19, %v397_v25  ;;  %v634_v14 = vadd.f32 %v556_v34, %v398_v55  ;;  %v52_v19 = vld [vmem:[%s5263_s0 + $0x50] sm:$0xff]  ;;  %v53_v34 = vld [vmem:[%s5263_s0 + $0x58] sm:$0xff] }
  0x23   :  { %1075 = vst.msk [vmem:[#allocation2 + $0x30] sm:$0xff] %vm1068_vm0, %v996_v43  ;;  %v635_v23 = vadd.f32 %v557_v3, %v399_v56  ;;  %v636_v24 = vadd.f32 %v558_v4, %v400_v57  ;;  %v637_v27 = vadd.f32 %v559_v5, %v401_v18  ;;  %v638_v28 = vadd.f32 %v560_v7, %v402_v33 }
  0x24   :  { %1076 = vst.msk [vmem:[#allocation2 + $0x38] sm:$0xff] %vm1068_vm0, %v997_v47  ;;  %v639_v37 = vadd.f32 %v561_v8, %v403_v61  ;;  %v640_v38 = vadd.f32 %v562_v9, %v404_v62  ;;  %v641_v39 = vadd.f32 %v563_v11, %v405_v1  ;;  %v791_v41 = vmul.f32 %v3054_v42, %v711_v20  ;;  %v51_v1 = vld [vmem:[%s5263_s0 + $0x48] sm:$0xff] }
  0x25   :  { %v1176_v32 = vld [vmem:[#allocation2] ss:$2 sm:$0xff]  ;;  %v1180_v36 = vld [vmem:[#allocation2 + $0x1] ss:$2 sm:$0xff]  ;;  %1077 = vst.msk [vmem:[#allocation2 + $0x40] sm:$0xff] %vm1068_vm0, %v998_v48  ;;  %v792_v44 = vmul.f32 %v3054_v42, %v712_v35  ;;  %v793_v45 = vmul.f32 %v3054_v42, %v713_v15  ;;  %v794_v47 = vmul.f32 %v3054_v42, %v714_v17  ;;  %v795_v49 = vmul.f32 %v3054_v42, %v715_v22  ;;  %v54_v35 = vld [vmem:[%s5263_s0 + $0x60] sm:$0xff] }
  0x26   :  { %v1191_v43 = vmax.f32 %v1176_v32, %v1180_v36  ;;  %v796_v48 = vmul.f32 %v3054_v42, %v716_v29  ;;  %v797_v50 = vmul.f32 %v3054_v42, %v717_v30  ;;  %v798_v2 = vmul.f32 %v3054_v42, %v718_v31  ;;  %v55_v15 = vld [vmem:[%s5263_s0 + $0x68] sm:$0xff]  ;;  %v210_v22 = vld [vmem:[%s5263_s0 + $0x51] sm:$0xff]  ;;  %v211_v29 = vld [vmem:[%s5263_s0 + $0x59] sm:$0xff] }
  0x27   :  { %v799_v21 = vmul.f32 %v3054_v42, %v719_v40  ;;  %v869_v52 = vadd.f32 %v791_v41, %v633_v12  ;;  %v870_v53 = vadd.f32 %v792_v44, %v634_v14  ;;  %v871_v54 = vadd.f32 %v793_v45, %v635_v23  ;;  %v209_v17 = vld [vmem:[%s5263_s0 + $0x49] sm:$0xff]  ;;  %v212_v30 = vld [vmem:[%s5263_s0 + $0x61] sm:$0xff] }
  0x28   :  { %v1184_v51 = vld [vmem:[#allocation2 + $0x12] ss:$2 sm:$0xff]  ;;  %v1188_v10 = vld [vmem:[#allocation2 + $0x13] ss:$2 sm:$0xff]  ;;  %v872_v25 = vadd.f32 %v794_v47, %v636_v24  ;;  %v873_v55 = vadd.f32 %v795_v49, %v637_v27  ;;  %v874_v56 = vadd.f32 %v796_v48, %v638_v28  ;;  %v875_v59 = vadd.f32 %v797_v50, %v639_v37  ;;  %v447_v47 = vld [vmem:[%s5263_s0 + $0x6a] sm:$0xff] }
  0x29   :  { %v1193_v13 = vmax.f32 %v1184_v51, %v1188_v10  ;;  %v876_v60 = vadd.f32 %v798_v2, %v640_v38  ;;  %v877_v18 = vadd.f32 %v799_v21, %v641_v39  ;;  %v951_v33 = vadd.f32 %v3067_v46, %v869_v52  ;;  %v213_v38 = vld [vmem:[%s5263_s0 + $0x69] sm:$0xff]  ;;  %v445_v39 = vld [vmem:[%s5263_s0 + $0x5a] sm:$0xff]  ;;  %v448_v49 = vld [vmem:[%s5263_s0 + $0x72] sm:$0xff] }
  0x2a   :  { %v1200_v57 = vld [vmem:[#allocation2 + $0x24] ss:$2 sm:$0xff]  ;;  %v1204_v58 = vld [vmem:[#allocation2 + $0x25] ss:$2 sm:$0xff]  ;;  %v952_v63 = vadd.f32 %v3067_v46, %v870_v53  ;;  %v953_v0 = vadd.f32 %v3067_v46, %v871_v54  ;;  %v954_v5 = vadd.f32 %v3067_v46, %v872_v25  ;;  %v955_v7 = vadd.f32 %v3067_v46, %v873_v55  ;;  %v446_v45 = vld [vmem:[%s5263_s0 + $0x62] sm:$0xff] }
  0x2b   :  { %v1195_v61 = vmax.f32 %v1191_v43, %v1193_v13  ;;  %v1215_v62 = vmax.f32 %v1200_v57, %v1204_v58  ;;  %v3380_v8 = vadd.f32 %v3067_v46, %v874_v56  ;;  %v3383_v20 = vadd.f32 %v3067_v46, %v875_v59  ;;  %v449_v10 = vld [vmem:[%s5263_s0 + $0x7a] sm:$0xff]  ;;  %v682_v52 = vld [vmem:[%s5263_s0 + $0x63] sm:$0xff]  ;;  %v683_v55 = vld [vmem:[%s5263_s0 + $0x6b] sm:$0xff] }
  0x2c   :  { %v1208_v3 = vld [vmem:[#allocation2 + $0x36] ss:$2 sm:$0xff]  ;;  %v1212_v4 = vld [vmem:[#allocation2 + $0x37] ss:$2 sm:$0xff]  ;;  %v3390_v11 = vadd.f32 %v3067_v46, %v876_v60  ;;  %v3393_v12 = vadd.f32 %v3067_v46, %v877_v18  ;;  %v1029_v14 = vmax.f32 %v951_v33, 0.0  ;;  %v1030_v23 = vmax.f32 %v952_v63, 0.0 }
  0x2d   :  { %1197 = vst.msk [vmem:[#allocation3 + $0xb] sm:$0xff] %vm1068_vm0, %v1195_v61  ;;  %v1217_v9 = vmax.f32 %v1208_v3, %v1212_v4  ;;  %v1031_v24 = vmax.f32 %v953_v0, 0.0  ;;  %v1032_v27 = vmax.f32 %v954_v5, 0.0  ;;  %v1033_v28 = vmax.f32 %v955_v7, 0.0  ;;  %v681_v21 = vld [vmem:[%s5263_s0 + $0x5b] sm:$0xff]  ;;  %v684_v60 = vld [vmem:[%s5263_s0 + $0x73] sm:$0xff] }
  0x2e   :  { %v1034_v32 = vmax.f32 %v3380_v8, 0.0  ;;  %v1035_v36 = vmax.f32 %v3383_v20, 0.0  ;;  %v1036_v37 = vmax.f32 %v3390_v11, 0.0  ;;  %1109 = vst.msk [vmem:[#allocation2 + $0x138] sm:$0xff] %vm1068_vm0, %v1029_v14  ;;  %v1037_v40 = vmax.f32 %v3393_v12, 0.0  ;;  %v90_v4 = vld [vmem:[%s5263_s0 + $0x190] sm:$0xff] }
  0x2f   :  { %v1219_v31 = vmax.f32 %v1215_v62, %v1217_v9  ;;  %1110 = vst.msk [vmem:[#allocation2 + $0x140] sm:$0xff] %vm1068_vm0, %v1030_v23  ;;  %v131_v41 = vmul.f32 %v2970_v6, %v51_v1  ;;  %v132_v43 = vmul.f32 %v2970_v6, %v52_v19  ;;  %v133_v44 = vmul.f32 %v2970_v6, %v53_v34  ;;  %v685_v1 = vld [vmem:[%s5263_s0 + $0x7b] sm:$0xff]  ;;  %v93_v23 = vld [vmem:[%s5263_s0 + $0x1a8] sm:$0xff] }
  0x30   :  { %v134_v48 = vmul.f32 %v2970_v6, %v54_v35  ;;  %v135_v50 = vmul.f32 %v2970_v6, %v55_v15  ;;  %v289_v2 = vmul.f32 %v2998_v16, %v209_v17  ;;  %v290_v51 = vmul.f32 %v2998_v16, %v210_v22  ;;  %1111 = vst.msk [vmem:[#allocation2 + $0x148] sm:$0xff] %vm1068_vm0, %v1031_v24  ;;  %v91_v35 = vld [vmem:[%s5263_s0 + $0x198] sm:$0xff]  ;;  %v92_v9 = vld [vmem:[%s5263_s0 + $0x1a0] sm:$0xff] }
  0x31   :  { %1221 = vst.msk [vmem:[#allocation3 + $0x15] sm:$0xff] %vm1068_vm0, %v1219_v31  ;;  %v291_v53 = vmul.f32 %v2998_v16, %v211_v29  ;;  %v292_v54 = vmul.f32 %v2998_v16, %v212_v30  ;;  %v293_v13 = vmul.f32 %v2998_v16, %v213_v38  ;;  %v525_v25 = vmul.f32 %v3024_v26, %v445_v39  ;;  %v94_v29 = vld [vmem:[%s5263_s0 + $0x1b0] sm:$0xff]  ;;  %v249_v39 = vld [vmem:[%s5263_s0 + $0x199] sm:$0xff] }
  0x32   :  { %1112 = vst.msk [vmem:[#allocation2 + $0x150] sm:$0xff] %vm1068_vm0, %v1032_v27  ;;  %v367_v56 = vadd.f32 %v289_v2, %v131_v41  ;;  %v368_v57 = vadd.f32 %v290_v51, %v132_v43  ;;  %v526_v58 = vmul.f32 %v3024_v26, %v446_v45  ;;  %v527_v59 = vmul.f32 %v3024_v26, %v447_v47  ;;  %v248_v31 = vld [vmem:[%s5263_s0 + $0x191] sm:$0xff]  ;;  %v251_v41 = vld [vmem:[%s5263_s0 + $0x1a9] sm:$0xff] }
  0x33   :  { %1113 = vst.msk [vmem:[#allocation2 + $0x158] sm:$0xff] %vm1068_vm0, %v1033_v28  ;;  %v369_v61 = vadd.f32 %v291_v53, %v133_v44  ;;  %v370_v62 = vadd.f32 %v292_v54, %v134_v48  ;;  %v371_v63 = vadd.f32 %v293_v13, %v135_v50  ;;  %v528_v0 = vmul.f32 %v3024_v26, %v448_v49  ;;  %v252_v50 = vld [vmem:[%s5263_s0 + $0x1b1] sm:$0xff]  ;;  %v484_v54 = vld [vmem:[%s5263_s0 + $0x1a2] sm:$0xff] }
  0x34   :  { %v1705_v18 = vld [vmem:[#allocation3 + $0xb] sm:$0xff]  ;;  %1114 = vst.msk [vmem:[#allocation2 + $0x160] sm:$0xff] %vm1068_vm0, %v1034_v32  ;;  %v529_v19 = vmul.f32 %v3024_v26, %v449_v10  ;;  %v603_v34 = vadd.f32 %v525_v25, %v367_v56  ;;  %v604_v3 = vadd.f32 %v526_v58, %v368_v57  ;;  %v761_v8 = vmul.f32 %v3054_v42, %v681_v21  ;;  %v486_v58 = vld [vmem:[%s5263_s0 + $0x1b2] sm:$0xff] }
  0x35   :  { %v1560_v33 = vld [vmem:[#allocation3 + $0xa] sm:$0xff]  ;;  %1753 = vrot.lane.b32.xlu1 %v1705_v18, %s2878_s26  ;;  %1115 = vst.msk [vmem:[#allocation2 + $0x168] sm:$0xff] %vm1068_vm0, %v1035_v36  ;;  %v605_v5 = vadd.f32 %v527_v59, %v369_v61  ;;  %v606_v7 = vadd.f32 %v528_v0, %v370_v62  ;;  %v762_v20 = vmul.f32 %v3054_v42, %v682_v52  ;;  %v485_v13 = vld [vmem:[%s5263_s0 + $0x1aa] sm:$0xff]  ;;  %v487_v59 = vld [vmem:[%s5263_s0 + $0x1ba] sm:$0xff] }
  0x36   :  { %1608 = vrot.lane.b32.xlu0 %v1560_v33, %s2879_s27  ;;  %1116 = vst.msk [vmem:[#allocation2 + $0x170] sm:$0xff] %vm1068_vm0, %v1036_v37  ;;  %v1178_v11 = vld [vmem:[#allocation2 + $0x138] ss:$2 sm:$0xff]  ;;  %v1182_v12 = vld [vmem:[#allocation2 + $0x139] ss:$2 sm:$0xff]  ;;  %v607_v14 = vadd.f32 %v529_v19, %v371_v63  ;;  %v763_v15 = vmul.f32 %v3054_v42, %v683_v55  ;;  %v764_v17 = vmul.f32 %v3054_v42, %v684_v60 }
  0x37   :  { %v765_v22 = vmul.f32 %v3054_v42, %v685_v1  ;;  %1117 = vst.msk [vmem:[#allocation2 + $0x178] sm:$0xff] %vm1068_vm0, %v1037_v40  ;;  %v1192_v24 = vmax.f32 %v1178_v11, %v1182_v12  ;;  %v839_v27 = vadd.f32 %v761_v8, %v603_v34  ;;  %v840_v28 = vadd.f32 %v762_v20, %v604_v3  ;;  %v250_v40 = vld [vmem:[%s5263_s0 + $0x1a1] sm:$0xff]  ;;  %v721_v11 = vld [vmem:[%s5263_s0 + $0x1ab] sm:$0xff] }
  0x38   :  { %v170_v30 = vmul.f32 %v2970_v6, %v90_v4  ;;  %v841_v32 = vadd.f32 %v763_v15, %v605_v5  ;;  %v842_v36 = vadd.f32 %v764_v17, %v606_v7  ;;  %v171_v38 = vmul.f32 %v2970_v6, %v91_v35  ;;  %v1561_v43 = vld [vmem:[#allocation3 + $0x12] sm:$0xff]  ;;  %v1416_v44 = vld [vmem:[#allocation3 + $0x9] sm:$0xff] }
  0x39   :  { %v843_v37 = vadd.f32 %v765_v22, %v607_v14  ;;  %v921_v45 = vadd.f32 %v3067_v46, %v839_v27  ;;  %v922_v47 = vadd.f32 %v3067_v46, %v840_v28  ;;  %v172_v49 = vmul.f32 %v2970_v6, %v92_v9  ;;  %v488_v60 = vld [vmem:[%s5263_s0 + $0x1c2] sm:$0xff]  ;;  %v722_v22 = vld [vmem:[%s5263_s0 + $0x1b3] sm:$0xff] }
  0x3a   :  { %v173_v48 = vmul.f32 %v2970_v6, %v93_v23  ;;  %v1186_v2 = vld [vmem:[#allocation2 + $0x14a] ss:$2 sm:$0xff]  ;;  %v1190_v51 = vld [vmem:[#allocation2 + $0x14b] ss:$2 sm:$0xff]  ;;  %v923_v10 = vadd.f32 %v3067_v46, %v841_v32  ;;  %v924_v21 = vadd.f32 %v3067_v46, %v842_v36  ;;  %v174_v53 = vmul.f32 %v2970_v6, %v94_v29  ;;  %v720_v1 = vld [vmem:[%s5263_s0 + $0x1a3] sm:$0xff] }
  0x3b   :  { %v925_v52 = vadd.f32 %v3067_v46, %v843_v37  ;;  %v1194_v25 = vmax.f32 %v1186_v2, %v1190_v51  ;;  %v999_v55 = vmax.f32 %v921_v45, 0.0  ;;  %v1000_v56 = vmax.f32 %v922_v47, 0.0 }
  0x3c   :  { %v328_v57 = vmul.f32 %v2998_v16, %v248_v31  ;;  %v1202_v18 = vld [vmem:[#allocation2 + $0x15c] ss:$2 sm:$0xff]  ;;  %v1206_v33 = vld [vmem:[#allocation2 + $0x15d] ss:$2 sm:$0xff]  ;;  %v1001_v61 = vmax.f32 %v923_v10, 0.0  ;;  %v1002_v62 = vmax.f32 %v924_v21, 0.0  ;;  %v329_v63 = vmul.f32 %v2998_v16, %v249_v39 }
  0x3d   :  { %1610 = vrot.lane.b32.xlu1 %v1561_v43, %s2879_s27  ;;  %v330_v0 = vmul.f32 %v2998_v16, %v250_v40  ;;  %v1196_v19 = vmax.f32 %v1192_v24, %v1194_v25  ;;  %v1216_v34 = vmax.f32 %v1202_v18, %v1206_v33  ;;  %v1003_v3 = vmax.f32 %v925_v52, 0.0  ;;  %1078 = vst.msk [vmem:[#allocation2 + $0x48] sm:$0xff] %vm1068_vm0, %v999_v55 }
  0x3e   :  { %1465 = vrot.lane.b32.xlu0 %v1416_v44, %s2877_s13  ;;  %v331_v4 = vmul.f32 %v2998_v16, %v251_v41  ;;  %v1210_v5 = vld [vmem:[#allocation2 + $0x16e] ss:$2 sm:$0xff]  ;;  %v1214_v7 = vld [vmem:[#allocation2 + $0x16f] ss:$2 sm:$0xff]  ;;  %1079 = vst.msk [vmem:[#allocation2 + $0x50] sm:$0xff] %vm1068_vm0, %v1000_v56  ;;  %v332_v8 = vmul.f32 %v2998_v16, %v252_v50  ;;  %v406_v20 = vadd.f32 %v328_v57, %v170_v30 }
  0x3f   :  { %v407_v35 = vadd.f32 %v329_v63, %v171_v38  ;;  %v408_v9 = vadd.f32 %v330_v0, %v172_v49  ;;  %1198 = vst.msk [vmem:[#allocation3 + $0x7b] sm:$0xff] %vm1068_vm0, %v1196_v19  ;;  %v1218_v12 = vmax.f32 %v1210_v5, %v1214_v7  ;;  %v564_v15 = vmul.f32 %v3024_v26, %v484_v54 }
  0x40   :  { %v409_v14 = vadd.f32 %v331_v4, %v173_v48  ;;  %v565_v17 = vmul.f32 %v3024_v26, %v485_v13 }
  0x41   :  { %17 = vsyncpa [#allocation8], 0  ;;  %1080 = vst.msk [vmem:[#allocation2 + $0x58] sm:$0xff] %vm1068_vm0, %v1001_v61  ;;  %v410_v23 = vadd.f32 %v332_v8, %v174_v53  ;;  %v566_v24 = vmul.f32 %v3024_v26, %v486_v58  ;;  %v567_v27 = vmul.f32 %v3024_v26, %v487_v59  ;;  %v568_v28 = vmul.f32 %v3024_v26, %v488_v60  ;;  %v723_v29 = vld [vmem:[%s5263_s0 + $0x1bb] sm:$0xff]  ;;  %v724_v30 = vld [vmem:[%s5263_s0 + $0x1c3] sm:$0xff]  ;;  %s2882_s17 = smov [#allocation7]  }
  0x42   :  { %v56_v31 = vld [vmem:[%s5263_s0 + $0x70] sm:$0xff]  ;;  %v1220_v32 = vmax.f32 %v1216_v34, %v1218_v12  ;;  %1081 = vst.msk [vmem:[#allocation2 + $0x60] sm:$0xff] %vm1068_vm0, %v1002_v62  ;;  %v642_v37 = vadd.f32 %v564_v15, %v406_v20  ;;  %v643_v38 = vadd.f32 %v565_v17, %v407_v35  ;;  %v800_v39 = vmul.f32 %v3054_v42, %v720_v1  ;;  %v57_v40 = vld [vmem:[%s5263_s0 + $0x78] sm:$0xff]  ;;  %v58_v41 = vld [vmem:[%s5263_s0 + $0x80] sm:$0xff]  ;;  %s2802_s18 = sshll.u32 %s2882_s17, 4  ;;  %s2803_s18 = int_to_ptr.vmem [resolvable:$true] %s2802_s18 }
  0x43   :  { %v1706_v36 = vld [vmem:[#allocation3 + $0x13] sm:$0xff]  ;;  %1082 = vst.msk [vmem:[#allocation2 + $0x68] sm:$0xff] %vm1068_vm0, %v1003_v3  ;;  %v644_v43 = vadd.f32 %v566_v24, %v408_v9  ;;  %v645_v44 = vadd.f32 %v567_v27, %v409_v14  ;;  %v646_v45 = vadd.f32 %v568_v28, %v410_v23  ;;  %v801_v47 = vmul.f32 %v3054_v42, %v721_v11  ;;  %v215_v13 = vld [vmem:[%s5263_s0 + $0x79] sm:$0xff]  ;;  %v216_v25 = vld [vmem:[%s5263_s0 + $0x81] sm:$0xff] }
  0x44   :  { %1222 = vst.msk [vmem:[#allocation3 + $0x85] sm:$0xff] %vm1068_vm0, %v1220_v32  ;;  %v802_v49 = vmul.f32 %v3054_v42, %v722_v22  ;;  %v803_v48 = vmul.f32 %v3054_v42, %v723_v29  ;;  %v804_v50 = vmul.f32 %v3054_v42, %v724_v30  ;;  %v878_v2 = vadd.f32 %v800_v39, %v642_v37  ;;  %v59_v51 = vld [vmem:[%s5263_s0 + $0x88] sm:$0xff]  ;;  %v214_v10 = vld [vmem:[%s5263_s0 + $0x71] sm:$0xff]  ;;  %v453_v11 = vld [vmem:[%s5263_s0 + $0x9a] sm:$0xff] }
  0x45   :  { %v879_v21 = vadd.f32 %v801_v47, %v643_v38  ;;  %v136_v52 = vmul.f32 %v2970_v6, %v56_v31  ;;  %v137_v53 = vmul.f32 %v2970_v6, %v57_v40  ;;  %v138_v54 = vmul.f32 %v2970_v6, %v58_v41  ;;  %v1224_v55 = vld [vmem:[#allocation2 + $0x48] ss:$2 sm:$0xff]  ;;  %v1228_v56 = vld [vmem:[#allocation2 + $0x49] ss:$2 sm:$0xff]  ;;  %v450_v1 = vld [vmem:[%s5263_s0 + $0x82] sm:$0xff] }
  0x46   :  { %1755 = vrot.lane.b32.xlu0 %v1706_v36, %s2878_s26  ;;  %v880_v57 = vadd.f32 %v802_v49, %v644_v43  ;;  %v881_v58 = vadd.f32 %v803_v48, %v645_v44  ;;  %v882_v59 = vadd.f32 %v804_v50, %v646_v45  ;;  %v960_v60 = vadd.f32 %v3067_v46, %v878_v2  ;;  %v217_v18 = vld [vmem:[%s5263_s0 + $0x89] sm:$0xff]  ;;  %v1572_v33 = vld [vmem:[#allocation3 + $0x7a] sm:$0xff]  ;;  %v689_v39 = vld [vmem:[%s5263_s0 + $0x9b] sm:$0xff] }
  0x47   :  { %v1239_v61 = vmax.f32 %v1224_v55, %v1228_v56  ;;  %v961_v62 = vadd.f32 %v3067_v46, %v879_v21  ;;  %v139_v63 = vmul.f32 %v2970_v6, %v59_v51  ;;  %v294_v0 = vmul.f32 %v2998_v16, %v214_v10  ;;  %1632 = vrot.lane.b32.xlu2 %v1572_v33, %s2879_s27  ;;  %v451_v5 = vld [vmem:[%s5263_s0 + $0x8a] sm:$0xff]  ;;  %v452_v9 = vld [vmem:[%s5263_s0 + $0x92] sm:$0xff]  ;;  %v96_v47 = vld [vmem:[%s5263_s0 + $0x1c0] sm:$0xff] }
  0x48   :  { %v962_v19 = vadd.f32 %v3067_v46, %v880_v57  ;;  %v963_v34 = vadd.f32 %v3067_v46, %v881_v58  ;;  %v964_v3 = vadd.f32 %v3067_v46, %v882_v59  ;;  %v1038_v4 = vmax.f32 %v960_v60, 0.0  ;;  %v1417_v6 = vld [vmem:[#allocation3 + $0x11] sm:$0xff]  ;;  %v688_v38 = vld [vmem:[%s5263_s0 + $0x93] sm:$0xff] }
  0x49   :  { %v1039_v7 = vmax.f32 %v961_v62, 0.0  ;;  %v295_v8 = vmul.f32 %v2998_v16, %v215_v13  ;;  %v296_v20 = vmul.f32 %v2998_v16, %v216_v25  ;;  %v297_v35 = vmul.f32 %v2998_v16, %v217_v18  ;;  %v686_v29 = vld [vmem:[%s5263_s0 + $0x83] sm:$0xff]  ;;  %v687_v30 = vld [vmem:[%s5263_s0 + $0x8b] sm:$0xff]  ;;  %v95_v40 = vld [vmem:[%s5263_s0 + $0x1b8] sm:$0xff] }
  0x4a   :  { %v1232_v12 = vld [vmem:[#allocation2 + $0x5a] ss:$2 sm:$0xff]  ;;  %v1236_v14 = vld [vmem:[#allocation2 + $0x5b] ss:$2 sm:$0xff]  ;;  %v1040_v15 = vmax.f32 %v962_v19, 0.0  ;;  %v1041_v17 = vmax.f32 %v963_v34, 0.0  ;;  %v372_v22 = vadd.f32 %v294_v0, %v136_v52  ;;  %v530_v23 = vmul.f32 %v3024_v26, %v450_v1 }
  0x4b   :  { %v1573_v24 = vld [vmem:[#allocation3 + $0x82] sm:$0xff]  ;;  %v1241_v27 = vmax.f32 %v1232_v12, %v1236_v14  ;;  %1118 = vst.msk [vmem:[#allocation2 + $0x180] sm:$0xff] %vm1068_vm0, %v1038_v4  ;;  %v373_v16 = vadd.f32 %v295_v8, %v137_v53  ;;  %v374_v28 = vadd.f32 %v296_v20, %v138_v54  ;;  %v1042_v31 = vmax.f32 %v964_v3, 0.0  ;;  %v97_v51 = vld [vmem:[%s5263_s0 + $0x1c8] sm:$0xff]  ;;  %v256_v58 = vld [vmem:[%s5263_s0 + $0x1d1] sm:$0xff] }
  0x4c   :  { %1634 = vrot.lane.b32.xlu1 %v1573_v24, %s2879_s27  ;;  %1119 = vst.msk [vmem:[#allocation2 + $0x188] sm:$0xff] %vm1068_vm0, %v1039_v7  ;;  %v375_v32 = vadd.f32 %v297_v35, %v139_v63  ;;  %v531_v36 = vmul.f32 %v3024_v26, %v451_v5  ;;  %v532_v37 = vmul.f32 %v3024_v26, %v452_v9  ;;  %v1717_v43 = vld [vmem:[#allocation3 + $0x7b] sm:$0xff]  ;;  %v3666_v53 = vld [vmem:[%s5265_s2] ss:$0 sm:$0xff]  ;;  %v254_v25 = vld [vmem:[%s5263_s0 + $0x1c1] sm:$0xff]  ;;  %vm1535_vm1 = vcmask 523520  }
  0x4d   :  { %v1243_v41 = vmax.f32 %v1239_v61, %v1241_v27  ;;  %1120 = vst.msk [vmem:[#allocation2 + $0x190] sm:$0xff] %vm1068_vm0, %v1040_v15  ;;  %v533_v44 = vmul.f32 %v3024_v26, %v453_v11  ;;  %v608_v45 = vadd.f32 %v530_v23, %v372_v22  ;;  %v766_v50 = vmul.f32 %v3054_v42, %v686_v29  ;;  %v98_v26 = vld [vmem:[%s5263_s0 + $0x1d0] sm:$0xff]  ;;  %v253_v13 = vld [vmem:[%s5263_s0 + $0x1b9] sm:$0xff]  ;;  %v3691_v63 = vld [vmem:[%s5265_s2 + $0x1] ss:$0 sm:$0xff] }
  0x4e   :  { %1467 = vrot.lane.b32.xlu0 %v1417_v6, %s2877_s13  ;;  %1121 = vst.msk [vmem:[#allocation2 + $0x198] sm:$0xff] %vm1068_vm0, %v1041_v17  ;;  %v609_v49 = vadd.f32 %v531_v36, %v373_v16  ;;  %v610_v48 = vadd.f32 %v532_v37, %v374_v28  ;;  %v767_v2 = vmul.f32 %v3054_v42, %v687_v30  ;;  %v255_v57 = vld [vmem:[%s5263_s0 + $0x1c9] sm:$0xff]  ;;  %v490_v34 = vld [vmem:[%s5263_s0 + $0x1d2] sm:$0xff]  ;;  %v491_v20 = vld [vmem:[%s5263_s0 + $0x1da] sm:$0xff]  ;;  %vm1680_vm2 = vcmask 785920  }
  0x4f   :  { %1245 = vst.msk [vmem:[#allocation3 + $0x1f] sm:$0xff] %vm1068_vm0, %v1243_v41  ;;  %v611_v10 = vadd.f32 %v533_v44, %v375_v32  ;;  %v768_v21 = vmul.f32 %v3054_v42, %v688_v38  ;;  %v769_v52 = vmul.f32 %v3054_v42, %v689_v39  ;;  %v175_v54 = vmul.f32 %v3666_v53, %v95_v40  ;;  %v489_v19 = vld [vmem:[%s5263_s0 + $0x1ca] sm:$0xff]  ;;  %v492_v14 = vld [vmem:[%s5263_s0 + $0x1e2] sm:$0xff]  ;;  %v726_v15 = vld [vmem:[%s5263_s0 + $0x1d3] sm:$0xff] }
  0x50   :  { %1777 = vrot.lane.b32.xlu2 %v1717_v43, %s2878_s26  ;;  %1122 = vst.msk [vmem:[#allocation2 + $0x1a0] sm:$0xff] %vm1068_vm0, %v1042_v31  ;;  %v844_v42 = vadd.f32 %v766_v50, %v608_v45  ;;  %v845_v55 = vadd.f32 %v767_v2, %v609_v49  ;;  %v176_v56 = vmul.f32 %v3666_v53, %v96_v47  ;;  %v1428_v17 = vld [vmem:[#allocation3 + $0x79] sm:$0xff]  ;;  %v727_v16 = vld [vmem:[%s5263_s0 + $0x1db] sm:$0xff]  ;;  %v728_v38 = vld [vmem:[%s5263_s0 + $0x1e3] sm:$0xff]  ;;  %vm1825_vm3 = vcmask 1048320  }
  0x51   :  { %v846_v59 = vadd.f32 %v768_v21, %v610_v48  ;;  %v847_v60 = vadd.f32 %v769_v52, %v611_v10  ;;  %v177_v18 = vmul.f32 %v3666_v53, %v97_v51  ;;  %v178_v33 = vmul.f32 %v3666_v53, %v98_v26  ;;  %v3724_v31 = vld [vmem:[%s5265_s2 + $0x2] ss:$0 sm:$0xff]  ;;  %v3739_v43 = vld [vmem:[%s5265_s2 + $0x3] ss:$0 sm:$0xff]  ;;  %v60_v47 = vld [vmem:[%s5263_s0 + $0x90] sm:$0xff] }
  0x52   :  { %v926_v61 = vadd.f32 %v3067_v46, %v844_v42  ;;  %v927_v62 = vadd.f32 %v3067_v46, %v845_v55  ;;  %v333_v0 = vmul.f32 %v3691_v63, %v253_v13  ;;  %v334_v1 = vmul.f32 %v3691_v63, %v254_v25  ;;  %v61_v2 = vld [vmem:[%s5263_s0 + $0x98] sm:$0xff]  ;;  %v62_v51 = vld [vmem:[%s5263_s0 + $0xa0] sm:$0xff]  ;;  %v64_v13 = vld [vmem:[%s5263_s0 + $0xb0] sm:$0xff] }
  0x53   :  { %v1226_v3 = vld [vmem:[#allocation2 + $0x180] ss:$2 sm:$0xff]  ;;  %v1230_v4 = vld [vmem:[#allocation2 + $0x181] ss:$2 sm:$0xff]  ;;  %v928_v5 = vadd.f32 %v3067_v46, %v846_v59  ;;  %v929_v6 = vadd.f32 %v3067_v46, %v847_v60  ;;  %v335_v7 = vmul.f32 %v3691_v63, %v255_v57  ;;  %v336_v8 = vmul.f32 %v3691_v63, %v256_v58  ;;  %v219_v58 = vld [vmem:[%s5263_s0 + $0x99] sm:$0xff] }
  0x54   :  { %v1240_v35 = vmax.f32 %v1226_v3, %v1230_v4  ;;  %v1004_v9 = vmax.f32 %v926_v61, 0.0  ;;  %v1005_v11 = vmax.f32 %v927_v62, 0.0  ;;  %v411_v12 = vadd.f32 %v333_v0, %v175_v54  ;;  %v725_v46 = vld [vmem:[%s5263_s0 + $0x1cb] sm:$0xff]  ;;  %v220_v61 = vld [vmem:[%s5263_s0 + $0xa1] sm:$0xff] }
  0x55   :  { %v1006_v22 = vmax.f32 %v928_v5, 0.0  ;;  %v1007_v23 = vmax.f32 %v929_v6, 0.0  ;;  %v412_v24 = vadd.f32 %v334_v1, %v176_v56  ;;  %v413_v27 = vadd.f32 %v335_v7, %v177_v18  ;;  %v63_v54 = vld [vmem:[%s5263_s0 + $0xa8] sm:$0xff]  ;;  %v218_v57 = vld [vmem:[%s5263_s0 + $0x91] sm:$0xff]  ;;  %v1718_v1 = vld [vmem:[#allocation3 + $0x83] sm:$0xff] }
  0x56   :  { %v1562_v28 = vld [vmem:[#allocation3 + $0x1a] sm:$0xff]  ;;  %1083 = vst.msk [vmem:[#allocation2 + $0x70] sm:$0xff] %vm1068_vm0, %v1004_v9  ;;  %v414_v30 = vadd.f32 %v336_v8, %v178_v33  ;;  %v569_v32 = vmul.f32 %v3724_v31, %v489_v19  ;;  %v570_v36 = vmul.f32 %v3724_v31, %v490_v34  ;;  %v571_v37 = vmul.f32 %v3724_v31, %v491_v20  ;;  %v221_v62 = vld [vmem:[%s5263_s0 + $0xa9] sm:$0xff]  ;;  %v3782_v19 = vld [vmem:[%s5266_s3] ss:$0 sm:$0xff] }
  0x57   :  { %v1707_v29 = vld [vmem:[#allocation3 + $0x1b] sm:$0xff]  ;;  %1612 = vrot.lane.b32.xlu1 %v1562_v28, %s2879_s27  ;;  %v1238_v40 = vld [vmem:[#allocation2 + $0x193] ss:$2 sm:$0xff]  ;;  %1084 = vst.msk [vmem:[#allocation2 + $0x78] sm:$0xff] %vm1068_vm0, %v1005_v11  ;;  %v572_v41 = vmul.f32 %v3724_v31, %v492_v14  ;;  %v805_v44 = vmul.f32 %v3739_v43, %v725_v46  ;;  %v806_v45 = vmul.f32 %v3739_v43, %v726_v15  ;;  %v455_v11 = vld [vmem:[%s5263_s0 + $0xaa] sm:$0xff]  ;;  %vm1947_vm4 = vcmask 523264  }
  0x58   :  { %v1234_v39 = vld [vmem:[#allocation2 + $0x192] ss:$2 sm:$0xff]  ;;  %1757 = vrot.lane.b32.xlu0 %v1707_v29, %s2878_s26  ;;  %1489 = vrot.lane.b32.xlu2 %v1428_v17, %s2877_s13  ;;  %1085 = vst.msk [vmem:[#allocation2 + $0x80] sm:$0xff] %vm1068_vm0, %v1006_v22  ;;  %v647_v48 = vadd.f32 %v569_v32, %v411_v12  ;;  %v648_v50 = vadd.f32 %v570_v36, %v412_v24  ;;  %v1418_v0 = vld [vmem:[#allocation3 + $0x19] sm:$0xff]  ;;  %vm2099_vm5 = vcmask 1041409   ;;  %vm2101_vm6 = vcmask 1043459  }
  0x59   :  { %v1242_v49 = vmax.f32 %v1234_v39, %v1238_v40  ;;  %1086 = vst.msk [vmem:[#allocation2 + $0x88] sm:$0xff] %vm1068_vm0, %v1007_v23  ;;  %v649_v26 = vadd.f32 %v571_v37, %v413_v27  ;;  %v650_v10 = vadd.f32 %v572_v41, %v414_v30  ;;  %v807_v21 = vmul.f32 %v3739_v43, %v727_v16  ;;  %v222_v6 = vld [vmem:[%s5263_s0 + $0xb1] sm:$0xff]  ;;  %v454_v9 = vld [vmem:[%s5263_s0 + $0xa2] sm:$0xff]  ;;  %v457_v29 = vld [vmem:[%s5263_s0 + $0xba] sm:$0xff] }
  0x5a   :  { %v808_v52 = vmul.f32 %v3739_v43, %v728_v38  ;;  %v883_v42 = vadd.f32 %v805_v44, %v647_v48  ;;  %v884_v55 = vadd.f32 %v806_v45, %v648_v50  ;;  %v140_v56 = vmul.f32 %v3666_v53, %v60_v47  ;;  %v456_v12 = vld [vmem:[%s5263_s0 + $0xb2] sm:$0xff]  ;;  %v458_v30 = vld [vmem:[%s5263_s0 + $0xc2] sm:$0xff] }
  0x5b   :  { %v1244_v25 = vmax.f32 %v1240_v35, %v1242_v49  ;;  %v885_v59 = vadd.f32 %v807_v21, %v649_v26  ;;  %v141_v18 = vmul.f32 %v3666_v53, %v61_v2  ;;  %v142_v33 = vmul.f32 %v3666_v53, %v62_v51  ;;  %v690_v32 = vld [vmem:[%s5263_s0 + $0xa3] sm:$0xff]  ;;  %v691_v41 = vld [vmem:[%s5263_s0 + $0xab] sm:$0xff]  ;;  %v692_v48 = vld [vmem:[%s5263_s0 + $0xb3] sm:$0xff] }
  0x5c   :  { %v886_v60 = vadd.f32 %v808_v52, %v650_v10  ;;  %v965_v34 = vadd.f32 %v3782_v19, %v883_v42  ;;  %v966_v3 = vadd.f32 %v3782_v19, %v884_v55  ;;  %v143_v4 = vmul.f32 %v3666_v53, %v63_v54  ;;  %v693_v10 = vld [vmem:[%s5263_s0 + $0xbb] sm:$0xff]  ;;  %v694_v21 = vld [vmem:[%s5263_s0 + $0xc3] sm:$0xff] }
  0x5d   :  { %1246 = vst.msk [vmem:[#allocation3 + $0x8f] sm:$0xff] %vm1068_vm0, %v1244_v25  ;;  %v144_v5 = vmul.f32 %v3666_v53, %v64_v13  ;;  %v967_v7 = vadd.f32 %v3782_v19, %v885_v59  ;;  %v298_v20 = vmul.f32 %v3691_v63, %v218_v57  ;;  %v299_v35 = vmul.f32 %v3691_v63, %v219_v58  ;;  %v99_v52 = vld [vmem:[%s5263_s0 + $0x1d8] sm:$0xff]  ;;  %v101_v57 = vld [vmem:[%s5263_s0 + $0x1e8] sm:$0xff] }
  0x5e   :  { %v968_v8 = vadd.f32 %v3782_v19, %v886_v60  ;;  %v1248_v14 = vld [vmem:[#allocation2 + $0x6c] ss:$2 sm:$0xff]  ;;  %v1252_v46 = vld [vmem:[#allocation2 + $0x6d] ss:$2 sm:$0xff]  ;;  %v1043_v15 = vmax.f32 %v965_v34, 0.0  ;;  %v1044_v17 = vmax.f32 %v966_v3, 0.0  ;;  %v300_v22 = vmul.f32 %v3691_v63, %v220_v61 }
  0x5f   :  { %v301_v23 = vmul.f32 %v3691_v63, %v221_v62  ;;  %v1263_v24 = vmax.f32 %v1248_v14, %v1252_v46  ;;  %v1045_v27 = vmax.f32 %v967_v7, 0.0  ;;  %v302_v28 = vmul.f32 %v3691_v63, %v222_v6  ;;  %v1429_v58 = vld [vmem:[#allocation3 + $0x81] sm:$0xff]  ;;  %v102_v34 = vld [vmem:[%s5263_s0 + $0x1f0] sm:$0xff] }
  0x60   :  { %1469 = vrot.lane.b32.xlu0 %v1418_v0, %s2877_s13  ;;  %v1046_v16 = vmax.f32 %v968_v8, 0.0  ;;  %v1256_v36 = vld [vmem:[#allocation2 + $0x7e] ss:$2 sm:$0xff]  ;;  %v1260_v37 = vld [vmem:[#allocation2 + $0x7f] ss:$2 sm:$0xff]  ;;  %1779 = vrot.lane.b32.xlu2 %v1718_v1, %s2878_s26  ;;  %1123 = vst.msk [vmem:[#allocation2 + $0x1a8] sm:$0xff] %vm1068_vm0, %v1043_v15  ;;  %v376_v38 = vadd.f32 %v298_v20, %v140_v56  ;;  %v377_v39 = vadd.f32 %v299_v35, %v141_v18 }
  0x61   :  { %v378_v40 = vadd.f32 %v300_v22, %v142_v33  ;;  %v1265_v44 = vmax.f32 %v1256_v36, %v1260_v37  ;;  %1124 = vst.msk [vmem:[#allocation2 + $0x1b0] sm:$0xff] %vm1068_vm0, %v1044_v17  ;;  %v379_v45 = vadd.f32 %v301_v23, %v143_v4  ;;  %v380_v47 = vadd.f32 %v302_v28, %v144_v5  ;;  %v100_v56 = vld [vmem:[%s5263_s0 + $0x1e0] sm:$0xff]  ;;  %v103_v3 = vld [vmem:[%s5263_s0 + $0x1f8] sm:$0xff]  ;;  %v259_v14 = vld [vmem:[%s5263_s0 + $0x1e9] sm:$0xff] }
  0x62   :  { %v534_v49 = vmul.f32 %v3724_v31, %v454_v9  ;;  %1125 = vst.msk [vmem:[#allocation2 + $0x1b8] sm:$0xff] %vm1068_vm0, %v1045_v27  ;;  %v535_v50 = vmul.f32 %v3724_v31, %v455_v11  ;;  %v536_v2 = vmul.f32 %v3724_v31, %v456_v12  ;;  %v537_v51 = vmul.f32 %v3724_v31, %v457_v29  ;;  %v257_v4 = vld [vmem:[%s5263_s0 + $0x1d9] sm:$0xff]  ;;  %v258_v12 = vld [vmem:[%s5263_s0 + $0x1e1] sm:$0xff]  ;;  %v493_v36 = vld [vmem:[%s5263_s0 + $0x1ea] sm:$0xff] }
  0x63   :  { %v538_v26 = vmul.f32 %v3724_v31, %v458_v30  ;;  %v1267_v13 = vmax.f32 %v1263_v24, %v1265_v44  ;;  %1126 = vst.msk [vmem:[#allocation2 + $0x1c0] sm:$0xff] %vm1068_vm0, %v1046_v16  ;;  %v770_v42 = vmul.f32 %v3739_v43, %v690_v32  ;;  %v771_v55 = vmul.f32 %v3739_v43, %v691_v41  ;;  %v260_v24 = vld [vmem:[%s5263_s0 + $0x1f1] sm:$0xff]  ;;  %v261_v32 = vld [vmem:[%s5263_s0 + $0x1f9] sm:$0xff] }
  0x64   :  { %v1574_v54 = vld [vmem:[#allocation3 + $0x8a] sm:$0xff]  ;;  %v612_v25 = vadd.f32 %v534_v49, %v376_v38  ;;  %v613_v59 = vadd.f32 %v535_v50, %v377_v39  ;;  %v614_v60 = vadd.f32 %v536_v2, %v378_v40  ;;  %v615_v18 = vadd.f32 %v537_v51, %v379_v45  ;;  %v494_v37 = vld [vmem:[%s5263_s0 + $0x1f2] sm:$0xff]  ;;  %v495_v2 = vld [vmem:[%s5263_s0 + $0x1fa] sm:$0xff] }
  0x65   :  { %1636 = vrot.lane.b32.xlu1 %v1574_v54, %s2879_s27  ;;  %v616_v33 = vadd.f32 %v538_v26, %v380_v47  ;;  %1269 = vst.msk [vmem:[#allocation3 + $0x29] sm:$0xff] %vm1068_vm0, %v1267_v13  ;;  %v772_v61 = vmul.f32 %v3739_v43, %v692_v48  ;;  %v773_v62 = vmul.f32 %v3739_v43, %v693_v10  ;;  %v496_v51 = vld [vmem:[%s5263_s0 + $0x202] sm:$0xff]  ;;  %v497_v26 = vld [vmem:[%s5263_s0 + $0x20a] sm:$0xff]  ;;  %vm2103_vm7 = vcmask 1045509  }
  0x66   :  { %v774_v0 = vmul.f32 %v3739_v43, %v694_v21  ;;  %v848_v1 = vadd.f32 %v770_v42, %v612_v25  ;;  %v849_v5 = vadd.f32 %v771_v55, %v613_v59  ;;  %v179_v6 = vmul.f32 %v3666_v53, %v99_v52  ;;  %v729_v42 = vld [vmem:[%s5263_s0 + $0x1eb] sm:$0xff]  ;;  %v730_v59 = vld [vmem:[%s5263_s0 + $0x1f3] sm:$0xff] }
  0x67   :  { %v180_v7 = vmul.f32 %v3666_v53, %v100_v56  ;;  %v181_v8 = vmul.f32 %v3666_v53, %v101_v57  ;;  %v850_v20 = vadd.f32 %v772_v61, %v614_v60  ;;  %v851_v35 = vadd.f32 %v773_v62, %v615_v18  ;;  %v1719_v56 = vld [vmem:[#allocation3 + $0x8b] sm:$0xff]  ;;  %v731_v62 = vld [vmem:[%s5263_s0 + $0x1fb] sm:$0xff] }
  0x68   :  { %v852_v9 = vadd.f32 %v774_v0, %v616_v33  ;;  %v930_v11 = vadd.f32 %v3782_v19, %v848_v1  ;;  %v1250_v46 = vld [vmem:[#allocation2 + $0x1a4] ss:$2 sm:$0xff]  ;;  %v1254_v15 = vld [vmem:[#allocation2 + $0x1a5] ss:$2 sm:$0xff]  ;;  %1491 = vrot.lane.b32.xlu2 %v1429_v58, %s2877_s13  ;;  %v931_v17 = vadd.f32 %v3782_v19, %v849_v5  ;;  %v182_v22 = vmul.f32 %v3666_v53, %v102_v34  ;;  %v732_v0 = vld [vmem:[%s5263_s0 + $0x203] sm:$0xff] }
  0x69   :  { %v183_v23 = vmul.f32 %v3666_v53, %v103_v3  ;;  %v337_v27 = vmul.f32 %v3691_v63, %v257_v4  ;;  %v1264_v16 = vmax.f32 %v1250_v46, %v1254_v15  ;;  %v932_v28 = vadd.f32 %v3782_v19, %v850_v20  ;;  %v733_v4 = vld [vmem:[%s5263_s0 + $0x20b] sm:$0xff] }
  0x6a   :  { %v933_v29 = vadd.f32 %v3782_v19, %v851_v35  ;;  %v934_v30 = vadd.f32 %v3782_v19, %v852_v9  ;;  %v1258_v38 = vld [vmem:[#allocation2 + $0x1b6] ss:$2 sm:$0xff]  ;;  %v1262_v39 = vld [vmem:[#allocation2 + $0x1b7] ss:$2 sm:$0xff]  ;;  %v1008_v40 = vmax.f32 %v930_v11, 0.0  ;;  %v1009_v41 = vmax.f32 %v931_v17, 0.0 }
  0x6b   :  { %v338_v44 = vmul.f32 %v3691_v63, %v258_v12  ;;  %v339_v45 = vmul.f32 %v3691_v63, %v259_v14  ;;  %v1266_v47 = vmax.f32 %v1258_v38, %v1262_v39  ;;  %v1010_v49 = vmax.f32 %v932_v28, 0.0  ;;  %v66_v35 = vld [vmem:[%s5263_s0 + $0xc0] sm:$0xff]  ;;  %v67_v9 = vld [vmem:[%s5263_s0 + $0xc8] sm:$0xff]  ;;  %v68_v15 = vld [vmem:[%s5263_s0 + $0xd0] sm:$0xff] }
  0x6c   :  { %v1011_v48 = vmax.f32 %v933_v29, 0.0  ;;  %v1012_v50 = vmax.f32 %v934_v30, 0.0  ;;  %v1563_v10 = vld [vmem:[#allocation3 + $0x22] sm:$0xff]  ;;  %1087 = vst.msk [vmem:[#allocation2 + $0x90] sm:$0xff] %vm1068_vm0, %v1008_v40  ;;  %v340_v52 = vmul.f32 %v3691_v63, %v260_v24  ;;  %v341_v54 = vmul.f32 %v3691_v63, %v261_v32 }
  0x6d   :  { %v1708_v21 = vld [vmem:[#allocation3 + $0x23] sm:$0xff]  ;;  %v415_v13 = vadd.f32 %v337_v27, %v179_v6  ;;  %v416_v25 = vadd.f32 %v338_v44, %v180_v7  ;;  %1614 = vrot.lane.b32.xlu1 %v1563_v10, %s2879_s27  ;;  %v1268_v55 = vmax.f32 %v1264_v16, %v1266_v47  ;;  %1088 = vst.msk [vmem:[#allocation2 + $0x98] sm:$0xff] %vm1068_vm0, %v1009_v41  ;;  %v226_v47 = vld [vmem:[%s5263_s0 + $0xd1] sm:$0xff]  ;;  %vm2105_vm8 = vcmask 1047559  }
  0x6e   :  { %1759 = vrot.lane.b32.xlu0 %v1708_v21, %s2878_s26  ;;  %v417_v57 = vadd.f32 %v339_v45, %v181_v8  ;;  %v573_v58 = vmul.f32 %v3724_v31, %v493_v36  ;;  %1089 = vst.msk [vmem:[#allocation2 + $0xa0] sm:$0xff] %vm1068_vm0, %v1010_v49  ;;  %v418_v60 = vadd.f32 %v340_v52, %v182_v22  ;;  %v65_v6 = vld [vmem:[%s5263_s0 + $0xb8] sm:$0xff]  ;;  %v224_v36 = vld [vmem:[%s5263_s0 + $0xc1] sm:$0xff]  ;;  %vm2108_vm9 = vcmask 517120  }
  0x6f   :  { %v419_v18 = vadd.f32 %v341_v54, %v183_v23  ;;  %v574_v33 = vmul.f32 %v3724_v31, %v494_v37  ;;  %v575_v61 = vmul.f32 %v3724_v31, %v495_v2  ;;  %1270 = vst.msk [vmem:[#allocation3 + $0x99] sm:$0xff] %vm1068_vm0, %v1268_v55  ;;  %v576_v1 = vmul.f32 %v3724_v31, %v496_v51  ;;  %v1419_v17 = vld [vmem:[#allocation3 + $0x21] sm:$0xff]  ;;  %v225_v37 = vld [vmem:[%s5263_s0 + $0xc9] sm:$0xff]  ;;  %v1430_v49 = vld [vmem:[#allocation3 + $0x89] sm:$0xff] }
  0x70   :  { %v577_v34 = vmul.f32 %v3724_v31, %v497_v26  ;;  %v651_v3 = vadd.f32 %v573_v58, %v415_v13  ;;  %v809_v5 = vmul.f32 %v3739_v43, %v729_v42  ;;  %1781 = vrot.lane.b32.xlu2 %v1719_v56, %s2878_s26  ;;  %1090 = vst.msk [vmem:[#allocation2 + $0xa8] sm:$0xff] %vm1068_vm0, %v1011_v48  ;;  %v223_v16 = vld [vmem:[%s5263_s0 + $0xb9] sm:$0xff]  ;;  %v459_v26 = vld [vmem:[%s5263_s0 + $0xca] sm:$0xff]  ;;  %v462_v55 = vld [vmem:[%s5263_s0 + $0xe2] sm:$0xff]  ;;  %vm2120_vm10 = vcmask 1041920  }
  0x71   :  { %v652_v7 = vadd.f32 %v574_v33, %v416_v25  ;;  %v653_v8 = vadd.f32 %v575_v61, %v417_v57  ;;  %v810_v20 = vmul.f32 %v3739_v43, %v730_v59  ;;  %1091 = vst.msk [vmem:[#allocation2 + $0xb0] sm:$0xff] %vm1068_vm0, %v1012_v50  ;;  %v654_v11 = vadd.f32 %v576_v1, %v418_v60  ;;  %v460_v10 = vld [vmem:[%s5263_s0 + $0xd2] sm:$0xff]  ;;  %v461_v42 = vld [vmem:[%s5263_s0 + $0xda] sm:$0xff] }
  0x72   :  { %v655_v12 = vadd.f32 %v577_v34, %v419_v18  ;;  %v811_v14 = vmul.f32 %v3739_v43, %v731_v62  ;;  %v812_v46 = vmul.f32 %v3739_v43, %v732_v0  ;;  %v813_v22 = vmul.f32 %v3739_v43, %v733_v4  ;;  %v695_v60 = vld [vmem:[%s5263_s0 + $0xcb] sm:$0xff]  ;;  %v696_v18 = vld [vmem:[%s5263_s0 + $0xd3] sm:$0xff]  ;;  %v697_v33 = vld [vmem:[%s5263_s0 + $0xdb] sm:$0xff] }
  0x73   :  { %v887_v23 = vadd.f32 %v809_v5, %v651_v3  ;;  %v888_v24 = vadd.f32 %v810_v20, %v652_v7  ;;  %v145_v27 = vmul.f32 %v3666_v53, %v65_v6  ;;  %v146_v30 = vmul.f32 %v3666_v53, %v66_v35  ;;  %v1709_v20 = vld [vmem:[#allocation3 + $0x2b] sm:$0xff] }
  0x74   :  { %v889_v28 = vadd.f32 %v811_v14, %v653_v8  ;;  %v890_v29 = vadd.f32 %v812_v46, %v654_v11  ;;  %v147_v32 = vmul.f32 %v3666_v53, %v67_v9  ;;  %v1272_v38 = vld [vmem:[#allocation2 + $0x90] ss:$2 sm:$0xff]  ;;  %v1276_v39 = vld [vmem:[#allocation2 + $0x91] ss:$2 sm:$0xff]  ;;  %v891_v40 = vadd.f32 %v813_v22, %v655_v12 }
  0x75   :  { %v969_v41 = vadd.f32 %v3782_v19, %v887_v23  ;;  %v970_v44 = vadd.f32 %v3782_v19, %v888_v24  ;;  %v148_v45 = vmul.f32 %v3666_v53, %v68_v15  ;;  %v1287_v48 = vmax.f32 %v1272_v38, %v1276_v39  ;;  %v698_v8 = vld [vmem:[%s5263_s0 + $0xe3] sm:$0xff]  ;;  %v106_v24 = vld [vmem:[%s5263_s0 + $0x210] sm:$0xff] }
  0x76   :  { %1471 = vrot.lane.b32.xlu0 %v1419_v17, %s2877_s13  ;;  %v971_v50 = vadd.f32 %v3782_v19, %v889_v28  ;;  %v972_v2 = vadd.f32 %v3782_v19, %v890_v29  ;;  %v303_v51 = vmul.f32 %v3691_v63, %v223_v16  ;;  %v1575_v21 = vld [vmem:[#allocation3 + $0x92] sm:$0xff]  ;;  %v973_v52 = vadd.f32 %v3782_v19, %v891_v40  ;;  %v104_v14 = vld [vmem:[%s5263_s0 + $0x200] sm:$0xff] }
  0x77   :  { %v1047_v54 = vmax.f32 %v969_v41, 0.0  ;;  %v1048_v13 = vmax.f32 %v970_v44, 0.0  ;;  %v304_v25 = vmul.f32 %v3691_v63, %v224_v36  ;;  %1638 = vrot.lane.b32.xlu1 %v1575_v21, %s2879_s27  ;;  %v305_v58 = vmul.f32 %v3691_v63, %v225_v37  ;;  %v105_v23 = vld [vmem:[%s5263_s0 + $0x208] sm:$0xff] }
  0x78   :  { %v1049_v56 = vmax.f32 %v971_v50, 0.0  ;;  %v1050_v57 = vmax.f32 %v972_v2, 0.0  ;;  %v306_v59 = vmul.f32 %v3691_v63, %v226_v47  ;;  %1493 = vrot.lane.b32.xlu2 %v1430_v49, %s2877_s13  ;;  %v1280_v61 = vld [vmem:[#allocation2 + $0xa2] ss:$2 sm:$0xff]  ;;  %v1284_v62 = vld [vmem:[#allocation2 + $0xa3] ss:$2 sm:$0xff]  ;;  %v381_v1 = vadd.f32 %v303_v51, %v145_v27 }
  0x79   :  { %v1051_v0 = vmax.f32 %v973_v52, 0.0  ;;  %1127 = vst.msk [vmem:[#allocation2 + $0x1c8] sm:$0xff] %vm1068_vm0, %v1047_v54  ;;  %v382_v34 = vadd.f32 %v304_v25, %v146_v30  ;;  %v539_v3 = vmul.f32 %v3724_v31, %v459_v26  ;;  %v1289_v4 = vmax.f32 %v1280_v61, %v1284_v62  ;;  %v1564_v27 = vld [vmem:[#allocation3 + $0x2a] sm:$0xff]  ;;  %v1720_v37 = vld [vmem:[#allocation3 + $0x93] sm:$0xff] }
  0x7a   :  { %1128 = vst.msk [vmem:[#allocation2 + $0x1d0] sm:$0xff] %vm1068_vm0, %v1048_v13  ;;  %v383_v5 = vadd.f32 %v305_v58, %v147_v32  ;;  %v384_v6 = vadd.f32 %v306_v59, %v148_v45  ;;  %v540_v7 = vmul.f32 %v3724_v31, %v460_v10  ;;  %v541_v35 = vmul.f32 %v3724_v31, %v461_v42  ;;  %v107_v32 = vld [vmem:[%s5263_s0 + $0x218] sm:$0xff]  ;;  %v262_v36 = vld [vmem:[%s5263_s0 + $0x201] sm:$0xff]  ;;  %v263_v50 = vld [vmem:[%s5263_s0 + $0x209] sm:$0xff] }
  0x7b   :  { %1129 = vst.msk [vmem:[#allocation2 + $0x1d8] sm:$0xff] %vm1068_vm0, %v1049_v56  ;;  %v542_v9 = vmul.f32 %v3724_v31, %v462_v55  ;;  %v617_v11 = vadd.f32 %v539_v3, %v381_v1  ;;  %v775_v12 = vmul.f32 %v3739_v43, %v695_v60  ;;  %v1291_v46 = vmax.f32 %v1287_v48, %v1289_v4  ;;  %v264_v2 = vld [vmem:[%s5263_s0 + $0x211] sm:$0xff]  ;;  %v1420_v26 = vld [vmem:[#allocation3 + $0x29] sm:$0xff] }
  0x7c   :  { %1130 = vst.msk [vmem:[#allocation2 + $0x1e0] sm:$0xff] %vm1068_vm0, %v1050_v57  ;;  %v618_v15 = vadd.f32 %v540_v7, %v382_v34  ;;  %v776_v17 = vmul.f32 %v3739_v43, %v696_v18  ;;  %v777_v22 = vmul.f32 %v3739_v43, %v697_v33  ;;  %v619_v16 = vadd.f32 %v541_v35, %v383_v5  ;;  %v1576_v59 = vld [vmem:[#allocation3 + $0x9a] sm:$0xff]  ;;  %v1431_v18 = vld [vmem:[#allocation3 + $0x91] sm:$0xff] }
  0x7d   :  { %1131 = vst.msk [vmem:[#allocation2 + $0x1e8] sm:$0xff] %vm1068_vm0, %v1051_v0  ;;  %v620_v28 = vadd.f32 %v542_v9, %v384_v6  ;;  %v778_v29 = vmul.f32 %v3739_v43, %v698_v8  ;;  %v853_v30 = vadd.f32 %v775_v12, %v617_v11  ;;  %v4036_v39 = vmul.f32 %v3666_v53, %v104_v14  ;;  %v1877_v1 = vld [vmem:[%s5267_s4 + $0x78] sm:$0xff]  ;;  %v1876_v4 = vld [vmem:[%s5267_s4 + $0x70] sm:$0xff] }
  0x7e   :  { %1761 = vrot.lane.b32.xlu0 %v1709_v20, %s2878_s26  ;;  %1293 = vst.msk [vmem:[#allocation3 + $0x33] sm:$0xff] %vm1068_vm0, %v1291_v46  ;;  %v854_v38 = vadd.f32 %v776_v17, %v618_v15  ;;  %v855_v40 = vadd.f32 %v777_v22, %v619_v16  ;;  %v4040_v45 = vmul.f32 %v3666_v53, %v105_v23  ;;  %v265_v6 = vld [vmem:[%s5263_s0 + $0x219] sm:$0xff]  ;;  %v500_v15 = vld [vmem:[%s5263_s0 + $0x222] sm:$0xff]  ;;  %v501_v17 = vld [vmem:[%s5263_s0 + $0x22a] sm:$0xff]  ;;  %vm2795_vm11 = vcmask 9216  }
  0x7f   :  { %v856_v41 = vadd.f32 %v778_v29, %v620_v28  ;;  %v935_v44 = vadd.f32 %v3782_v19, %v853_v30  ;;  %1616 = vrot.lane.b32.xlu1 %v1564_v27, %s2879_s27  ;;  %v4045_v49 = vmul.f32 %v3666_v53, %v106_v24  ;;  %v4048_v48 = vmul.f32 %v3666_v53, %v107_v32  ;;  %v1721_v9 = vld [vmem:[#allocation3 + $0x9b] sm:$0xff]  ;;  %v735_v24 = vld [vmem:[%s5263_s0 + $0x21b] sm:$0xff]  ;;  %v736_v27 = vld [vmem:[%s5263_s0 + $0x223] sm:$0xff] }
  0x80   :  { %v936_v47 = vadd.f32 %v3782_v19, %v854_v38  ;;  %v342_v51 = vmul.f32 %v3691_v63, %v262_v36  ;;  %1783 = vrot.lane.b32.xlu2 %v1720_v37, %s2878_s26  ;;  %v937_v52 = vadd.f32 %v3782_v19, %v855_v40  ;;  %v343_v33 = vmul.f32 %v3691_v63, %v263_v50  ;;  %v498_v14 = vld [vmem:[%s5263_s0 + $0x212] sm:$0xff]  ;;  %v499_v46 = vld [vmem:[%s5263_s0 + $0x21a] sm:$0xff] }
  0x81   :  { %v1274_v10 = vld [vmem:[#allocation2 + $0x1c8] ss:$2 sm:$0xff]  ;;  %v1278_v21 = vld [vmem:[#allocation2 + $0x1c9] ss:$2 sm:$0xff]  ;;  %v938_v54 = vadd.f32 %v3782_v19, %v856_v41  ;;  %v1013_v13 = vmax.f32 %v935_v44, 0.0  ;;  %v344_v61 = vmul.f32 %v3691_v63, %v264_v2  ;;  %1882 = vmatpush.msra.mxu0 %v1877_v1  ;;  %1993 = vmatpush.msra.mxu1 %v1877_v1  ;;  %v345_v12 = vmul.f32 %v3691_v63, %v265_v6  ;;  %v70_v40 = vld [vmem:[%s5263_s0 + $0xe0] sm:$0xff] }
  0x82   :  { %v1288_v25 = vmax.f32 %v1274_v10, %v1278_v21  ;;  %v1014_v42 = vmax.f32 %v936_v47, 0.0  ;;  %v1015_v55 = vmax.f32 %v937_v52, 0.0  ;;  %v734_v63 = vld [vmem:[%s5263_s0 + $0x213] sm:$0xff]  ;;  %v420_v22 = vadd.f32 %v342_v51, %v4036_v39  ;;  %v737_v16 = vld [vmem:[%s5263_s0 + $0x22b] sm:$0xff]  ;;  %v1874_v50 = vld [vmem:[%s5267_s4 + $0x60] sm:$0xff] }
  0x83   :  { %v1016_v56 = vmax.f32 %v938_v54, 0.0  ;;  %1092 = vst.msk [vmem:[#allocation2 + $0xb8] sm:$0xff] %vm1068_vm0, %v1013_v13  ;;  %1883 = vmatpush.msra.mxu0 %v1876_v4  ;;  %1994 = vmatpush.msra.mxu1 %v1876_v4  ;;  %v421_v23 = vadd.f32 %v343_v33, %v4040_v45  ;;  %v422_v29 = vadd.f32 %v344_v61, %v4045_v49  ;;  %v69_v39 = vld [vmem:[%s5263_s0 + $0xd8] sm:$0xff]  ;;  %v71_v21 = vld [vmem:[%s5263_s0 + $0xe8] sm:$0xff]  ;;  %v4164_v33 = vld [vmem:[%s5265_s2] ss:$0 sm:$0xff] }
  0x84   :  { %v1282_v57 = vld [vmem:[#allocation2 + $0x1da] ss:$2 sm:$0xff]  ;;  %v1286_v58 = vld [vmem:[#allocation2 + $0x1db] ss:$2 sm:$0xff]  ;;  %1093 = vst.msk [vmem:[#allocation2 + $0xc0] sm:$0xff] %vm1068_vm0, %v1014_v42  ;;  %v423_v30 = vadd.f32 %v345_v12, %v4048_v48  ;;  %v578_v32 = vmul.f32 %v3724_v31, %v498_v14  ;;  %v579_v36 = vmul.f32 %v3724_v31, %v499_v46  ;;  %v580_v37 = vmul.f32 %v3724_v31, %v500_v15  ;;  %v1873_v54 = vld [vmem:[%s5267_s4 + $0x58] sm:$0xff] }
  0x85   :  { %v1290_v60 = vmax.f32 %v1282_v57, %v1286_v58  ;;  %1094 = vst.msk [vmem:[#allocation2 + $0xc8] sm:$0xff] %vm1068_vm0, %v1015_v55  ;;  %v1710_v0 = vld [vmem:[#allocation3 + $0x33] sm:$0xff]  ;;  %v581_v38 = vmul.f32 %v3724_v31, %v501_v17  ;;  %v814_v44 = vmul.f32 %v3739_v43, %v734_v63  ;;  %v815_v45 = vmul.f32 %v3739_v43, %v735_v24  ;;  %v73_v13 = vld [vmem:[%s5263_s0 + $0xf8] sm:$0xff]  ;;  %v466_v63 = vld [vmem:[%s5263_s0 + $0x102] sm:$0xff] }
  0x86   :  { %1473 = vrot.lane.b32.xlu0 %v1420_v26, %s2877_s13  ;;  %1095 = vst.msk [vmem:[#allocation2 + $0xd0] sm:$0xff] %vm1068_vm0, %v1016_v56  ;;  %v1565_v7 = vld [vmem:[#allocation3 + $0x32] sm:$0xff]  ;;  %v816_v47 = vmul.f32 %v3739_v43, %v736_v27  ;;  %v817_v49 = vmul.f32 %v3739_v43, %v737_v16  ;;  %v656_v2 = vadd.f32 %v578_v32, %v420_v22  ;;  %v227_v58 = vld [vmem:[%s5263_s0 + $0xd9] sm:$0xff] }
  0x87   :  { %v1292_v62 = vmax.f32 %v1288_v25, %v1290_v60  ;;  %1640 = vrot.lane.b32.xlu1 %v1576_v59, %s2879_s27  ;;  %v1421_v28 = vld [vmem:[#allocation3 + $0x31] sm:$0xff]  ;;  %v657_v51 = vadd.f32 %v579_v36, %v421_v23  ;;  %v658_v26 = vadd.f32 %v580_v37, %v422_v29  ;;  %v1432_v10 = vld [vmem:[#allocation3 + $0x99] sm:$0xff]  ;;  %v659_v52 = vadd.f32 %v581_v38, %v423_v30  ;;  %v228_v59 = vld [vmem:[%s5263_s0 + $0xe1] sm:$0xff] }
  0x88   :  { %1495 = vrot.lane.b32.xlu2 %v1431_v18, %s2877_s13  ;;  %v1875_v48 = vld [vmem:[%s5267_s4 + $0x68] sm:$0xff]  ;;  %v72_v43 = vld [vmem:[%s5263_s0 + $0xf0] sm:$0xff]  ;;  %v149_v25 = vmul.f32 %v3666_v53, %v69_v39  ;;  %v150_v42 = vmul.f32 %v3666_v53, %v70_v40  ;;  %v892_v55 = vadd.f32 %v814_v44, %v656_v2  ;;  %v151_v61 = vmul.f32 %v4164_v33, %v71_v21  ;;  %v465_v17 = vld [vmem:[%s5263_s0 + $0xfa] sm:$0xff] }
  0x89   :  { %1294 = vst.msk [vmem:[#allocation3 + $0xa3] sm:$0xff] %vm1068_vm0, %v1292_v62  ;;  %1884 = vmatpush.msra.mxu0 %v1875_v48  ;;  %1995 = vmatpush.msra.mxu1 %v1875_v48  ;;  %v893_v56 = vadd.f32 %v815_v45, %v657_v51  ;;  %v894_v57 = vadd.f32 %v816_v47, %v658_v26  ;;  %v229_v60 = vld [vmem:[%s5263_s0 + $0xe9] sm:$0xff]  ;;  %v464_v15 = vld [vmem:[%s5263_s0 + $0xf2] sm:$0xff]  ;;  %v4217_v39 = vld [vmem:[%s5265_s2 + $0x2] ss:$0 sm:$0xff] }
  0x8a   :  { %v895_v18 = vadd.f32 %v817_v49, %v659_v52  ;;  %v1872_v53 = vld [vmem:[%s5267_s4 + $0x50] sm:$0xff]  ;;  %v152_v62 = vmul.f32 %v4164_v33, %v72_v43  ;;  %v974_v1 = vadd.f32 %v3782_v19, %v892_v55  ;;  %v153_v4 = vmul.f32 %v4164_v33, %v73_v13  ;;  %v702_v45 = vld [vmem:[%s5263_s0 + $0x103] sm:$0xff] }
  0x8b   :  { %v1296_v34 = vld [vmem:[#allocation2 + $0xb4] ss:$2 sm:$0xff]  ;;  %v1300_v3 = vld [vmem:[#allocation2 + $0xb5] ss:$2 sm:$0xff]  ;;  %1885 = vmatpush.msra.mxu0 %v1874_v50  ;;  %1996 = vmatpush.msra.mxu1 %v1874_v50  ;;  %v700_v37 = vld [vmem:[%s5263_s0 + $0xf3] sm:$0xff]  ;;  %v544_v40 = vmul.f32 %v4217_v39, %v464_v15  ;;  %v546_v44 = vmul.f32 %v4217_v39, %v466_v63 }
  0x8c   :  { %v1311_v5 = vmax.f32 %v1296_v34, %v1300_v3  ;;  %v975_v34 = vadd.f32 %v3782_v19, %v893_v56  ;;  %v976_v3 = vadd.f32 %v3782_v19, %v894_v57  ;;  %v977_v6 = vadd.f32 %v3782_v19, %v895_v18  ;;  %v699_v29 = vld [vmem:[%s5263_s0 + $0xeb] sm:$0xff]  ;;  %v4237_v50 = vld [vmem:[%s5265_s2 + $0x3] ss:$0 sm:$0xff]  ;;  %v1488_v56 = vpop.permute.xlu1 %1487 }
  0x8d   :  { %v1304_v8 = vld [vmem:[#allocation2 + $0xc6] ss:$2 sm:$0xff]  ;;  %v1308_v20 = vld [vmem:[#allocation2 + $0xc7] ss:$2 sm:$0xff]  ;;  %1886 = vmatpush.msra.mxu0 %v1873_v54  ;;  %1997 = vmatpush.msra.mxu1 %v1873_v54  ;;  %v1052_v12 = vmax.f32 %v974_v1, 0.0  ;;  %v779_v2 = vmul.f32 %v4237_v50, %v699_v29  ;;  %v780_v21 = vmul.f32 %v4237_v50, %v700_v37  ;;  %v108_v43 = vld [vmem:[%s5263_s0 + $0x220] sm:$0xff]  ;;  %v782_v13 = vmul.f32 %v4237_v50, %v702_v45 }
  0x8e   :  { %1763 = vrot.lane.b32.xlu0 %v1710_v0, %s2878_s26  ;;  %v1313_v35 = vmax.f32 %v1304_v8, %v1308_v20  ;;  %v230_v0 = vld [vmem:[%s5263_s0 + $0xf1] sm:$0xff]  ;;  %v4182_v8 = vld [vmem:[%s5265_s2 + $0x1] ss:$0 sm:$0xff]  ;;  %v1053_v14 = vmax.f32 %v975_v34, 0.0  ;;  %v1054_v19 = vmax.f32 %v976_v3, 0.0  ;;  %v1055_v23 = vmax.f32 %v977_v6, 0.0 }
  0x8f   :  { %1618 = vrot.lane.b32.xlu1 %v1565_v7, %s2879_s27  ;;  %v307_v20 = vmul.f32 %v4182_v8, %v227_v58  ;;  %1887 = vmatpush.msra.mxu0 %v1872_v53  ;;  %v310_v46 = vmul.f32 %v4182_v8, %v230_v0  ;;  %1132 = vst.msk [vmem:[#allocation2 + $0x1f0] sm:$0xff] %vm1068_vm0, %v1052_v12  ;;  %v703_v47 = vld [vmem:[%s5263_s0 + $0x10b] sm:$0xff]  ;;  %v111_v6 = vld [vmem:[%s5263_s0 + $0x238] sm:$0xff]  ;;  %v266_v12 = vld [vmem:[%s5263_s0 + $0x221] sm:$0xff] }
  0x90   :  { %v1315_v11 = vmax.f32 %v1311_v5, %v1313_v35  ;;  %1785 = vrot.lane.b32.xlu2 %v1721_v9, %s2878_s26  ;;  %v1577_v41 = vld [vmem:[#allocation3 + $0xa2] sm:$0xff]  ;;  %v308_v35 = vmul.f32 %v4182_v8, %v228_v59  ;;  %v309_v9 = vmul.f32 %v4182_v8, %v229_v60  ;;  %1998 = vmatpush.msra.mxu1 %v1872_v53  ;;  %v1379_v57 = vld [vmem:[#allocation3 + $0x70] sm:$0xff]  ;;  %v1464_v53 = vpop.permute.xlu0 %1463  ;;  %v110_v0 = vld [vmem:[%s5263_s0 + $0x230] sm:$0xff] }
  0x91   :  { %v231_v5 = vld [vmem:[%s5263_s0 + $0xf9] sm:$0xff]  ;;  %v385_v27 = vadd.f32 %v307_v20, %v149_v25  ;;  %v388_v32 = vadd.f32 %v310_v46, %v152_v62  ;;  %1133 = vst.msk [vmem:[#allocation2 + $0x1f8] sm:$0xff] %vm1068_vm0, %v1053_v14  ;;  %v783_v25 = vmul.f32 %v4237_v50, %v703_v47  ;;  %v109_v58 = vld [vmem:[%s5263_s0 + $0x228] sm:$0xff]  ;;  %v346_v47 = vmul.f32 %v4182_v8, %v266_v12 }
  0x92   :  { %1317 = vst.msk [vmem:[#allocation3 + $0x3d] sm:$0xff] %vm1068_vm0, %v1315_v11  ;;  %v463_v11 = vld [vmem:[%s5263_s0 + $0xea] sm:$0xff]  ;;  %v311_v24 = vmul.f32 %v4182_v8, %v231_v5  ;;  %v386_v16 = vadd.f32 %v308_v35, %v150_v42  ;;  %v387_v30 = vadd.f32 %v309_v9, %v151_v61  ;;  %v1722_v55 = vld [vmem:[#allocation3 + $0xa3] sm:$0xff] }
  0x93   :  { %v543_v36 = vmul.f32 %v3724_v31, %v463_v11  ;;  %v701_v31 = vld [vmem:[%s5263_s0 + $0xfb] sm:$0xff]  ;;  %1134 = vst.msk [vmem:[#allocation2 + $0x200] sm:$0xff] %vm1068_vm0, %v1054_v19  ;;  %v1871_v42 = vld [vmem:[%s5267_s4 + $0x48] sm:$0xff]  ;;  %v188_v11 = vmul.f32 %v4164_v33, %v108_v43  ;;  %v268_v19 = vld [vmem:[%s5263_s0 + $0x231] sm:$0xff] }
  0x94   :  { %v389_v38 = vadd.f32 %v311_v24, %v153_v4  ;;  %1135 = vst.msk [vmem:[#allocation2 + $0x208] sm:$0xff] %vm1068_vm0, %v1055_v23  ;;  %v622_v51 = vadd.f32 %v544_v40, %v386_v16  ;;  %v781_v54 = vmul.f32 %v4237_v50, %v701_v31  ;;  %1888 = vmatpush.msra.mxu0 %v1871_v42  ;;  %v1367_v61 = vld [vmem:[#allocation3] sm:$0xff]  ;;  %v1870_v62 = vld [vmem:[%s5267_s4 + $0x40] sm:$0xff]  ;;  %v267_v14 = vld [vmem:[%s5263_s0 + $0x229] sm:$0xff] }
  0x95   :  { %v621_v48 = vadd.f32 %v543_v36, %v385_v27  ;;  %1403 = vst.msk [vmem:[#allocation4 + $0x60] sm:$0xff] %vm1068_vm0, %v1379_v57  ;;  %1999 = vmatpush.msra.mxu1 %v1871_v42  ;;  %v1869_v5 = vld [vmem:[%s5267_s4 + $0x38] sm:$0xff]  ;;  %v4275_v20 = vld [vmem:[%s5266_s3] ss:$0 sm:$0xff]  ;;  %v1868_v23 = vld [vmem:[%s5267_s4 + $0x30] sm:$0xff]  ;;  %s2804_s3 = sshll.u32 %s5275_s12, 4  ;;  %s2805_s3 = int_to_ptr.hbm [resolvable:$true] %s2804_s3 }
  0x96   :  { %1475 = vrot.lane.b32.xlu0 %v1421_v28, %s2877_s13  ;;  %v467_v28 = vld [vmem:[%s5263_s0 + $0x10a] sm:$0xff]  ;;  %v858_v60 = vadd.f32 %v780_v21, %v622_v51  ;;  %1548 = vst.msk [vmem:[#allocation4 + $0x60] sm:$0xff] %vm1535_vm1, %v1488_v56  ;;  %1889 = vmatpush.msra.mxu0 %v1870_v62  ;;  %v269_v29 = vld [vmem:[%s5263_s0 + $0x239] sm:$0xff]  ;;  %v348_v51 = vmul.f32 %v4182_v8, %v268_v19 }
  0x97   :  { %1642 = vrot.lane.b32.xlu1 %v1577_v41, %s2879_s27  ;;  %v545_v41 = vmul.f32 %v4217_v39, %v465_v17  ;;  %v547_v49 = vmul.f32 %v4217_v39, %v467_v28  ;;  %v857_v59 = vadd.f32 %v779_v2, %v621_v48  ;;  %1391 = vst.msk [vmem:[#allocation4] sm:$0xff] %vm1068_vm0, %v1367_v61  ;;  %v505_v21 = vld [vmem:[%s5263_s0 + $0x24a] sm:$0xff]  ;;  %v506_v43 = vld [vmem:[%s5263_s0 + $0x252] sm:$0xff] }
  0x98   :  { %1497 = vrot.lane.b32.xlu2 %v1432_v10, %s2877_s13  ;;  %v624_v10 = vadd.f32 %v546_v44, %v388_v32  ;;  %v940_v9 = vadd.f32 %v4275_v20, %v858_v60  ;;  %v1298_v46 = vld [vmem:[#allocation2 + $0x1ec] ss:$2 sm:$0xff]  ;;  %v1302_v15 = vld [vmem:[#allocation2 + $0x1ed] ss:$2 sm:$0xff]  ;;  %1536 = vst.msk [vmem:[#allocation4] sm:$0xff] %vm1535_vm1, %v1464_v53  ;;  %2000 = vmatpush.msra.mxu1 %v1870_v62 }
  0x99   :  { %v1711_v7 = vld [vmem:[#allocation3 + $0x3b] sm:$0xff]  ;;  %v623_v26 = vadd.f32 %v545_v41, %v387_v30  ;;  %v625_v52 = vadd.f32 %v547_v49, %v389_v38  ;;  %v939_v35 = vadd.f32 %v4275_v20, %v857_v59  ;;  %v1312_v24 = vmax.f32 %v1298_v46, %v1302_v15  ;;  %1890 = vmatpush.msra.mxu0 %v1869_v5  ;;  %v270_v30 = vld [vmem:[%s5263_s0 + $0x241] sm:$0xff] }
  0x9a   :  { %v1566_v22 = vld [vmem:[#allocation3 + $0x3a] sm:$0xff]  ;;  %v860_v34 = vadd.f32 %v782_v13, %v624_v10  ;;  %v1018_v16 = vmax.f32 %v940_v9, 0.0  ;;  %v189_v28 = vmul.f32 %v4164_v33, %v109_v58  ;;  %2001 = vmatpush.msra.mxu1 %v1869_v5  ;;  %v190_v41 = vmul.f32 %v4164_v33, %v110_v0  ;;  %v503_v49 = vld [vmem:[%s5263_s0 + $0x23a] sm:$0xff]  ;;  %v504_v10 = vld [vmem:[%s5263_s0 + $0x242] sm:$0xff] }
  0x9b   :  { %v1422_v18 = vld [vmem:[#allocation3 + $0x39] sm:$0xff]  ;;  %v859_v1 = vadd.f32 %v781_v54, %v623_v26  ;;  %v861_v3 = vadd.f32 %v783_v25, %v625_v52  ;;  %v1017_v27 = vmax.f32 %v939_v35, 0.0  ;;  %v191_v44 = vmul.f32 %v4164_v33, %v111_v6  ;;  %1891 = vmatpush.msra.mxu0 %v1868_v23  ;;  %v740_v60 = vld [vmem:[%s5263_s0 + $0x243] sm:$0xff]  ;;  %v1433_v19 = vld [vmem:[#allocation3 + $0xa1] sm:$0xff] }
  0x9c   :  { %v942_v63 = vadd.f32 %v4275_v20, %v860_v34  ;;  %v502_v32 = vld [vmem:[%s5263_s0 + $0x232] sm:$0xff]  ;;  %1097 = vst.msk [vmem:[#allocation2 + $0xe0] sm:$0xff] %vm1068_vm0, %v1018_v16  ;;  %2002 = vmatpush.msra.mxu1 %v1868_v23  ;;  %v347_v2 = vmul.f32 %v4182_v8, %v267_v14  ;;  %v349_v26 = vmul.f32 %v4182_v8, %v269_v29  ;;  %v74_v6 = vld [vmem:[%s5263_s0 + $0x100] sm:$0xff]  ;;  %v1867_v14 = vld [vmem:[%s5267_s4 + $0x28] sm:$0xff] }
  0x9d   :  { %v941_v17 = vadd.f32 %v4275_v20, %v859_v1  ;;  %v1306_v36 = vld [vmem:[#allocation2 + $0x1fe] ss:$2 sm:$0xff]  ;;  %v1310_v37 = vld [vmem:[#allocation2 + $0x1ff] ss:$2 sm:$0xff]  ;;  %1096 = vst.msk [vmem:[#allocation2 + $0xd8] sm:$0xff] %vm1068_vm0, %v1017_v27  ;;  %v350_v54 = vmul.f32 %v4182_v8, %v270_v30  ;;  %v424_v13 = vadd.f32 %v346_v47, %v188_v11  ;;  %v582_v25 = vmul.f32 %v4217_v39, %v502_v32 }
  0x9e   :  { %1765 = vrot.lane.b32.xlu0 %v1711_v7, %s2878_s26  ;;  %v112_v7 = vld [vmem:[%s5263_s0 + $0x240] sm:$0xff]  ;;  %v1020_v40 = vmax.f32 %v942_v63, 0.0  ;;  %v1314_v31 = vmax.f32 %v1306_v36, %v1310_v37  ;;  %v738_v42 = vld [vmem:[%s5263_s0 + $0x233] sm:$0xff]  ;;  %v425_v56 = vadd.f32 %v347_v2, %v189_v28  ;;  %v426_v57 = vadd.f32 %v348_v51, %v190_v41  ;;  %v741_v0 = vld [vmem:[%s5263_s0 + $0x24b] sm:$0xff]  ;;  %1892 = vmatpush.msra.mxu0 %v1867_v14 }
  0x9f   :  { %1620 = vrot.lane.b32.xlu1 %v1566_v22, %s2879_s27  ;;  %v943_v22 = vadd.f32 %v4275_v20, %v861_v3  ;;  %v1019_v38 = vmax.f32 %v941_v17, 0.0  ;;  %v192_v45 = vmul.f32 %v4164_v33, %v112_v7  ;;  %v427_v58 = vadd.f32 %v349_v26, %v191_v44  ;;  %v742_v1 = vld [vmem:[%s5263_s0 + $0x253] sm:$0xff]  ;;  %v75_v7 = vld [vmem:[%s5263_s0 + $0x108] sm:$0xff]  ;;  %2003 = vmatpush.msra.mxu1 %v1867_v14 }
  0xa0   :  { %1787 = vrot.lane.b32.xlu2 %v1722_v55, %s2878_s26  ;;  %v1316_v52 = vmax.f32 %v1312_v24, %v1314_v31  ;;  %v739_v55 = vld [vmem:[%s5263_s0 + $0x23b] sm:$0xff]  ;;  %1099 = vst.msk [vmem:[#allocation2 + $0xf0] sm:$0xff] %vm1068_vm0, %v1020_v40  ;;  %v583_v59 = vmul.f32 %v4217_v39, %v503_v49  ;;  %v584_v53 = vmul.f32 %v4217_v39, %v504_v10  ;;  %v76_v16 = vld [vmem:[%s5263_s0 + $0x110] sm:$0xff]  ;;  %v113_v14 = vld [vmem:[%s5263_s0 + $0x248] sm:$0xff] }
  0xa1   :  { %v1633_v4 = vpop.permute.xlu2 %1632  ;;  %v1021_v48 = vmax.f32 %v943_v22, 0.0  ;;  %1098 = vst.msk [vmem:[#allocation2 + $0xe8] sm:$0xff] %vm1068_vm0, %v1019_v38  ;;  %v585_v61 = vmul.f32 %v4217_v39, %v505_v21  ;;  %v586_v62 = vmul.f32 %v4217_v39, %v506_v43  ;;  %v660_v34 = vadd.f32 %v582_v25, %v424_v13  ;;  %v1866_v24 = vld [vmem:[%s5267_s4 + $0x20] sm:$0xff]  ;;  %v77_v28 = vld [vmem:[%s5263_s0 + $0x118] sm:$0xff]  ;;  %v233_v47 = vld [vmem:[%s5263_s0 + $0x109] sm:$0xff] }
  0xa2   :  { %1693 = vst.msk [vmem:[#allocation4 + $0x60] sm:$0xff] %vm1680_vm2, %v1633_v4  ;;  %v661_v3 = vadd.f32 %v583_v59, %v425_v56  ;;  %v818_v4 = vmul.f32 %v4237_v50, %v738_v42  ;;  %v819_v5 = vmul.f32 %v4237_v50, %v739_v55  ;;  %v662_v35 = vadd.f32 %v584_v53, %v426_v57  ;;  %v1865_v31 = vld [vmem:[%s5267_s4 + $0x18] sm:$0xff] }
  0xa3   :  { %1318 = vst.msk [vmem:[#allocation3 + $0xad] sm:$0xff] %vm1068_vm0, %v1316_v52  ;;  %v663_v9 = vadd.f32 %v585_v61, %v427_v58  ;;  %v820_v12 = vmul.f32 %v4237_v50, %v740_v60  ;;  %v821_v17 = vmul.f32 %v4237_v50, %v741_v0  ;;  %v822_v63 = vmul.f32 %v4237_v50, %v742_v1  ;;  %v234_v51 = vld [vmem:[%s5263_s0 + $0x111] sm:$0xff]  ;;  %v235_v26 = vld [vmem:[%s5263_s0 + $0x119] sm:$0xff] }
  0xa4   :  { %1100 = vst.msk [vmem:[#allocation2 + $0xf8] sm:$0xff] %vm1068_vm0, %v1021_v48  ;;  %v896_v22 = vadd.f32 %v818_v4, %v660_v34  ;;  %v897_v23 = vadd.f32 %v819_v5, %v661_v3  ;;  %v1320_v29 = vld [vmem:[#allocation2 + $0xd8] ss:$2 sm:$0xff]  ;;  %v1324_v30 = vld [vmem:[#allocation2 + $0xd9] ss:$2 sm:$0xff]  ;;  %v154_v36 = vmul.f32 %v4164_v33, %v74_v6  ;;  %v155_v37 = vmul.f32 %v4164_v33, %v75_v7  ;;  %v468_v25 = vld [vmem:[%s5263_s0 + $0x112] sm:$0xff] }
  0xa5   :  { %v898_v32 = vadd.f32 %v820_v12, %v662_v35  ;;  %v1335_v38 = vmax.f32 %v1320_v29, %v1324_v30  ;;  %v899_v40 = vadd.f32 %v821_v17, %v663_v9  ;;  %1893 = vmatpush.msra.mxu0 %v1866_v24  ;;  %2004 = vmatpush.msra.mxu1 %v1866_v24  ;;  %v469_v61 = vld [vmem:[%s5263_s0 + $0x11a] sm:$0xff]  ;;  %v471_v0 = vld [vmem:[%s5263_s0 + $0x12a] sm:$0xff] }
  0xa6   :  { %1477 = vrot.lane.b32.xlu0 %v1422_v18, %s2877_s13  ;;  %v428_v18 = vadd.f32 %v350_v54, %v192_v45  ;;  %v978_v44 = vadd.f32 %v4275_v20, %v896_v22  ;;  %v232_v45 = vld [vmem:[%s5263_s0 + $0x101] sm:$0xff]  ;;  %v979_v49 = vadd.f32 %v4275_v20, %v897_v23  ;;  %v156_v2 = vmul.f32 %v4164_v33, %v76_v16  ;;  %v1864_v54 = vld [vmem:[%s5267_s4 + $0x10] sm:$0xff] }
  0xa7   :  { %v1754_v46 = vpop.permute.xlu1 %1753  ;;  %v980_v48 = vadd.f32 %v4275_v20, %v898_v32  ;;  %v981_v21 = vadd.f32 %v4275_v20, %v899_v40  ;;  %v157_v13 = vmul.f32 %v4164_v33, %v77_v28  ;;  %1894 = vmatpush.msra.mxu0 %v1865_v31  ;;  %v312_v58 = vmul.f32 %v4182_v8, %v232_v45  ;;  %v704_v5 = vld [vmem:[%s5263_s0 + $0x113] sm:$0xff]  ;;  %v705_v6 = vld [vmem:[%s5263_s0 + $0x11b] sm:$0xff]  ;;  %v706_v7 = vld [vmem:[%s5263_s0 + $0x123] sm:$0xff] }
  0xa8   :  { %v664_v11 = vadd.f32 %v586_v62, %v428_v18  ;;  %v1609_v15 = vpop.permute.xlu0 %1608  ;;  %1499 = vrot.lane.b32.xlu2 %v1433_v19, %s2877_s13  ;;  %v1056_v52 = vmax.f32 %v978_v44, 0.0  ;;  %v1057_v56 = vmax.f32 %v979_v49, 0.0  ;;  %v313_v59 = vmul.f32 %v4182_v8, %v233_v47  ;;  %2005 = vmatpush.msra.mxu1 %v1865_v31  ;;  %v470_v62 = vld [vmem:[%s5263_s0 + $0x122] sm:$0xff]  ;;  %v707_v12 = vld [vmem:[%s5263_s0 + $0x12b] sm:$0xff]  ;;  %v115_v31 = vld [vmem:[%s5263_s0 + $0x258] sm:$0xff] }
  0xa9   :  { %1681 = vst.msk [vmem:[#allocation4] sm:$0xff] %vm1680_vm2, %v1609_v15  ;;  %v1058_v57 = vmax.f32 %v980_v48, 0.0  ;;  %v1059_v18 = vmax.f32 %v981_v21, 0.0  ;;  %v314_v53 = vmul.f32 %v4182_v8, %v234_v51  ;;  %1895 = vmatpush.msra.mxu0 %v1864_v54  ;;  %v315_v34 = vmul.f32 %v4182_v8, %v235_v26  ;;  %v114_v19 = vld [vmem:[%s5263_s0 + $0x250] sm:$0xff]  ;;  %v1863_v22 = vld [vmem:[%s5267_s4 + $0x8] sm:$0xff]  ;;  %v1368_v24 = vld [vmem:[#allocation3 + $0x8] sm:$0xff] }
  0xaa   :  { %v1778_v27 = vpop.permute.xlu2 %1777  ;;  %v900_v41 = vadd.f32 %v822_v63, %v664_v11  ;;  %1826 = vst.msk [vmem:[#allocation4] sm:$0xff] %vm1825_vm3, %v1754_v46  ;;  %v1578_v10 = vld [vmem:[#allocation3 + $0xaa] sm:$0xff]  ;;  %v390_v3 = vadd.f32 %v312_v58, %v154_v36  ;;  %v391_v4 = vadd.f32 %v313_v59, %v155_v37  ;;  %2006 = vmatpush.msra.mxu1 %v1864_v54  ;;  %v1380_v49 = vld [vmem:[#allocation3 + $0x78] sm:$0xff]  ;;  %v273_v54 = vld [vmem:[%s5263_s0 + $0x259] sm:$0xff] }
  0xab   :  { %1838 = vst.msk [vmem:[#allocation4 + $0x60] sm:$0xff] %vm1825_vm3, %v1778_v27  ;;  %1644 = vrot.lane.b32.xlu1 %v1578_v10, %s2879_s27  ;;  %v1328_v42 = vld [vmem:[#allocation2 + $0xea] ss:$2 sm:$0xff]  ;;  %v1332_v55 = vld [vmem:[#allocation2 + $0xeb] ss:$2 sm:$0xff]  ;;  %v392_v9 = vadd.f32 %v314_v53, %v156_v2  ;;  %v548_v11 = vmul.f32 %v4217_v39, %v468_v25  ;;  %v393_v46 = vadd.f32 %v315_v34, %v157_v13  ;;  %v1723_v23 = vld [vmem:[#allocation3 + $0xab] sm:$0xff] }
  0xac   :  { %v982_v43 = vadd.f32 %v4275_v20, %v900_v41  ;;  %v1337_v60 = vmax.f32 %v1328_v42, %v1332_v55  ;;  %1136 = vst.msk [vmem:[#allocation2 + $0x210] sm:$0xff] %vm1068_vm0, %v1056_v52  ;;  %v549_v15 = vmul.f32 %v4217_v39, %v469_v61  ;;  %v550_v17 = vmul.f32 %v4217_v39, %v470_v62  ;;  %v1862_v41 = vld [vmem:[%s5267_s4] sm:$0xff]  ;;  %v271_v51 = vld [vmem:[%s5263_s0 + $0x249] sm:$0xff]  ;;  %v272_v52 = vld [vmem:[%s5263_s0 + $0x251] sm:$0xff] }
  0xad   :  { %1137 = vst.msk [vmem:[#allocation2 + $0x218] sm:$0xff] %vm1068_vm0, %v1057_v56  ;;  %v551_v63 = vmul.f32 %v4217_v39, %v471_v0  ;;  %v626_v27 = vadd.f32 %v548_v11, %v390_v3  ;;  %v784_v16 = vmul.f32 %v4237_v50, %v704_v5  ;;  %v785_v28 = vmul.f32 %v4237_v50, %v705_v6  ;;  %v116_v45 = vld [vmem:[%s5263_s0 + $0x260] sm:$0xff]  ;;  %v509_v34 = vld [vmem:[%s5263_s0 + $0x26a] sm:$0xff]  ;;  %v510_v3 = vld [vmem:[%s5263_s0 + $0x272] sm:$0xff] }
  0xae   :  { %v1060_v1 = vmax.f32 %v982_v43, 0.0  ;;  %v1339_v35 = vmax.f32 %v1335_v38, %v1337_v60  ;;  %1138 = vst.msk [vmem:[#allocation2 + $0x220] sm:$0xff] %vm1068_vm0, %v1058_v57  ;;  %v786_v29 = vmul.f32 %v4237_v50, %v706_v7  ;;  %v627_v36 = vadd.f32 %v549_v15, %v391_v4  ;;  %1896 = vmatpush.msra.mxu0 %v1863_v22  ;;  %v274_v53 = vld [vmem:[%s5263_s0 + $0x261] sm:$0xff] }
  0xaf   :  { %1139 = vst.msk [vmem:[#allocation2 + $0x228] sm:$0xff] %vm1068_vm0, %v1059_v18  ;;  %v1611_v30 = vpop.permute.xlu1 %1610  ;;  %v628_v37 = vadd.f32 %v550_v17, %v392_v9  ;;  %v629_v38 = vadd.f32 %v551_v63, %v393_v46  ;;  %v787_v40 = vmul.f32 %v4237_v50, %v707_v12  ;;  %v862_v47 = vadd.f32 %v784_v16, %v626_v27  ;;  %v507_v61 = vld [vmem:[%s5263_s0 + $0x25a] sm:$0xff]  ;;  %v744_v17 = vld [vmem:[%s5263_s0 + $0x263] sm:$0xff]  ;;  %v745_v27 = vld [vmem:[%s5263_s0 + $0x26b] sm:$0xff] }
  0xb0   :  { %1341 = vst.msk [vmem:[#allocation3 + $0x47] sm:$0xff] %vm1068_vm0, %v1339_v35  ;;  %v1466_v32 = vpop.permute.xlu0 %1465  ;;  %1789 = vrot.lane.b32.xlu2 %v1723_v23, %s2878_s26  ;;  %v193_v48 = vmul.f32 %v4164_v33, %v113_v14  ;;  %v194_v2 = vmul.f32 %v4164_v33, %v114_v19  ;;  %v863_v26 = vadd.f32 %v785_v28, %v627_v36  ;;  %v743_v11 = vld [vmem:[%s5263_s0 + $0x25b] sm:$0xff] }
  0xb1   :  { %1140 = vst.msk [vmem:[#allocation2 + $0x230] sm:$0xff] %vm1068_vm0, %v1060_v1  ;;  %v864_v10 = vadd.f32 %v786_v29, %v628_v37  ;;  %v865_v21 = vadd.f32 %v787_v40, %v629_v38  ;;  %2007 = vmatpush.msra.mxu1 %v1863_v22  ;;  %v1850_v43 = vld [vmem:[#allocation4] sm:$0xff]  ;;  %v944_v42 = vadd.f32 %v4275_v20, %v862_v47  ;;  %v508_v1 = vld [vmem:[%s5263_s0 + $0x262] sm:$0xff] }
  0xb2   :  { %v1490_v44 = vpop.permute.xlu2 %1489  ;;  %1392 = vst.msk [vmem:[#allocation4 + $0x8] sm:$0xff] %vm1068_vm0, %v1368_v24  ;;  %1897 = vmatpush.msra.mxu0 %v1862_v41  ;;  %v1961_v55 = vld [vmem:[#allocation4 + $0x60] sm:$0xff]  ;;  %v195_v56 = vmul.f32 %v4164_v33, %v115_v31  ;;  %v196_v57 = vmul.f32 %v4164_v33, %v116_v45  ;;  %v945_v59 = vadd.f32 %v4275_v20, %v863_v26 }
  0xb3   :  { %1537 = vst.msk [vmem:[#allocation4 + $0x8] sm:$0xff] %vm1535_vm1, %v1466_v32  ;;  %v946_v60 = vadd.f32 %v4275_v20, %v864_v10  ;;  %v947_v18 = vadd.f32 %v4275_v20, %v865_v21  ;;  %v1022_v62 = vmax.f32 %v944_v42, 0.0  ;;  %1898 = vmatmul.f32.vlgmr.msra.gmra.mxu0 %v1850_v43  ;;  %2008 = vmatpush.msra.mxu1 %v1862_v41  ;;  %v1434_v32 = vld [vmem:[#allocation3 + $0xa9] sm:$0xff] }
  0xb4   :  { %v1322_v13 = vld [vmem:[#allocation2 + $0x210] ss:$2 sm:$0xff]  ;;  %v1326_v25 = vld [vmem:[#allocation2 + $0x211] ss:$2 sm:$0xff]  ;;  %1682 = vst.msk [vmem:[#allocation4 + $0x8] sm:$0xff] %vm1680_vm2, %v1611_v30  ;;  %v351_v33 = vmul.f32 %v4182_v8, %v271_v51  ;;  %v352_v0 = vmul.f32 %v4182_v8, %v272_v52  ;;  %v1023_v6 = vmax.f32 %v945_v59, 0.0  ;;  %2009 = vmatmul.f32.vlgmr.msra.gmra.mxu1 %v1961_v55  ;;  %v353_v9 = vmul.f32 %v4182_v8, %v273_v54 }
  0xb5   :  { %v1336_v58 = vmax.f32 %v1322_v13, %v1326_v25  ;;  %1404 = vst.msk [vmem:[#allocation4 + $0x68] sm:$0xff] %vm1068_vm0, %v1380_v49  ;;  %v1024_v7 = vmax.f32 %v946_v60, 0.0  ;;  %v1025_v35 = vmax.f32 %v947_v18, 0.0  ;;  %v354_v19 = vmul.f32 %v4182_v8, %v274_v53  ;;  %v746_v8 = vld [vmem:[%s5263_s0 + $0x273] sm:$0xff] }
  0xb6   :  { %1549 = vst.msk [vmem:[#allocation4 + $0x68] sm:$0xff] %vm1535_vm1, %v1490_v44  ;;  %v429_v46 = vadd.f32 %v351_v33, %v193_v48  ;;  %v430_v15 = vadd.f32 %v352_v0, %v194_v2  ;;  %v431_v22 = vadd.f32 %v353_v9, %v195_v56  ;;  %v587_v23 = vmul.f32 %v4217_v39, %v507_v61  ;;  %v1369_v0 = vld [vmem:[#allocation3 + $0x10] sm:$0xff] }
  0xb7   :  { %v1567_v4 = vld [vmem:[#allocation3 + $0x42] sm:$0xff]  ;;  %1101 = vst.msk [vmem:[#allocation2 + $0x100] sm:$0xff] %vm1068_vm0, %v1022_v62  ;;  %v588_v24 = vmul.f32 %v4217_v39, %v508_v1  ;;  %v432_v16 = vadd.f32 %v354_v19, %v196_v57  ;;  %v589_v28 = vmul.f32 %v4217_v39, %v509_v34  ;;  %v590_v29 = vmul.f32 %v4217_v39, %v510_v3  ;;  %v1370_v19 = vld [vmem:[#allocation3 + $0x18] sm:$0xff] }
  0xb8   :  { %v1712_v5 = vld [vmem:[#allocation3 + $0x43] sm:$0xff]  ;;  %1622 = vrot.lane.b32.xlu1 %v1567_v4, %s2879_s27  ;;  %v1330_v12 = vld [vmem:[#allocation2 + $0x222] ss:$2 sm:$0xff]  ;;  %v1334_v14 = vld [vmem:[#allocation2 + $0x223] ss:$2 sm:$0xff]  ;;  %1102 = vst.msk [vmem:[#allocation2 + $0x108] sm:$0xff] %vm1068_vm0, %v1023_v6  ;;  %v823_v30 = vmul.f32 %v4237_v50, %v743_v11  ;;  %v1756_v37 = vpop.permute.xlu0 %1755  ;;  %v665_v40 = vadd.f32 %v587_v23, %v429_v46  ;;  %v824_v44 = vmul.f32 %v4237_v50, %v744_v17 }
  0xb9   :  { %1767 = vrot.lane.b32.xlu0 %v1712_v5, %s2878_s26  ;;  %v1338_v63 = vmax.f32 %v1330_v12, %v1334_v14  ;;  %1103 = vst.msk [vmem:[#allocation2 + $0x110] sm:$0xff] %vm1068_vm0, %v1024_v7  ;;  %v666_v41 = vadd.f32 %v588_v24, %v430_v15  ;;  %v667_v45 = vadd.f32 %v589_v28, %v431_v22  ;;  %v1423_v39 = vld [vmem:[#allocation3 + $0x41] sm:$0xff] }
  0xba   :  { %1104 = vst.msk [vmem:[#allocation2 + $0x118] sm:$0xff] %vm1068_vm0, %v1025_v35  ;;  %v1780_v31 = vpop.permute.xlu2 %1779  ;;  %v668_v47 = vadd.f32 %v590_v29, %v432_v16  ;;  %v825_v49 = vmul.f32 %v4237_v50, %v745_v27  ;;  %v826_v48 = vmul.f32 %v4237_v50, %v746_v8  ;;  %1501 = vrot.lane.b32.xlu2 %v1434_v32, %s2877_s13  ;;  %v1381_v3 = vld [vmem:[#allocation3 + $0x80] sm:$0xff]  ;;  %v1383_v8 = vld [vmem:[#allocation3 + $0x90] sm:$0xff]  ;;  %v1372_v32 = vld [vmem:[#allocation3 + $0x28] sm:$0xff] }
  0xbb   :  { %v1340_v38 = vmax.f32 %v1336_v58, %v1338_v63  ;;  %v901_v2 = vadd.f32 %v823_v30, %v665_v40  ;;  %v902_v51 = vadd.f32 %v824_v44, %v666_v41  ;;  %1827 = vst.msk [vmem:[#allocation4 + $0x8] sm:$0xff] %vm1825_vm3, %v1756_v37  ;;  %v1382_v63 = vld [vmem:[#allocation3 + $0x88] sm:$0xff]  ;;  %v1371_v24 = vld [vmem:[#allocation3 + $0x20] sm:$0xff]  ;;  %v1384_v40 = vld [vmem:[#allocation3 + $0x98] sm:$0xff] }
  0xbc   :  { %v903_v26 = vadd.f32 %v825_v49, %v667_v45  ;;  %v904_v10 = vadd.f32 %v826_v48, %v668_v47  ;;  %1393 = vst.msk [vmem:[#allocation4 + $0x10] sm:$0xff] %vm1068_vm0, %v1369_v0  ;;  %v1424_v16 = vld [vmem:[#allocation3 + $0x49] sm:$0xff] }
  0xbd   :  { %1342 = vst.msk [vmem:[#allocation3 + $0xb7] sm:$0xff] %vm1068_vm0, %v1340_v38  ;;  %v983_v21 = vadd.f32 %v4275_v20, %v901_v2  ;;  %v984_v43 = vadd.f32 %v4275_v20, %v902_v51  ;;  %v1386_v0 = vld [vmem:[#allocation3 + $0xa8] sm:$0xff] }
  0xbe   :  { %v1635_v36 = vpop.permute.xlu1 %1634  ;;  %v985_v50 = vadd.f32 %v4275_v20, %v903_v26  ;;  %v986_v13 = vadd.f32 %v4275_v20, %v904_v10  ;;  %1405 = vst.msk [vmem:[#allocation4 + $0x70] sm:$0xff] %vm1068_vm0, %v1381_v3  ;;  %v1373_v10 = vld [vmem:[#allocation3 + $0x30] sm:$0xff] }
  0xbf   :  { %1694 = vst.msk [vmem:[#allocation4 + $0x68] sm:$0xff] %vm1680_vm2, %v1635_v36  ;;  %v1344_v52 = vld [vmem:[#allocation2 + $0xfc] ss:$2 sm:$0xff]  ;;  %v1348_v54 = vld [vmem:[#allocation2 + $0xfd] ss:$2 sm:$0xff]  ;;  %v1061_v42 = vmax.f32 %v983_v21, 0.0 }
  0xc0   :  { %1839 = vst.msk [vmem:[#allocation4 + $0x68] sm:$0xff] %vm1825_vm3, %v1780_v31  ;;  %v1359_v25 = vmax.f32 %v1344_v52, %v1348_v54  ;;  %v1062_v55 = vmax.f32 %v984_v43, 0.0  ;;  %v1063_v58 = vmax.f32 %v985_v50, 0.0  ;;  %v1064_v59 = vmax.f32 %v986_v13, 0.0  ;;  %v1468_v60 = vpop.permute.xlu0 %1467  ;;  %v1385_v43 = vld [vmem:[#allocation3 + $0xa0] sm:$0xff] }
  0xc1   :  { %1479 = vrot.lane.b32.xlu0 %v1423_v39, %s2877_s13  ;;  %v1352_v56 = vld [vmem:[#allocation2 + $0x10e] ss:$2 sm:$0xff]  ;;  %v1356_v57 = vld [vmem:[#allocation2 + $0x10f] ss:$2 sm:$0xff]  ;;  %1141 = vst.msk [vmem:[#allocation2 + $0x238] sm:$0xff] %vm1068_vm0, %v1061_v42 }
  0xc2   :  { %v1361_v18 = vmax.f32 %v1352_v56, %v1356_v57  ;;  %v1492_v61 = vpop.permute.xlu2 %1491  ;;  %1142 = vst.msk [vmem:[#allocation2 + $0x240] sm:$0xff] %vm1068_vm0, %v1062_v55  ;;  %v1851_v1 = vld [vmem:[#allocation4 + $0x8] sm:$0xff] }
  0xc3   :  { %1143 = vst.msk [vmem:[#allocation2 + $0x248] sm:$0xff] %vm1068_vm0, %v1063_v58  ;;  %1901 = vmatmul.f32.gmra.mxu0 %v1851_v1 }
  0xc4   :  { %v1579_v62 = vld [vmem:[#allocation3 + $0xb2] sm:$0xff]  ;;  %v1363_v20 = vmax.f32 %v1359_v25, %v1361_v18  ;;  %1144 = vst.msk [vmem:[#allocation2 + $0x250] sm:$0xff] %vm1068_vm0, %v1064_v59 }
  0xc5   :  { %v1724_v33 = vld [vmem:[#allocation3 + $0xb3] sm:$0xff]  ;;  %1646 = vrot.lane.b32.xlu1 %v1579_v62, %s2879_s27  ;;  %1538 = vst.msk [vmem:[#allocation4 + $0x10] sm:$0xff] %vm1535_vm1, %v1468_v60 }
  0xc6   :  { %1791 = vrot.lane.b32.xlu2 %v1724_v33, %s2878_s26  ;;  %1365 = vst.msk [vmem:[#allocation3 + $0x51] sm:$0xff] %vm1068_vm0, %v1363_v20  ;;  %v1435_v4 = vld [vmem:[#allocation3 + $0xb1] sm:$0xff]  ;;  %v1436_v45 = vld [vmem:[#allocation3 + $0xb9] sm:$0xff] }
  0xc7   :  { %v1962_v34 = vld [vmem:[#allocation4 + $0x68] sm:$0xff]  ;;  %1550 = vst.msk [vmem:[#allocation4 + $0x70] sm:$0xff] %vm1535_vm1, %v1492_v61  ;;  %v1374_v20 = vld [vmem:[#allocation3 + $0x38] sm:$0xff] }
  0xc8   :  { %2012 = vmatmul.f32.gmra.mxu1 %v1962_v34  ;;  %1394 = vst.msk [vmem:[#allocation4 + $0x18] sm:$0xff] %vm1068_vm0, %v1370_v19  ;;  %v4619_v19 = vld [vmem:[%s5268_s5] ss:$0 sm:$0xff] }
  0xc9   :  { %v1613_v53 = vpop.permute.xlu1 %1612  ;;  %v1346_v6 = vld [vmem:[#allocation2 + $0x234] ss:$2 sm:$0xff]  ;;  %v1350_v7 = vld [vmem:[#allocation2 + $0x235] ss:$2 sm:$0xff]  ;;  %1406 = vst.msk [vmem:[#allocation4 + $0x78] sm:$0xff] %vm1068_vm0, %v1382_v63 }
  0xca   :  { %1683 = vst.msk [vmem:[#allocation4 + $0x10] sm:$0xff] %vm1680_vm2, %v1613_v53  ;;  %v1758_v5 = vpop.permute.xlu0 %1757  ;;  %v1782_v35 = vpop.permute.xlu2 %1781  ;;  %v1360_v9 = vmax.f32 %v1346_v6, %v1350_v7  ;;  %v1375_v7 = vld [vmem:[#allocation3 + $0x40] sm:$0xff] }
  0xcb   :  { %v1354_v11 = vld [vmem:[#allocation2 + $0x246] ss:$2 sm:$0xff]  ;;  %v1358_v12 = vld [vmem:[#allocation2 + $0x247] ss:$2 sm:$0xff]  ;;  %1828 = vst.msk [vmem:[#allocation4 + $0x10] sm:$0xff] %vm1825_vm3, %v1758_v5 }
  0xcc   :  { %v1362_v15 = vmax.f32 %v1354_v11, %v1358_v12  ;;  %1395 = vst.msk [vmem:[#allocation4 + $0x20] sm:$0xff] %vm1068_vm0, %v1371_v24 }
  0xcd   :  { %v1568_v46 = vld [vmem:[#allocation3 + $0x4a] sm:$0xff]  ;;  %1407 = vst.msk [vmem:[#allocation4 + $0x80] sm:$0xff] %vm1068_vm0, %v1383_v8  ;;  %v1714_v44 = vld [vmem:[#allocation3 + $0x53] sm:$0xff] }
  0xce   :  { %1503 = vrot.lane.b32.xlu2 %v1435_v4, %s2877_s13  ;;  %v1713_v17 = vld [vmem:[#allocation3 + $0x4b] sm:$0xff]  ;;  %1624 = vrot.lane.b32.xlu1 %v1568_v46, %s2879_s27  ;;  %v1364_v22 = vmax.f32 %v1360_v9, %v1362_v15  ;;  %1396 = vst.msk [vmem:[#allocation4 + $0x28] sm:$0xff] %vm1068_vm0, %v1372_v32  ;;  %v4624_v46 = vld [vmem:[%s5268_s5] ss:$0 sm:$0xff] }
  0xcf   :  { %1769 = vrot.lane.b32.xlu0 %v1713_v17, %s2878_s26  ;;  %1408 = vst.msk [vmem:[#allocation4 + $0x88] sm:$0xff] %vm1068_vm0, %v1384_v40  ;;  %v1569_v31 = vld [vmem:[#allocation3 + $0x52] sm:$0xff] }
  0xd0   :  { %1366 = vst.msk [vmem:[#allocation3 + $0xc1] sm:$0xff] %vm1068_vm0, %v1364_v22  ;;  %v1376_v22 = vld [vmem:[#allocation3 + $0x48] sm:$0xff] }
  0xd1   :  { %1397 = vst.msk [vmem:[#allocation4 + $0x30] sm:$0xff] %vm1068_vm0, %v1373_v10 }
  0xd2   :  { %v1470_v23 = vpop.permute.xlu0 %1469  ;;  %v1494_v27 = vpop.permute.xlu2 %1493  ;;  %v1852_v28 = vld [vmem:[#allocation4 + $0x10] sm:$0xff]  ;;  %1409 = vst.msk [vmem:[#allocation4 + $0x90] sm:$0xff] %vm1068_vm0, %v1385_v43 }
  0xd3   :  { %1539 = vst.msk [vmem:[#allocation4 + $0x18] sm:$0xff] %vm1535_vm1, %v1470_v23  ;;  %1904 = vmatmul.f32.gmra.mxu0 %v1852_v28 }
  0xd4   :  { %1551 = vst.msk [vmem:[#allocation4 + $0x78] sm:$0xff] %vm1535_vm1, %v1494_v27 }
  0xd5   :  { %1398 = vst.msk [vmem:[#allocation4 + $0x38] sm:$0xff] %vm1068_vm0, %v1374_v20 }
  0xd6   :  { %1410 = vst.msk [vmem:[#allocation4 + $0x98] sm:$0xff] %vm1068_vm0, %v1386_v0 }
  0xd7   :  { %v1637_v14 = vpop.permute.xlu1 %1636  ;;  %1481 = vrot.lane.b32.xlu0 %v1424_v16, %s2877_s13  ;;  %v1580_v36 = vld [vmem:[#allocation3 + $0xba] sm:$0xff]  ;;  %v1581_v2 = vld [vmem:[#allocation3 + $0xc2] sm:$0xff]  ;;  %1399 = vst.msk [vmem:[#allocation4 + $0x40] sm:$0xff] %vm1068_vm0, %v1375_v7 }
  0xd8   :  { %1695 = vst.msk [vmem:[#allocation4 + $0x70] sm:$0xff] %vm1680_vm2, %v1637_v14  ;;  %v1725_v37 = vld [vmem:[#allocation3 + $0xbb] sm:$0xff]  ;;  %1648 = vrot.lane.b32.xlu1 %v1580_v36, %s2879_s27  ;;  %v1726_v51 = vld [vmem:[#allocation3 + $0xc3] sm:$0xff] }
  0xd9   :  { %1840 = vst.msk [vmem:[#allocation4 + $0x70] sm:$0xff] %vm1825_vm3, %v1782_v35  ;;  %1793 = vrot.lane.b32.xlu2 %v1725_v37, %s2878_s26  ;;  %v1387_v35 = vld [vmem:[#allocation3 + $0xb0] sm:$0xff]  ;;  %v1388_v16 = vld [vmem:[#allocation3 + $0xb8] sm:$0xff] }
  0xda   :  { %v1784_v41 = vpop.permute.xlu2 %1783  ;;  %1411 = vst.msk [vmem:[#allocation4 + $0xa0] sm:$0xff] %vm1068_vm0, %v1387_v35 }
  0xdb   :  { %1400 = vst.msk [vmem:[#allocation4 + $0x48] sm:$0xff] %vm1068_vm0, %v1376_v22 }
  0xdc   :  { %1412 = vst.msk [vmem:[#allocation4 + $0xa8] sm:$0xff] %vm1068_vm0, %v1388_v16 }
  0xdf   :  { %v1615_v29 = vpop.permute.xlu1 %1614  ;;  %1771 = vrot.lane.b32.xlu0 %v1714_v44, %s2878_s26 }
  0xe0   :  { %v1963_v30 = vld [vmem:[#allocation4 + $0x70] sm:$0xff]  ;;  %1684 = vst.msk [vmem:[#allocation4 + $0x18] sm:$0xff] %vm1680_vm2, %v1615_v29  ;;  %v1760_v38 = vpop.permute.xlu0 %1759  ;;  %1626 = vrot.lane.b32.xlu1 %v1569_v31, %s2879_s27 }
  0xe1   :  { %2015 = vmatmul.f32.gmra.mxu1 %v1963_v30  ;;  %1829 = vst.msk [vmem:[#allocation4 + $0x18] sm:$0xff] %vm1825_vm3, %v1760_v38  ;;  %1505 = vrot.lane.b32.xlu2 %v1436_v45, %s2877_s13 }
  0xe2   :  { %v1496_v39 = vpop.permute.xlu2 %1495 }
  0xe3   :  { %1552 = vst.msk [vmem:[#allocation4 + $0x80] sm:$0xff] %vm1535_vm1, %v1496_v39 }
  0xe8   :  { %v1472_v49 = vpop.permute.xlu0 %1471  ;;  %v1853_v48 = vld [vmem:[#allocation4 + $0x18] sm:$0xff]  ;;  %1650 = vrot.lane.b32.xlu1 %v1581_v2, %s2879_s27 }
  0xe9   :  { %v1639_v47 = vpop.permute.xlu1 %1638  ;;  %1540 = vst.msk [vmem:[#allocation4 + $0x20] sm:$0xff] %vm1535_vm1, %v1472_v49  ;;  %1907 = vmatmul.f32.gmra.mxu0 %v1853_v48  ;;  %1795 = vrot.lane.b32.xlu2 %v1726_v51, %s2878_s26  ;;  %v1425_v2 = vld [vmem:[#allocation3 + $0x51] sm:$0xff] }
  0xea   :  { %1696 = vst.msk [vmem:[#allocation4 + $0x78] sm:$0xff] %vm1680_vm2, %v1639_v47  ;;  %v1786_v54 = vpop.permute.xlu2 %1785 }
  0xeb   :  { %1841 = vst.msk [vmem:[#allocation4 + $0x78] sm:$0xff] %vm1825_vm3, %v1784_v41 }
  0xf0   :  { %v1762_v52 = vpop.permute.xlu0 %1761  ;;  %1483 = vrot.lane.b32.xlu1 %v1425_v2, %s2877_s13 }
  0xf1   :  { %v1617_v26 = vpop.permute.xlu1 %1616 }
  0xf2   :  { %1685 = vst.msk [vmem:[#allocation4 + $0x20] sm:$0xff] %vm1680_vm2, %v1617_v26  ;;  %v1964_v21 = vld [vmem:[#allocation4 + $0x78] sm:$0xff]  ;;  %v1498_v42 = vpop.permute.xlu2 %1497 }
  0xf3   :  { %2018 = vmatmul.f32.gmra.mxu1 %v1964_v21  ;;  %1830 = vst.msk [vmem:[#allocation4 + $0x20] sm:$0xff] %vm1825_vm3, %v1762_v52 }
  0xf4   :  { %1553 = vst.msk [vmem:[#allocation4 + $0x88] sm:$0xff] %vm1535_vm1, %v1498_v42 }
  0xf8   :  { %v1474_v13 = vpop.permute.xlu0 %1473 }
  0xf9   :  { %v1641_v50 = vpop.permute.xlu1 %1640  ;;  %1541 = vst.msk [vmem:[#allocation4 + $0x28] sm:$0xff] %vm1535_vm1, %v1474_v13 }
  0xfa   :  { %1697 = vst.msk [vmem:[#allocation4 + $0x80] sm:$0xff] %vm1680_vm2, %v1641_v50  ;;  %v1854_v25 = vld [vmem:[#allocation4 + $0x20] sm:$0xff]  ;;  %v1788_v58 = vpop.permute.xlu2 %1787 }
  0xfb   :  { %1842 = vst.msk [vmem:[#allocation4 + $0x80] sm:$0xff] %vm1825_vm3, %v1786_v54  ;;  %1910 = vmatmul.f32.gmra.mxu0 %v1854_v25 }
 0x100   :  { %v1764_v57 = vpop.permute.xlu0 %1763 }
 0x101   :  { %v1619_v55 = vpop.permute.xlu1 %1618 }
 0x102   :  { %1686 = vst.msk [vmem:[#allocation4 + $0x28] sm:$0xff] %vm1680_vm2, %v1619_v55  ;;  %v1965_v56 = vld [vmem:[#allocation4 + $0x80] sm:$0xff]  ;;  %v1500_v53 = vpop.permute.xlu2 %1499 }
 0x103   :  { %2021 = vmatmul.f32.gmra.mxu1 %v1965_v56  ;;  %1831 = vst.msk [vmem:[#allocation4 + $0x28] sm:$0xff] %vm1825_vm3, %v1764_v57 }
 0x104   :  { %1554 = vst.msk [vmem:[#allocation4 + $0x90] sm:$0xff] %vm1535_vm1, %v1500_v53 }
 0x108   :  { %v1476_v60 = vpop.permute.xlu0 %1475 }
 0x109   :  { %v1643_v59 = vpop.permute.xlu1 %1642  ;;  %1542 = vst.msk [vmem:[#allocation4 + $0x30] sm:$0xff] %vm1535_vm1, %v1476_v60 }
 0x10a   :  { %1698 = vst.msk [vmem:[#allocation4 + $0x88] sm:$0xff] %vm1680_vm2, %v1643_v59  ;;  %v1855_v18 = vld [vmem:[#allocation4 + $0x28] sm:$0xff]  ;;  %v1790_v1 = vpop.permute.xlu2 %1789 }
 0x10b   :  { %1843 = vst.msk [vmem:[#allocation4 + $0x88] sm:$0xff] %vm1825_vm3, %v1788_v58  ;;  %1913 = vmatmul.f32.gmra.mxu0 %v1855_v18 }
 0x110   :  { %v1766_v33 = vpop.permute.xlu0 %1765 }
 0x111   :  { %v1621_v61 = vpop.permute.xlu1 %1620 }
 0x112   :  { %1687 = vst.msk [vmem:[#allocation4 + $0x30] sm:$0xff] %vm1680_vm2, %v1621_v61  ;;  %v1966_v62 = vld [vmem:[#allocation4 + $0x88] sm:$0xff] }
 0x113   :  { %2024 = vmatmul.f32.gmra.mxu1 %v1966_v62  ;;  %1832 = vst.msk [vmem:[#allocation4 + $0x30] sm:$0xff] %vm1825_vm3, %v1766_v33 }
 0x114   :  { %v1502_v4 = vpop.permute.xlu2 %1501 }
 0x115   :  { %1555 = vst.msk [vmem:[#allocation4 + $0x98] sm:$0xff] %vm1535_vm1, %v1502_v4 }
 0x118   :  { %v1478_v34 = vpop.permute.xlu0 %1477 }
 0x119   :  { %1543 = vst.msk [vmem:[#allocation4 + $0x38] sm:$0xff] %vm1535_vm1, %v1478_v34 }
 0x11a   :  { %v1856_v3 = vld [vmem:[#allocation4 + $0x30] sm:$0xff] }
 0x11b   :  { %1916 = vmatmul.f32.gmra.mxu0 %v1856_v3 }
 0x11d   :  { %v1645_v5 = vpop.permute.xlu1 %1644 }
 0x11e   :  { %1699 = vst.msk [vmem:[#allocation4 + $0x90] sm:$0xff] %vm1680_vm2, %v1645_v5 }
 0x11f   :  { %1844 = vst.msk [vmem:[#allocation4 + $0x90] sm:$0xff] %vm1825_vm3, %v1790_v1 }
 0x120   :  { %v1792_v6 = vpop.permute.xlu2 %1791 }
 0x126   :  { %v1967_v9 = vld [vmem:[#allocation4 + $0x90] sm:$0xff] }
 0x127   :  { %2027 = vmatmul.f32.gmra.mxu1 %v1967_v9 }
 0x128   :  { %v1504_v11 = vpop.permute.xlu2 %1503 }
 0x129   :  { %1556 = vst.msk [vmem:[#allocation4 + $0xa0] sm:$0xff] %vm1535_vm1, %v1504_v11 }
 0x12a   :  { %v1623_v12 = vpop.permute.xlu1 %1622 }
 0x12b   :  { %v1768_v14 = vpop.permute.xlu0 %1767  ;;  %1688 = vst.msk [vmem:[#allocation4 + $0x38] sm:$0xff] %vm1680_vm2, %v1623_v12 }
 0x12c   :  { %1833 = vst.msk [vmem:[#allocation4 + $0x38] sm:$0xff] %vm1825_vm3, %v1768_v14 }
 0x130   :  { %v1899_v63 = vpop.f32.mrf.mxu0 }
 0x131   :  { %v1900_v24 = vadd.f32 %v4619_v19, %v1899_v63  ;;  %v2010_v27 = vpop.f32.mrf.mxu1 }
 0x132   :  { %v2011_v8 = vadd.f32 %v4624_v46, %v2010_v27 }
 0x133   :  { %v1480_v15 = vpop.permute.xlu0 %1479  ;;  %v1857_v17 = vld [vmem:[#allocation4 + $0x38] sm:$0xff]  ;;  %v1794_v23 = vpop.permute.xlu2 %1793  ;;  %v1935_v28 = vmax.f32 %v1900_v24, 0.0 }
 0x134   :  { %1544 = vst.msk [vmem:[#allocation4 + $0x40] sm:$0xff] %vm1535_vm1, %v1480_v15  ;;  %1919 = vmatmul.f32.gmra.mxu0 %v1857_v17  ;;  %v2046_v30 = vmax.f32 %v2011_v8, 0.0 }
 0x135   :  { %1948 = vst.msk [vmem:[#allocation5] sm:$0xff] %vm1947_vm4, %v1935_v28 }
 0x136   :  { %2059 = vst.msk [vmem:[#allocation5 + $0x60] sm:$0xff] %vm1947_vm4, %v2046_v30 }
 0x137   :  { %v1647_v29 = vpop.permute.xlu1 %1646 }
 0x138   :  { %1700 = vst.msk [vmem:[#allocation4 + $0x98] sm:$0xff] %vm1680_vm2, %v1647_v29 }
 0x139   :  { %1845 = vst.msk [vmem:[#allocation4 + $0x98] sm:$0xff] %vm1825_vm3, %v1792_v6 }
 0x13b   :  { %v1506_v32 = vpop.permute.xlu2 %1505 }
 0x13c   :  { %1557 = vst.msk [vmem:[#allocation4 + $0xa8] sm:$0xff] %vm1535_vm1, %v1506_v32  ;;  %v2071_v42 = vld [vmem:[#allocation5] ss:$2 sm:$0xf] }
 0x13d   :  { %v2073_v56 = vld [vmem:[#allocation5 + $0x60] ss:$2 sm:$0xf]  ;;  %v2075_v57 = vld [vmem:[#allocation5 + $0x1] ss:$2 sm:$0xf] }
 0x13e   :  { %v2077_v59 = vld [vmem:[#allocation5 + $0x61] ss:$2 sm:$0xf]  ;;  %v2086_v33 = vmax.f32 %v2071_v42, %v2075_v57 }
 0x13f   :  { %v2087_v1 = vmax.f32 %v2073_v56, %v2077_v59 }
 0x140   :  { %v1968_v36 = vld [vmem:[#allocation4 + $0x98] sm:$0xff]  ;;  %v1625_v37 = vpop.permute.xlu1 %1624  ;;  %v1902_v40 = vpop.f32.mrf.mxu0 }
 0x141   :  { %2030 = vmatmul.f32.gmra.mxu1 %v1968_v36  ;;  %v1770_v38 = vpop.permute.xlu0 %1769  ;;  %1689 = vst.msk [vmem:[#allocation4 + $0x40] sm:$0xff] %vm1680_vm2, %v1625_v37  ;;  %v1903_v41 = vadd.f32 %v4619_v19, %v1902_v40 }
 0x142   :  { %1834 = vst.msk [vmem:[#allocation4 + $0x40] sm:$0xff] %vm1825_vm3, %v1770_v38 }
 0x143   :  { %v1936_v45 = vmax.f32 %v1903_v41, 0.0  ;;  %v1796_v25 = vpop.permute.xlu2 %1795 }
 0x145   :  { %v2013_v44 = vpop.f32.mrf.mxu1  ;;  %1949 = vst.msk [vmem:[#allocation5 + $0x8] sm:$0xff] %vm1947_vm4, %v1936_v45 }
 0x146   :  { %v2014_v31 = vadd.f32 %v4624_v46, %v2013_v44 }
 0x148   :  { %v2047_v47 = vmax.f32 %v2014_v31, 0.0 }
 0x149   :  { %v1482_v49 = vpop.permute.xlu0 %1481  ;;  %v1858_v48 = vld [vmem:[#allocation4 + $0x40] sm:$0xff] }
 0x14a   :  { %1545 = vst.msk [vmem:[#allocation4 + $0x48] sm:$0xff] %vm1535_vm1, %v1482_v49  ;;  %1922 = vmatmul.f32.gmra.mxu0 %v1858_v48  ;;  %v1649_v39 = vpop.permute.xlu1 %1648 }
 0x14b   :  { %2060 = vst.msk [vmem:[#allocation5 + $0x68] sm:$0xff] %vm1947_vm4, %v2047_v47 }
 0x14c   :  { %1701 = vst.msk [vmem:[#allocation4 + $0xa0] sm:$0xff] %vm1680_vm2, %v1649_v39 }
 0x14d   :  { %1846 = vst.msk [vmem:[#allocation4 + $0xa0] sm:$0xff] %vm1825_vm3, %v1794_v23 }
 0x150   :  { %v1905_v51 = vpop.f32.mrf.mxu0 }
 0x151   :  { %v1772_v26 = vpop.permute.xlu0 %1771  ;;  %v1906_v10 = vadd.f32 %v4619_v19, %v1905_v51 }
 0x152   :  { %v1627_v21 = vpop.permute.xlu1 %1626 }
 0x153   :  { %1690 = vst.msk [vmem:[#allocation4 + $0x48] sm:$0xff] %vm1680_vm2, %v1627_v21  ;;  %v1937_v54 = vmax.f32 %v1906_v10, 0.0 }
 0x154   :  { %v1969_v52 = vld [vmem:[#allocation4 + $0xa0] sm:$0xff]  ;;  %1835 = vst.msk [vmem:[#allocation4 + $0x48] sm:$0xff] %vm1825_vm3, %v1772_v26 }
 0x155   :  { %2033 = vmatmul.f32.gmra.mxu1 %v1969_v52  ;;  %1950 = vst.msk [vmem:[#allocation5 + $0x10] sm:$0xff] %vm1947_vm4, %v1937_v54 }
 0x15a   :  { %v1651_v55 = vpop.permute.xlu1 %1650 }
 0x15b   :  { %1702 = vst.msk [vmem:[#allocation4 + $0xa8] sm:$0xff] %vm1680_vm2, %v1651_v55  ;;  %v1859_v58 = vld [vmem:[#allocation4 + $0x48] sm:$0xff] }
 0x15c   :  { %1847 = vst.msk [vmem:[#allocation4 + $0xa8] sm:$0xff] %vm1825_vm3, %v1796_v25  ;;  %1925 = vmatmul.f32.gmra.mxu0 %v1859_v58  ;;  %v2079_v60 = vld [vmem:[#allocation5 + $0xa] ss:$2 sm:$0xf] }
 0x15d   :  { %v2083_v18 = vld [vmem:[#allocation5 + $0xb] ss:$2 sm:$0xf] }
 0x15e   :  { %v2016_v43 = vpop.f32.mrf.mxu1  ;;  %v2088_v20 = vmax.f32 %v2079_v60, %v2083_v18 }
 0x15f   :  { %v2017_v50 = vadd.f32 %v4624_v46, %v2016_v43 }
 0x160   :  { %v2090_v3 = vmax.f32 %v2086_v33, %v2088_v20 }
 0x161   :  { %v2048_v13 = vmax.f32 %v2017_v50, 0.0 }
 0x162   :  { %v2110_v6 = vrot.slane %v2090_v3, 1  ;;  %2122 = vst.sshfl [vmem:[#allocation1] sm:$0xff pattern:$0x73625140] %v2090_v3 }
 0x163   :  { %2061 = vst.msk [vmem:[#allocation5 + $0x70] sm:$0xff] %vm1947_vm4, %v2048_v13  ;;  %v1970_v7 = vld [vmem:[#allocation4 + $0xa8] sm:$0xff] }
 0x164   :  { %2036 = vmatmul.f32.gmra.mxu1 %v1970_v7 }
 0x166   :  { %v1908_v53 = vpop.f32.mrf.mxu0 }
 0x167   :  { %v1909_v0 = vadd.f32 %v4619_v19, %v1908_v53 }
 0x169   :  { %v1938_v4 = vmax.f32 %v1909_v0, 0.0  ;;  %v2124_v8 = vld [vmem:[#allocation1 + $0x1] ss:$4 sm:$0xff] }
 0x16a   :  { %v2081_v61 = vld [vmem:[#allocation5 + $0x6a] ss:$2 sm:$0xf]  ;;  %v2085_v62 = vld [vmem:[#allocation5 + $0x6b] ss:$2 sm:$0xf] }
 0x16b   :  { %v2089_v34 = vmax.f32 %v2081_v61, %v2085_v62  ;;  %1951 = vst.msk [vmem:[#allocation5 + $0x18] sm:$0xff] %vm1947_vm4, %v1938_v4 }
 0x16c   :  { %2137 = vst.sshfl [vmem:[#allocation1] sm:$0xff pattern:$0x73625140] %v2090_v3 }
 0x16d   :  { %v2091_v5 = vmax.f32 %v2087_v1, %v2089_v34  ;;  %v2880_v34 = vmov 1  }
 0x16e   :  { %2822 = vset.pattern.permute.xlu1 %v2880_v34 }
 0x16f   :  { %v2098_v35 = vrot.slane %v2091_v5, 7  ;;  %v2113_v9 = vsel %vm2099_vm5, %v2091_v5, %v2110_v6  ;;  %2125 = vst.sshfl [vmem:[#allocation1 + $0x20] sm:$0xff pattern:$0x73625140] %v2091_v5  ;;  %v2382_v6 = vld [vmem:[%s5264_s1] sm:$0x3] }
 0x170   :  { %v2114_v11 = vsel %vm2101_vm6, %v2091_v5, %v2113_v9  ;;  %v2019_v14 = vpop.f32.mrf.mxu1 }
 0x171   :  { %v2100_v12 = vsel %vm2099_vm5, %v2098_v35, %v2090_v3  ;;  %v2115_v15 = vsel %vm2103_vm7, %v2091_v5, %v2114_v11  ;;  %v2020_v63 = vadd.f32 %v4624_v46, %v2019_v14 }
 0x172   :  { %v2102_v17 = vsel %vm2101_vm6, %v2098_v35, %v2100_v12  ;;  %v2116_v22 = vsel %vm2105_vm8, %v2091_v5, %v2115_v15  ;;  %v2155_v26 = vld [vmem:[#allocation5 + $0x14] ss:$2 sm:$0xf]  ;;  %v2159_v10 = vld [vmem:[#allocation5 + $0x15] ss:$2 sm:$0xf] }
 0x173   :  { %v2104_v23 = vsel %vm2103_vm7, %v2098_v35, %v2102_v17  ;;  %2117 = vrot.lane.b32.xlu0 %v2116_v22, %s2879_s27  ;;  %v2049_v27 = vmax.f32 %v2020_v63, 0.0  ;;  %v2139_v40 = vld [vmem:[#allocation1 + $0x1] ss:$4 sm:$0xff]  ;;  %v2170_v52 = vmax.f32 %v2155_v26, %v2159_v10 }
 0x174   :  { %v2106_v24 = vsel %vm2105_vm8, %v2098_v35, %v2104_v23  ;;  %v2143_v44 = vrot.slane %v2139_v40, 1 }
 0x175   :  { %2109 = vst.msk [vmem:[#allocation6] sm:$0x3] %vm2108_vm9, %v2106_v24 }
 0x176   :  { %2062 = vst.msk [vmem:[#allocation5 + $0x78] sm:$0xff] %vm1947_vm4, %v2049_v27  ;;  %v2127_v16 = vld [vmem:[#allocation1 + $0x21] ss:$4 sm:$0xff] }
 0x177   :  { %2140 = vst.sshfl [vmem:[#allocation1 + $0x20] sm:$0xff pattern:$0x73625140] %v2091_v5  ;;  %v2130_v28 = vrot.slane %v2127_v16, 7  ;;  %v2881_v5 = vmov 0  }
 0x178   :  { %v1911_v29 = vpop.f32.mrf.mxu0  ;;  %2821 = vset.pattern.permute.xlu0 %v2881_v5 }
 0x179   :  { %v2131_v30 = vsel %vm2099_vm5, %v2130_v28, %v2124_v8  ;;  %v1912_v32 = vadd.f32 %v4619_v19, %v1911_v29 }
 0x17a   :  { %v2132_v36 = vsel %vm2101_vm6, %v2130_v28, %v2131_v30 }
 0x17b   :  { %v2133_v37 = vsel %vm2103_vm7, %v2130_v28, %v2132_v36  ;;  %v1939_v38 = vmax.f32 %v1912_v32, 0.0 }
 0x17c   :  { %v2134_v41 = vsel %vm2105_vm8, %v2130_v28, %v2133_v37 }
 0x17d   :  { %2136 = vst.msk [vmem:[#allocation6 + $0x2] sm:$0x3] %vm2108_vm9, %v2134_v41  ;;  %v2157_v42 = vld [vmem:[#allocation5 + $0x74] ss:$2 sm:$0xf] }
 0x17e   :  { %1952 = vst.msk [vmem:[#allocation5 + $0x20] sm:$0xff] %vm1947_vm4, %v1939_v38  ;;  %v2142_v31 = vld [vmem:[#allocation1 + $0x21] ss:$4 sm:$0xff] }
 0x17f   :  { %v2146_v45 = vsel %vm2099_vm5, %v2142_v31, %v2143_v44  ;;  %v2161_v55 = vld [vmem:[#allocation5 + $0x75] ss:$2 sm:$0xf] }
 0x180   :  { %v2022_v47 = vpop.f32.mrf.mxu1  ;;  %v2147_v49 = vsel %vm2101_vm6, %v2142_v31, %v2146_v45  ;;  %v2171_v59 = vmax.f32 %v2157_v42, %v2161_v55  ;;  %v1570_v38 = vld [vmem:[#allocation3 + $0x5a] sm:$0xff] }
 0x181   :  { %v2023_v48 = vadd.f32 %v4624_v46, %v2022_v47  ;;  %v2148_v39 = vsel %vm2103_vm7, %v2142_v31, %v2147_v49  ;;  %v1437_v55 = vld [vmem:[#allocation3 + $0xc1] sm:$0xff] }
 0x182   :  { %v2149_v2 = vsel %vm2105_vm8, %v2142_v31, %v2148_v39  ;;  %v1715_v31 = vld [vmem:[#allocation3 + $0x5b] sm:$0xff] }
 0x183   :  { %v2050_v51 = vmax.f32 %v2023_v48, 0.0  ;;  %2150 = vrot.lane.b32.xlu1 %v2149_v2, %s2879_s27  ;;  %v1582_v48 = vld [vmem:[#allocation3 + $0xca] sm:$0xff] }
 0x185   :  { %2063 = vst.msk [vmem:[#allocation5 + $0x80] sm:$0xff] %vm1947_vm4, %v2050_v51  ;;  %v2163_v21 = vld [vmem:[#allocation5 + $0x1e] ss:$2 sm:$0xf] }
 0x186   :  { %v2167_v43 = vld [vmem:[#allocation5 + $0x1f] ss:$2 sm:$0xf] }
 0x187   :  { %v2172_v54 = vmax.f32 %v2163_v21, %v2167_v43 }
 0x188   :  { %v1914_v50 = vpop.f32.mrf.mxu0 }
 0x189   :  { %v2174_v13 = vmax.f32 %v2170_v52, %v2172_v54  ;;  %v1915_v25 = vadd.f32 %v4619_v19, %v1914_v50 }
 0x18b   :  { %2198 = vst.sshfl [vmem:[#allocation1] sm:$0xff pattern:$0x73625140] %v2174_v13  ;;  %v1940_v56 = vmax.f32 %v1915_v25, 0.0  ;;  %v2187_v18 = vrot.slane %v2174_v13, 1  ;;  %2393 = vperm.xlu1 %2822, %v2382_v6  }
 0x18c   :  { %v2165_v57 = vld [vmem:[#allocation5 + $0x7e] ss:$2 sm:$0xf]  ;;  %v2169_v58 = vld [vmem:[#allocation5 + $0x7f] ss:$2 sm:$0xf] }
 0x18d   :  { %1953 = vst.msk [vmem:[#allocation5 + $0x28] sm:$0xff] %vm1947_vm4, %v1940_v56  ;;  %v2173_v60 = vmax.f32 %v2165_v57, %v2169_v58 }
 0x18f   :  { %v2175_v61 = vmax.f32 %v2171_v59, %v2173_v60 }
 0x190   :  { %v2025_v53 = vpop.f32.mrf.mxu1 }
 0x191   :  { %v2026_v62 = vadd.f32 %v4624_v46, %v2025_v53  ;;  %v2190_v33 = vsel %vm2099_vm5, %v2175_v61, %v2187_v18  ;;  %2201 = vst.sshfl [vmem:[#allocation1 + $0x20] sm:$0xff pattern:$0x73625140] %v2175_v61  ;;  %v2180_v3 = vrot.slane %v2175_v61, 7 }
 0x192   :  { %v2200_v20 = vld [vmem:[#allocation1 + $0x1] ss:$4 sm:$0xff]  ;;  %v2191_v1 = vsel %vm2101_vm6, %v2175_v61, %v2190_v33 }
 0x193   :  { %v2051_v0 = vmax.f32 %v2026_v62, 0.0  ;;  %2213 = vst.sshfl [vmem:[#allocation1] sm:$0xff pattern:$0x73625140] %v2174_v13  ;;  %v2192_v4 = vsel %vm2103_vm7, %v2175_v61, %v2191_v1  ;;  %v2181_v35 = vsel %vm2099_vm5, %v2180_v3, %v2174_v13  ;;  %1507 = vrot.lane.b32.xlu1 %v1437_v55, %s2877_s13  ;;  %v1727_v33 = vld [vmem:[#allocation3 + $0xcb] sm:$0xff]  ;;  %v2436_v55 = vld [vmem:[%s5271_s8 + $0xd8] sm:$0xff] }
 0x194   :  { %v2193_v7 = vsel %vm2105_vm8, %v2175_v61, %v2192_v4  ;;  %v2182_v9 = vsel %vm2101_vm6, %v2180_v3, %v2181_v35  ;;  %v2231_v39 = vld [vmem:[#allocation5 + $0x28] ss:$2 sm:$0xf]  ;;  %v2235_v2 = vld [vmem:[#allocation5 + $0x29] ss:$2 sm:$0xf] }
 0x195   :  { %2064 = vst.msk [vmem:[#allocation5 + $0x88] sm:$0xff] %vm1947_vm4, %v2051_v0  ;;  %2194 = vrot.lane.b32.xlu2 %v2193_v7, %s2879_s27  ;;  %v2183_v11 = vsel %vm2103_vm7, %v2180_v3, %v2182_v9  ;;  %v2246_v21 = vmax.f32 %v2231_v39, %v2235_v2 }
 0x196   :  { %v2184_v12 = vsel %vm2105_vm8, %v2180_v3, %v2183_v11 }
 0x197   :  { %2186 = vst.msk [vmem:[#allocation6 + $0x4] sm:$0x3] %vm2108_vm9, %v2184_v12 }
 0x198   :  { %v1917_v14 = vpop.f32.mrf.mxu0  ;;  %v2203_v15 = vld [vmem:[#allocation1 + $0x21] ss:$4 sm:$0xff] }
 0x199   :  { %v1918_v17 = vadd.f32 %v4619_v19, %v1917_v14  ;;  %2216 = vst.sshfl [vmem:[#allocation1 + $0x20] sm:$0xff pattern:$0x73625140] %v2175_v61  ;;  %v2206_v63 = vrot.slane %v2203_v15, 7 }
 0x19a   :  { %v2215_v22 = vld [vmem:[#allocation1 + $0x1] ss:$4 sm:$0xff] }
 0x19b   :  { %v1941_v23 = vmax.f32 %v1918_v17, 0.0  ;;  %v2207_v24 = vsel %vm2099_vm5, %v2206_v63, %v2200_v20  ;;  %v2219_v8 = vrot.slane %v2215_v22, 1  ;;  %1797 = vrot.lane.b32.xlu1 %v1727_v33, %s2878_s26 }
 0x19c   :  { %v2208_v27 = vsel %vm2101_vm6, %v2206_v63, %v2207_v24  ;;  %v2233_v13 = vld [vmem:[#allocation5 + $0x88] ss:$2 sm:$0xf]  ;;  %v2237_v42 = vld [vmem:[#allocation5 + $0x89] ss:$2 sm:$0xf] }
 0x19d   :  { %1954 = vst.msk [vmem:[#allocation5 + $0x30] sm:$0xff] %vm1947_vm4, %v1941_v23  ;;  %v2209_v16 = vsel %vm2103_vm7, %v2206_v63, %v2208_v27  ;;  %1628 = vrot.lane.b32.xlu2 %v1570_v38, %s2879_s27  ;;  %v2247_v18 = vmax.f32 %v2233_v13, %v2237_v42 }
 0x19e   :  { %v2210_v28 = vsel %vm2105_vm8, %v2206_v63, %v2209_v16 }
 0x19f   :  { %2212 = vst.msk [vmem:[#allocation6 + $0x6] sm:$0x3] %vm2108_vm9, %v2210_v28 }
 0x1a0   :  { %v2218_v29 = vld [vmem:[#allocation1 + $0x21] ss:$4 sm:$0xff] }
 0x1a1   :  { %v2222_v30 = vsel %vm2099_vm5, %v2218_v29, %v2219_v8 }
 0x1a2   :  { %v2223_v32 = vsel %vm2101_vm6, %v2218_v29, %v2222_v30 }
 0x1a3   :  { %v2224_v36 = vsel %vm2103_vm7, %v2218_v29, %v2223_v32 }
 0x1a4   :  { %v2225_v37 = vsel %vm2105_vm8, %v2218_v29, %v2224_v36  ;;  %v2028_v40 = vpop.f32.mrf.mxu1  ;;  %v1377_v36 = vld [vmem:[#allocation3 + $0x50] sm:$0xff] }
 0x1a5   :  { %2226 = vrot.lane.b32.xlu0 %v2225_v37, %s2879_s27  ;;  %v2029_v41 = vadd.f32 %v4624_v46, %v2028_v40  ;;  %1773 = vrot.lane.b32.xlu2 %v1715_v31, %s2878_s26  ;;  %v2440_v37 = vld [vmem:[%s5271_s8 + $0xf8] sm:$0xff]  ;;  %1401 = vst.msk [vmem:[#allocation4 + $0x50] sm:$0xff] %vm1068_vm0, %v1377_v36  ;;  %v1484_v40 = vpop.permute.xlu1 %1483  ;;  %v1438_v36 = vld [vmem:[#allocation3 + $0xc9] sm:$0xff] }
 0x1a6   :  { %2602 = vmatpush.msra.mxu3 %v2440_v37  ;;  %1546 = vst.msk [vmem:[#allocation4 + $0x50] sm:$0xff] %vm1535_vm1, %v1484_v40  ;;  %v2427_v37 = vld [vmem:[%s5271_s8 + $0x90] sm:$0xff]  ;;  %v2410_v40 = vld [vmem:[%s5271_s8 + $0x8] sm:$0xff] }
 0x1a7   :  { %v2052_v44 = vmax.f32 %v2029_v41, 0.0  ;;  %v2423_v41 = vld [vmem:[%s5271_s8 + $0x70] sm:$0xff] }
 0x1a9   :  { %2065 = vst.msk [vmem:[#allocation5 + $0x90] sm:$0xff] %vm1947_vm4, %v2052_v44  ;;  %v2439_v44 = vld [vmem:[%s5271_s8 + $0xf0] sm:$0xff] }
 0x1aa   :  { %2603 = vmatpush.msra.mxu3 %v2439_v44  ;;  %v2426_v44 = vld [vmem:[%s5271_s8 + $0x88] sm:$0xff] }
 0x1ad   :  { %2386 = vperm.xlu0 %2821, %v2382_v6  }
 0x1b1   :  { %v1920_v45 = vpop.f32.mrf.mxu0 }
 0x1b2   :  { %v1921_v47 = vadd.f32 %v4619_v19, %v1920_v45 }
 0x1b4   :  { %v1942_v49 = vmax.f32 %v1921_v47, 0.0 }
 0x1b5   :  { %2823 = vset.pattern.permute.xlu0 %v2880_v34 }
 0x1b6   :  { %1955 = vst.msk [vmem:[#allocation5 + $0x38] sm:$0xff] %vm1947_vm4, %v1942_v49  ;;  %1652 = vrot.lane.b32.xlu0 %v1582_v48, %s2879_s27 }
 0x1bd   :  { %v2239_v51 = vld [vmem:[#allocation5 + $0x32] ss:$2 sm:$0xf]  ;;  %v2243_v26 = vld [vmem:[#allocation5 + $0x33] ss:$2 sm:$0xf] }
 0x1be   :  { %v2031_v10 = vpop.f32.mrf.mxu1  ;;  %v2248_v43 = vmax.f32 %v2239_v51, %v2243_v26 }
 0x1bf   :  { %v2032_v52 = vadd.f32 %v4624_v46, %v2031_v10 }
 0x1c0   :  { %v2250_v54 = vmax.f32 %v2246_v21, %v2248_v43  ;;  %v1571_v43 = vld [vmem:[#allocation3 + $0x62] sm:$0xff] }
 0x1c1   :  { %v2053_v50 = vmax.f32 %v2032_v52, 0.0  ;;  %v2422_v52 = vld [vmem:[%s5271_s8 + $0x68] sm:$0xff] }
 0x1c2   :  { %2274 = vst.sshfl [vmem:[#allocation1] sm:$0xff pattern:$0x73625140] %v2250_v54  ;;  %v2263_v61 = vrot.slane %v2250_v54, 1 }
 0x1c3   :  { %2066 = vst.msk [vmem:[#allocation5 + $0x98] sm:$0xff] %vm1947_vm4, %v2053_v50  ;;  %v2437_v50 = vld [vmem:[%s5271_s8 + $0xe0] sm:$0xff] }
 0x1c7   :  { %v1923_v25 = vpop.f32.mrf.mxu0 }
 0x1c8   :  { %v1924_v56 = vadd.f32 %v4619_v19, %v1923_v25  ;;  %v2420_v25 = vld [vmem:[%s5271_s8 + $0x58] sm:$0xff] }
 0x1c9   :  { %v2276_v57 = vld [vmem:[#allocation1 + $0x1] ss:$4 sm:$0xff] }
 0x1ca   :  { %v2241_v58 = vld [vmem:[#allocation5 + $0x92] ss:$2 sm:$0xf]  ;;  %v2245_v59 = vld [vmem:[#allocation5 + $0x93] ss:$2 sm:$0xf] }
 0x1cb   :  { %v1943_v60 = vmax.f32 %v1924_v56, 0.0  ;;  %v2249_v53 = vmax.f32 %v2241_v58, %v2245_v59  ;;  %2289 = vst.sshfl [vmem:[#allocation1] sm:$0xff pattern:$0x73625140] %v2250_v54  ;;  %v2435_v59 = vld [vmem:[%s5271_s8 + $0xd0] sm:$0xff] }
 0x1cd   :  { %1956 = vst.msk [vmem:[#allocation5 + $0x40] sm:$0xff] %vm1947_vm4, %v1943_v60  ;;  %v2251_v62 = vmax.f32 %v2247_v18, %v2249_v53  ;;  %v1583_v60 = vld [vmem:[#allocation3 + $0xd2] sm:$0xff] }
 0x1cf   :  { %v2266_v20 = vsel %vm2099_vm5, %v2251_v62, %v2263_v61  ;;  %2277 = vst.sshfl [vmem:[#allocation1 + $0x20] sm:$0xff pattern:$0x73625140] %v2251_v62  ;;  %v2256_v0 = vrot.slane %v2251_v62, 7 }
 0x1d0   :  { %v2267_v1 = vsel %vm2101_vm6, %v2251_v62, %v2266_v20  ;;  %v2418_v20 = vld [vmem:[%s5271_s8 + $0x48] sm:$0xff] }
 0x1d1   :  { %v2268_v34 = vsel %vm2103_vm7, %v2251_v62, %v2267_v1  ;;  %v2257_v3 = vsel %vm2099_vm5, %v2256_v0, %v2250_v54  ;;  %v2421_v54 = vld [vmem:[%s5271_s8 + $0x60] sm:$0xff] }
 0x1d2   :  { %v2269_v4 = vsel %vm2105_vm8, %v2251_v62, %v2268_v34  ;;  %v2258_v5 = vsel %vm2101_vm6, %v2256_v0, %v2257_v3  ;;  %v2034_v6 = vpop.f32.mrf.mxu1  ;;  %v2291_v15 = vld [vmem:[#allocation1 + $0x1] ss:$4 sm:$0xff] }
 0x1d3   :  { %2270 = vrot.lane.b32.xlu2 %v2269_v4, %s2879_s27  ;;  %v2259_v7 = vsel %vm2103_vm7, %v2256_v0, %v2258_v5  ;;  %v2035_v35 = vadd.f32 %v4624_v46, %v2034_v6  ;;  %v2295_v23 = vrot.slane %v2291_v15, 1  ;;  %v2417_v1 = vld [vmem:[%s5271_s8 + $0x40] sm:$0xff]  ;;  %v2416_v4 = vld [vmem:[%s5271_s8 + $0x38] sm:$0xff] }
 0x1d4   :  { %v2260_v9 = vsel %vm2105_vm8, %v2256_v0, %v2259_v7  ;;  %v2307_v49 = vld [vmem:[#allocation5 + $0x3c] ss:$2 sm:$0xf]  ;;  %v2311_v48 = vld [vmem:[#allocation5 + $0x3d] ss:$2 sm:$0xf] }
 0x1d5   :  { %2262 = vst.msk [vmem:[#allocation6 + $0x8] sm:$0x3] %vm2108_vm9, %v2260_v9  ;;  %v2054_v11 = vmax.f32 %v2035_v35, 0.0  ;;  %v2322_v10 = vmax.f32 %v2307_v49, %v2311_v48  ;;  %v2434_v0 = vld [vmem:[%s5271_s8 + $0xc8] sm:$0xff]  ;;  %v2433_v34 = vld [vmem:[%s5271_s8 + $0xc0] sm:$0xff]  ;;  %v2432_v6 = vld [vmem:[%s5271_s8 + $0xb8] sm:$0xff] }
 0x1d6   :  { %v2279_v12 = vld [vmem:[#allocation1 + $0x21] ss:$4 sm:$0xff] }
 0x1d7   :  { %2292 = vst.sshfl [vmem:[#allocation1 + $0x20] sm:$0xff pattern:$0x73625140] %v2251_v62  ;;  %v2282_v14 = vrot.slane %v2279_v12, 7  ;;  %v2415_v35 = vld [vmem:[%s5271_s8 + $0x30] sm:$0xff]  ;;  %v2409_v49 = vld [vmem:[%s5271_s8] sm:$0xff] }
 0x1d8   :  { %2067 = vst.msk [vmem:[#allocation5 + $0xa0] sm:$0xff] %vm1947_vm4, %v2054_v11  ;;  %v2431_v12 = vld [vmem:[%s5271_s8 + $0xb0] sm:$0xff]  ;;  %v2536_v48 = vld [vmem:[%s5271_s8 + $0x3f8] sm:$0xff] }
 0x1d9   :  { %v2283_v17 = vsel %vm2099_vm5, %v2282_v14, %v2276_v57  ;;  %v1926_v22 = vpop.f32.mrf.mxu0  ;;  %v2419_v57 = vld [vmem:[%s5271_s8 + $0x50] sm:$0xff]  ;;  %2722 = vmatpush.msrb.mxu1 %v2536_v48 }
 0x1da   :  { %v2284_v63 = vsel %vm2101_vm6, %v2282_v14, %v2283_v17  ;;  %v1927_v27 = vadd.f32 %v4619_v19, %v1926_v22  ;;  %v2424_v19 = vld [vmem:[%s5271_s8 + $0x78] sm:$0xff]  ;;  %v2414_v22 = vld [vmem:[%s5271_s8 + $0x28] sm:$0xff] }
 0x1db   :  { %v2285_v24 = vsel %vm2103_vm7, %v2282_v14, %v2284_v63  ;;  %2582 = vmatpush.msra.mxu2 %v2424_v19 }
 0x1dc   :  { %v2286_v16 = vsel %vm2105_vm8, %v2282_v14, %v2285_v24  ;;  %v1944_v28 = vmax.f32 %v1927_v27, 0.0  ;;  %v2413_v24 = vld [vmem:[%s5271_s8 + $0x20] sm:$0xff] }
 0x1dd   :  { %2288 = vst.msk [vmem:[#allocation6 + $0xa] sm:$0x3] %vm2108_vm9, %v2286_v16  ;;  %2583 = vmatpush.msra.mxu2 %v2423_v41 }
 0x1de   :  { %v2294_v29 = vld [vmem:[#allocation1 + $0x21] ss:$4 sm:$0xff]  ;;  %1957 = vst.msk [vmem:[#allocation5 + $0x48] sm:$0xff] %vm1947_vm4, %v1944_v28 }
 0x1df   :  { %v2298_v30 = vsel %vm2099_vm5, %v2294_v29, %v2295_v23  ;;  %2584 = vmatpush.msra.mxu2 %v2422_v52  ;;  %v2309_v42 = vld [vmem:[#allocation5 + $0x9c] ss:$2 sm:$0xf]  ;;  %v2313_v58 = vld [vmem:[#allocation5 + $0x9d] ss:$2 sm:$0xf] }
 0x1e0   :  { %v2299_v32 = vsel %vm2101_vm6, %v2294_v29, %v2298_v30  ;;  %v2323_v61 = vmax.f32 %v2309_v42, %v2313_v58  ;;  %v2430_v23 = vld [vmem:[%s5271_s8 + $0xa8] sm:$0xff]  ;;  %v2412_v28 = vld [vmem:[%s5271_s8 + $0x18] sm:$0xff] }
 0x1e1   :  { %v2300_v38 = vsel %vm2103_vm7, %v2294_v29, %v2299_v32  ;;  %v2037_v45 = vpop.f32.mrf.mxu1  ;;  %2585 = vmatpush.msra.mxu2 %v2421_v54  ;;  %v2428_v30 = vld [vmem:[%s5271_s8 + $0x98] sm:$0xff]  ;;  %v2411_v32 = vld [vmem:[%s5271_s8 + $0x10] sm:$0xff] }
 0x1e2   :  { %v2301_v31 = vsel %vm2105_vm8, %v2294_v29, %v2300_v38  ;;  %v2038_v47 = vadd.f32 %v4624_v46, %v2037_v45  ;;  %v2438_v46 = vld [vmem:[%s5271_s8 + $0xe8] sm:$0xff]  ;;  %v2455_v54 = vld [vmem:[%s5271_s8 + $0x170] sm:$0xff] }
 0x1e3   :  { %2302 = vrot.lane.b32.xlu0 %v2301_v31, %s2879_s27  ;;  %2604 = vmatpush.msra.mxu3 %v2438_v46  ;;  %v2520_v31 = vld [vmem:[%s5271_s8 + $0x378] sm:$0xff]  ;;  %v1728_v42 = vld [vmem:[#allocation3 + $0xd3] sm:$0xff] }
 0x1e4   :  { %v2055_v39 = vmax.f32 %v2038_v47, 0.0  ;;  %2586 = vmatpush.msra.mxu2 %v2420_v25  ;;  %2702 = vmatpush.msrb.mxu0 %v2520_v31  ;;  %v2444_v31 = vld [vmem:[%s5271_s8 + $0x118] sm:$0xff] }
 0x1e5   :  { %v2118_v8 = vpop.permute.xlu0 %2117  ;;  %v2315_v2 = vld [vmem:[#allocation5 + $0x46] ss:$2 sm:$0xf]  ;;  %v2319_v51 = vld [vmem:[#allocation5 + $0x47] ss:$2 sm:$0xf]  ;;  %2605 = vmatpush.msra.mxu3 %v2437_v50 }
 0x1e6   :  { %2121 = vst.msk [vmem:[#allocation6] sm:$0x3] %vm2120_vm10, %v2118_v8  ;;  %v2324_v21 = vmax.f32 %v2315_v2, %v2319_v51  ;;  %2587 = vmatpush.msra.mxu2 %v2419_v57  ;;  %v2429_v8 = vld [vmem:[%s5271_s8 + $0xa0] sm:$0xff]  ;;  %v2456_v51 = vld [vmem:[%s5271_s8 + $0x178] sm:$0xff]  ;;  %v2470_v57 = vld [vmem:[%s5271_s8 + $0x1e8] sm:$0xff] }
 0x1e7   :  { %2068 = vst.msk [vmem:[#allocation5 + $0xa8] sm:$0xff] %vm1947_vm4, %v2055_v39  ;;  %2606 = vmatpush.msra.mxu3 %v2436_v55  ;;  %v2425_v2 = vld [vmem:[%s5271_s8 + $0x80] sm:$0xff] }
 0x1e8   :  { %v2326_v13 = vmax.f32 %v2322_v10, %v2324_v21  ;;  %2588 = vmatpush.msra.mxu2 %v2418_v20  ;;  %v2472_v21 = vld [vmem:[%s5271_s8 + $0x1f8] sm:$0xff] }
 0x1e9   :  { %2607 = vmatpush.msra.mxu3 %v2435_v59  ;;  %v1426_v20 = vld [vmem:[#allocation3 + $0x59] sm:$0xff] }
 0x1ea   :  { %2350 = vst.sshfl [vmem:[#allocation1] sm:$0xff pattern:$0x73625140] %v2326_v13  ;;  %v2339_v33 = vrot.slane %v2326_v13, 1  ;;  %2589 = vmatpush.msra.mxu2 %v2417_v1  ;;  %v2466_v1 = vld [vmem:[%s5271_s8 + $0x1c8] sm:$0xff] }
 0x1eb   :  { %1630 = vrot.lane.b32.xlu0 %v1571_v43, %s2879_s27  ;;  %2608 = vmatpush.msra.mxu3 %v2434_v0  ;;  %v2535_v43 = vld [vmem:[%s5271_s8 + $0x3f0] sm:$0xff]  ;;  %v2450_v0 = vld [vmem:[%s5271_s8 + $0x148] sm:$0xff] }
 0x1ec   :  { %2590 = vmatpush.msra.mxu2 %v2416_v4  ;;  %2723 = vmatpush.msrb.mxu1 %v2535_v43  ;;  %v2449_v4 = vld [vmem:[%s5271_s8 + $0x140] sm:$0xff]  ;;  %v2512_v43 = vld [vmem:[%s5271_s8 + $0x338] sm:$0xff] }
 0x1ed   :  { %2609 = vmatpush.msra.mxu3 %v2433_v34 }
 0x1ee   :  { %v2317_v18 = vld [vmem:[#allocation5 + $0xa6] ss:$2 sm:$0xf]  ;;  %v2321_v53 = vld [vmem:[#allocation5 + $0xa7] ss:$2 sm:$0xf]  ;;  %2591 = vmatpush.msra.mxu2 %v2415_v35 }
 0x1ef   :  { %v2195_v26 = vpop.permute.xlu2 %2194  ;;  %v2325_v62 = vmax.f32 %v2317_v18, %v2321_v53  ;;  %2610 = vmatpush.msra.mxu3 %v2432_v6  ;;  %v2469_v18 = vld [vmem:[%s5271_s8 + $0x1e0] sm:$0xff]  ;;  %v2452_v53 = vld [vmem:[%s5271_s8 + $0x158] sm:$0xff]  ;;  %v2534_v6 = vld [vmem:[%s5271_s8 + $0x3e8] sm:$0xff] }
 0x1f0   :  { %2197 = vst.msk [vmem:[#allocation6 + $0x4] sm:$0x3] %vm2120_vm10, %v2195_v26  ;;  %2592 = vmatpush.msra.mxu2 %v2414_v22  ;;  %v2519_v26 = vld [vmem:[%s5271_s8 + $0x370] sm:$0xff]  ;;  %v2448_v35 = vld [vmem:[%s5271_s8 + $0x138] sm:$0xff]  ;;  %2724 = vmatpush.msrb.mxu1 %v2534_v6  ;;  %v2502_v6 = vld [vmem:[%s5271_s8 + $0x2e8] sm:$0xff] }
 0x1f1   :  { %v2327_v3 = vmax.f32 %v2323_v61, %v2325_v62  ;;  %v2352_v5 = vld [vmem:[#allocation1 + $0x1] ss:$4 sm:$0xff]  ;;  %2611 = vmatpush.msra.mxu3 %v2431_v12  ;;  %2703 = vmatpush.msrb.mxu0 %v2519_v26 }
 0x1f2   :  { %2365 = vst.sshfl [vmem:[#allocation1] sm:$0xff pattern:$0x73625140] %v2326_v13  ;;  %2593 = vmatpush.msra.mxu2 %v2413_v24  ;;  %v2468_v61 = vld [vmem:[%s5271_s8 + $0x1d8] sm:$0xff]  ;;  %v2451_v62 = vld [vmem:[%s5271_s8 + $0x150] sm:$0xff] }
 0x1f3   :  { %1654 = vrot.lane.b32.xlu0 %v1583_v60, %s2879_s27  ;;  %v2342_v7 = vsel %vm2099_vm5, %v2327_v3, %v2339_v33  ;;  %2353 = vst.sshfl [vmem:[#allocation1 + $0x20] sm:$0xff pattern:$0x73625140] %v2327_v3  ;;  %v2332_v9 = vrot.slane %v2327_v3, 7  ;;  %2612 = vmatpush.msra.mxu3 %v2430_v23  ;;  %v2453_v60 = vld [vmem:[%s5271_s8 + $0x160] sm:$0xff]  ;;  %v2467_v33 = vld [vmem:[%s5271_s8 + $0x1d0] sm:$0xff] }
 0x1f4   :  { %v2343_v11 = vsel %vm2101_vm6, %v2327_v3, %v2342_v7  ;;  %2594 = vmatpush.msra.mxu2 %v2412_v28  ;;  %v2831_v7 = vld [vmem:[%s5269_s6 + $0x1] ss:$0 sm:$0xff]  ;;  %v2516_v23 = vld [vmem:[%s5271_s8 + $0x358] sm:$0xff]  ;;  %v2833_v28 = vld [vmem:[%s5270_s7] ss:$0 sm:$0xff] }
 0x1f5   :  { %v2151_v56 = vpop.permute.xlu1 %2150  ;;  %v2344_v14 = vsel %vm2103_vm7, %v2327_v3, %v2343_v11  ;;  %v2333_v15 = vsel %vm2099_vm5, %v2332_v9, %v2326_v13  ;;  %2613 = vmatpush.msra.mxu3 %v2429_v8  ;;  %v2471_v13 = vld [vmem:[%s5271_s8 + $0x1f0] sm:$0xff]  ;;  %v2517_v11 = vld [vmem:[%s5271_s8 + $0x360] sm:$0xff]  ;;  %v2462_v8 = vld [vmem:[%s5271_s8 + $0x1a8] sm:$0xff] }
 0x1f6   :  { %2153 = vst.msk [vmem:[#allocation6 + $0x2] sm:$0x3] %vm2120_vm10, %v2151_v56  ;;  %v2345_v17 = vsel %vm2105_vm8, %v2327_v3, %v2344_v14  ;;  %v2334_v63 = vsel %vm2101_vm6, %v2332_v9, %v2333_v15  ;;  %2595 = vmatpush.msra.mxu2 %v2411_v32  ;;  %v2454_v56 = vld [vmem:[%s5271_s8 + $0x168] sm:$0xff]  ;;  %v2533_v14 = vld [vmem:[%s5271_s8 + $0x3e0] sm:$0xff]  ;;  %v2515_v32 = vld [vmem:[%s5271_s8 + $0x350] sm:$0xff] }
 0x1f7   :  { %2346 = vrot.lane.b32.xlu1 %v2345_v17, %s2879_s27  ;;  %v2335_v27 = vsel %vm2103_vm7, %v2332_v9, %v2334_v63  ;;  %2614 = vmatpush.msra.mxu3 %v2428_v30  ;;  %v1629_v41 = vpop.permute.xlu2 %1628  ;;  %v2832_v15 = vld [vmem:[%s5269_s6] ss:$0 sm:$0xff]  ;;  %v2447_v17 = vld [vmem:[%s5271_s8 + $0x130] sm:$0xff] }
 0x1f8   :  { %v2336_v16 = vsel %vm2105_vm8, %v2332_v9, %v2335_v27  ;;  %1691 = vst.msk [vmem:[#allocation4 + $0x50] sm:$0xff] %vm1680_vm2, %v1629_v41  ;;  %2596 = vmatpush.msra.mxu2 %v2410_v40  ;;  %v2464_v9 = vld [vmem:[%s5271_s8 + $0x1b8] sm:$0xff]  ;;  %v2463_v63 = vld [vmem:[%s5271_s8 + $0x1b0] sm:$0xff]  ;;  %2725 = vmatpush.msrb.mxu1 %v2533_v14  ;;  %v2446_v27 = vld [vmem:[%s5271_s8 + $0x128] sm:$0xff] }
 0x1f9   :  { %2338 = vst.msk [vmem:[#allocation6 + $0xc] sm:$0x3] %vm2108_vm9, %v2336_v16  ;;  %v2367_v19 = vld [vmem:[#allocation1 + $0x1] ss:$4 sm:$0xff]  ;;  %2615 = vmatpush.msra.mxu3 %v2427_v37 }
 0x1fa   :  { %v2355_v29 = vld [vmem:[#allocation1 + $0x21] ss:$4 sm:$0xff]  ;;  %v2371_v47 = vrot.slane %v2367_v19, 1  ;;  %2597 = vmatpush.msra.mxu2 %v2409_v49 }
 0x1fb   :  { %2368 = vst.sshfl [vmem:[#allocation1 + $0x20] sm:$0xff pattern:$0x73625140] %v2327_v3  ;;  %v2358_v38 = vrot.slane %v2355_v29, 7  ;;  %2616 = vmatpush.msra.mxu3 %v2426_v44  ;;  %v2518_v3 = vld [vmem:[%s5271_s8 + $0x368] sm:$0xff]  ;;  %v1716_v22 = vld [vmem:[#allocation3 + $0x63] sm:$0xff] }
 0x1fc   :  { %2622 = vmatpush.msrb.mxu2 %v2456_v51  ;;  %2704 = vmatpush.msrb.mxu0 %v2518_v3  ;;  %v2532_v16 = vld [vmem:[%s5271_s8 + $0x3d8] sm:$0xff]  ;;  %v2445_v19 = vld [vmem:[%s5271_s8 + $0x120] sm:$0xff]  ;;  %v2514_v40 = vld [vmem:[%s5271_s8 + $0x348] sm:$0xff] }
 0x1fd   :  { %v2359_v45 = vsel %vm2099_vm5, %v2358_v38, %v2352_v5  ;;  %2617 = vmatpush.msra.mxu3 %v2425_v2  ;;  %v2465_v5 = vld [vmem:[%s5271_s8 + $0x1c0] sm:$0xff]  ;;  %v2394_v12 = vpop.permute.xlu1 %2393  ;;  %2726 = vmatpush.msrb.mxu1 %v2532_v16  ;;  %v2530_v41 = vld [vmem:[%s5271_s8 + $0x3c8] sm:$0xff]  ;;  %v2459_v2 = vld [vmem:[%s5271_s8 + $0x190] sm:$0xff] }
 0x1fe   :  { %v2360_v39 = vsel %vm2101_vm6, %v2358_v38, %v2359_v45  ;;  %2623 = vmatpush.msrb.mxu2 %v2455_v54  ;;  %2705 = vmatpush.msrb.mxu0 %v2517_v11  ;;  %v2397_v24 = vmul.f32 %v2831_v7, %v2394_v12  ;;  %v2461_v37 = vld [vmem:[%s5271_s8 + $0x1a0] sm:$0xff]  ;;  %v2460_v45 = vld [vmem:[%s5271_s8 + $0x198] sm:$0xff]  ;;  %v2527_v7 = vld [vmem:[%s5271_s8 + $0x3b0] sm:$0xff] }
 0x1ff   :  { %1509 = vrot.lane.b32.xlu1 %v1438_v36, %s2877_s13  ;;  %v2361_v10 = vsel %vm2103_vm7, %v2358_v38, %v2360_v39  ;;  %2642 = vmatpush.msrb.mxu3 %v2472_v21  ;;  %v1774_v58 = vpop.permute.xlu2 %1773  ;;  %v2529_v49 = vld [vmem:[%s5271_s8 + $0x3c0] sm:$0xff]  ;;  %v2443_v39 = vld [vmem:[%s5271_s8 + $0x110] sm:$0xff]  ;;  %v1389_v51 = vld [vmem:[#allocation3 + $0xc0] sm:$0xff] }
 0x200   :  { %v2362_v52 = vsel %vm2105_vm8, %v2358_v38, %v2361_v10  ;;  %1836 = vst.msk [vmem:[#allocation4 + $0x50] sm:$0xff] %vm1825_vm3, %v1774_v58  ;;  %2624 = vmatpush.msrb.mxu2 %v2454_v56  ;;  %2706 = vmatpush.msrb.mxu0 %v2516_v23  ;;  %v2531_v38 = vld [vmem:[%s5271_s8 + $0x3d0] sm:$0xff]  ;;  %v2442_v10 = vld [vmem:[%s5271_s8 + $0x108] sm:$0xff]  ;;  %v2441_v54 = vld [vmem:[%s5271_s8 + $0x100] sm:$0xff] }
 0x201   :  { %2364 = vst.msk [vmem:[#allocation6 + $0xe] sm:$0x3] %vm2108_vm9, %v2362_v52  ;;  %2643 = vmatpush.msrb.mxu3 %v2471_v13  ;;  %2727 = vmatpush.msrb.mxu1 %v2531_v38  ;;  %v2458_v21 = vld [vmem:[%s5271_s8 + $0x188] sm:$0xff]  ;;  %v2488_v13 = vld [vmem:[%s5271_s8 + $0x278] sm:$0xff]  ;;  %v2485_v58 = vld [vmem:[%s5271_s8 + $0x260] sm:$0xff] }
 0x202   :  { %v2370_v46 = vld [vmem:[#allocation1 + $0x21] ss:$4 sm:$0xff]  ;;  %2625 = vmatpush.msrb.mxu2 %v2453_v60  ;;  %2707 = vmatpush.msrb.mxu0 %v2515_v32  ;;  %1413 = vst.msk [vmem:[#allocation4 + $0xb0] sm:$0xff] %vm1068_vm0, %v1389_v51 }
 0x203   :  { %v2374_v50 = vsel %vm2099_vm5, %v2370_v46, %v2371_v47  ;;  %2644 = vmatpush.msrb.mxu3 %v2470_v57  ;;  %v2513_v47 = vld [vmem:[%s5271_s8 + $0x340] sm:$0xff]  ;;  %2728 = vmatpush.msrb.mxu1 %v2530_v41  ;;  %v2483_v60 = vld [vmem:[%s5271_s8 + $0x250] sm:$0xff]  ;;  %v2474_v14 = vld [vmem:[%s5271_s8 + $0x208] sm:$0xff] }
 0x204   :  { %v2375_v25 = vsel %vm2101_vm6, %v2370_v46, %v2374_v50  ;;  %2626 = vmatpush.msrb.mxu2 %v2452_v53  ;;  %2708 = vmatpush.msrb.mxu0 %v2514_v40  ;;  %v2457_v50 = vld [vmem:[%s5271_s8 + $0x180] sm:$0xff]  ;;  %v2482_v53 = vld [vmem:[%s5271_s8 + $0x248] sm:$0xff]  ;;  %v2475_v12 = vld [vmem:[%s5271_s8 + $0x210] sm:$0xff] }
 0x205   :  { %v2376_v55 = vsel %vm2103_vm7, %v2370_v46, %v2375_v25  ;;  %2645 = vmatpush.msrb.mxu3 %v2469_v18  ;;  %2729 = vmatpush.msrb.mxu1 %v2529_v49  ;;  %v2487_v25 = vld [vmem:[%s5271_s8 + $0x270] sm:$0xff]  ;;  %v2477_v3 = vld [vmem:[%s5271_s8 + $0x220] sm:$0xff]  ;;  %v2552_v23 = vld [vmem:[%s5271_s8 + $0x478] sm:$0xff] }
 0x206   :  { %v2377_v59 = vsel %vm2105_vm8, %v2370_v46, %v2376_v55  ;;  %2627 = vmatpush.msrb.mxu2 %v2451_v62  ;;  %2709 = vmatpush.msrb.mxu0 %v2513_v47  ;;  %v2486_v55 = vld [vmem:[%s5271_s8 + $0x268] sm:$0xff]  ;;  %v2480_v62 = vld [vmem:[%s5271_s8 + $0x238] sm:$0xff]  ;;  %v2497_v32 = vld [vmem:[%s5271_s8 + $0x2c0] sm:$0xff] }
 0x207   :  { %2378 = vrot.lane.b32.xlu2 %v2377_v59, %s2879_s27  ;;  %1799 = vrot.lane.b32.xlu1 %v1728_v42, %s2878_s26  ;;  %v2484_v59 = vld [vmem:[%s5271_s8 + $0x258] sm:$0xff]  ;;  %v2526_v16 = vld [vmem:[%s5271_s8 + $0x3a8] sm:$0xff] }
 0x208   :  { %2646 = vmatpush.msrb.mxu3 %v2468_v61  ;;  %2628 = vmatpush.msrb.mxu2 %v2450_v0  ;;  %v2481_v61 = vld [vmem:[%s5271_s8 + $0x240] sm:$0xff]  ;;  %v2528_v0 = vld [vmem:[%s5271_s8 + $0x3b8] sm:$0xff]  ;;  %v2495_v40 = vld [vmem:[%s5271_s8 + $0x2b0] sm:$0xff] }
 0x209   :  { %2710 = vmatpush.msrb.mxu0 %v2512_v43  ;;  %2730 = vmatpush.msrb.mxu1 %v2528_v0  ;;  %v2548_v38 = vld [vmem:[%s5271_s8 + $0x458] sm:$0xff]  ;;  %v2547_v41 = vld [vmem:[%s5271_s8 + $0x450] sm:$0xff]  ;;  %v2493_v47 = vld [vmem:[%s5271_s8 + $0x2a0] sm:$0xff] }
 0x20a   :  { %2647 = vmatpush.msrb.mxu3 %v2467_v33  ;;  %2629 = vmatpush.msrb.mxu2 %v2449_v4  ;;  %v2479_v33 = vld [vmem:[%s5271_s8 + $0x230] sm:$0xff]  ;;  %v2545_v49 = vld [vmem:[%s5271_s8 + $0x440] sm:$0xff] }
 0x20b   :  { %v2511_v4 = vld [vmem:[%s5271_s8 + $0x330] sm:$0xff]  ;;  %2731 = vmatpush.msrb.mxu1 %v2527_v7 }
 0x20c   :  { %2648 = vmatpush.msrb.mxu3 %v2466_v1  ;;  %2630 = vmatpush.msrb.mxu2 %v2448_v35  ;;  %v2504_v1 = vld [vmem:[%s5271_s8 + $0x2f8] sm:$0xff]  ;;  %v2491_v43 = vld [vmem:[%s5271_s8 + $0x290] sm:$0xff] }
 0x20d   :  { %2711 = vmatpush.msrb.mxu0 %v2511_v4  ;;  %v2476_v35 = vld [vmem:[%s5271_s8 + $0x218] sm:$0xff]  ;;  %2732 = vmatpush.msrb.mxu1 %v2526_v16 }
 0x20e   :  { %2649 = vmatpush.msrb.mxu3 %v2465_v5  ;;  %2631 = vmatpush.msrb.mxu2 %v2447_v17  ;;  %v1860_v5 = vld [vmem:[#allocation4 + $0x50] sm:$0xff]  ;;  %v2501_v17 = vld [vmem:[%s5271_s8 + $0x2e0] sm:$0xff] }
 0x20f   :  { %1485 = vrot.lane.b32.xlu2 %v1426_v20, %s2877_s13  ;;  %v2478_v20 = vld [vmem:[%s5271_s8 + $0x228] sm:$0xff]  ;;  %1928 = vmatmul.f32.gmra.mxu0 %v1860_v5 }
 0x210   :  { %2650 = vmatpush.msrb.mxu3 %v2464_v9  ;;  %2632 = vmatpush.msrb.mxu2 %v2446_v27  ;;  %v1508_v9 = vpop.permute.xlu1 %1507  ;;  %v2499_v27 = vld [vmem:[%s5271_s8 + $0x2d0] sm:$0xff] }
 0x211   :  { %1558 = vst.msk [vmem:[#allocation4 + $0xb0] sm:$0xff] %vm1535_vm1, %v1508_v9 }
 0x212   :  { %2651 = vmatpush.msrb.mxu3 %v2463_v63  ;;  %2633 = vmatpush.msrb.mxu2 %v2445_v19  ;;  %v2473_v63 = vld [vmem:[%s5271_s8 + $0x200] sm:$0xff] }
 0x214   :  { %2652 = vmatpush.msrb.mxu3 %v2462_v8  ;;  %2634 = vmatpush.msrb.mxu2 %v2444_v31  ;;  %v2551_v8 = vld [vmem:[%s5271_s8 + $0x470] sm:$0xff]  ;;  %v2546_v31 = vld [vmem:[%s5271_s8 + $0x448] sm:$0xff] }
 0x216   :  { %2653 = vmatpush.msrb.mxu3 %v2461_v37  ;;  %2635 = vmatpush.msrb.mxu2 %v2443_v39  ;;  %v2496_v37 = vld [vmem:[%s5271_s8 + $0x2b8] sm:$0xff]  ;;  %v2525_v39 = vld [vmem:[%s5271_s8 + $0x3a0] sm:$0xff] }
 0x217   :  { %v2227_v34 = vpop.permute.xlu0 %2226  ;;  %1775 = vrot.lane.b32.xlu2 %v1716_v22, %s2878_s26  ;;  %v2500_v22 = vld [vmem:[%s5271_s8 + $0x2d8] sm:$0xff]  ;;  %2733 = vmatpush.msrb.mxu1 %v2525_v39 }
 0x218   :  { %2229 = vst.msk [vmem:[#allocation6 + $0x6] sm:$0x3] %vm2120_vm10, %v2227_v34  ;;  %2654 = vmatpush.msrb.mxu3 %v2460_v45  ;;  %2636 = vmatpush.msrb.mxu2 %v2442_v10  ;;  %v2503_v34 = vld [vmem:[%s5271_s8 + $0x2f0] sm:$0xff]  ;;  %v1390_v45 = vld [vmem:[#allocation3 + $0xc8] sm:$0xff]  ;;  %v2492_v10 = vld [vmem:[%s5271_s8 + $0x298] sm:$0xff] }
 0x219   :  { %1414 = vst.msk [vmem:[#allocation4 + $0xb8] sm:$0xff] %vm1068_vm0, %v1390_v45 }
 0x21a   :  { %2655 = vmatpush.msrb.mxu3 %v2459_v2  ;;  %2637 = vmatpush.msrb.mxu2 %v2441_v54  ;;  %v2508_v2 = vld [vmem:[%s5271_s8 + $0x318] sm:$0xff]  ;;  %v2490_v54 = vld [vmem:[%s5271_s8 + $0x288] sm:$0xff] }
 0x21c   :  { %2656 = vmatpush.msrb.mxu3 %v2458_v21  ;;  %v2544_v21 = vld [vmem:[%s5271_s8 + $0x438] sm:$0xff] }
 0x21e   :  { %2657 = vmatpush.msrb.mxu3 %v2457_v50  ;;  %v2542_v50 = vld [vmem:[%s5271_s8 + $0x428] sm:$0xff] }
 0x21f   :  { %v2387_v29 = vpop.permute.xlu0 %2386  ;;  %v2406_v30 = vld [vmem:[#allocation6] sm:$0xff] }
 0x220   :  { %v2390_v36 = vmul.f32 %v2832_v15, %v2387_v29  ;;  %2560 = vst [vmem:[#allocation1] ss:$4 sm:$0xff] %v2406_v30  ;;  %v1798_v15 = vpop.permute.xlu1 %1797  ;;  %v1378_v29 = vld [vmem:[#allocation3 + $0x58] sm:$0xff]  ;;  %v2498_v30 = vld [vmem:[%s5271_s8 + $0x2c8] sm:$0xff] }
 0x221   :  { %1402 = vst.msk [vmem:[#allocation4 + $0x58] sm:$0xff] %vm1068_vm0, %v1378_v29 }
 0x222   :  { %v2398_v44 = vadd.f32 %v2397_v24, %v2390_v36  ;;  %v2510_v24 = vld [vmem:[%s5271_s8 + $0x328] sm:$0xff]  ;;  %v2549_v36 = vld [vmem:[%s5271_s8 + $0x460] sm:$0xff] }
 0x223   :  { %2712 = vmatpush.msrb.mxu0 %v2510_v24  ;;  %v2763_v24 = vld [vmem:[%s5273_s10] sm:$0xff] }
 0x224   :  { %v2403_v48 = vadd.f32 %v2833_v28, %v2398_v44  ;;  %v2550_v28 = vld [vmem:[%s5271_s8 + $0x468] sm:$0xff] }
 0x225   :  { %v2494_v44 = vld [vmem:[%s5271_s8 + $0x2a8] sm:$0xff] }
 0x226   :  { %v2404_v26 = vmax.f32 %v2403_v48, 0.0  ;;  %v2509_v48 = vld [vmem:[%s5271_s8 + $0x320] sm:$0xff] }
 0x227   :  { %v2563_v52 = vld.sshfl [vmem:[#allocation1] sm:$0xff pattern:$0x73625140]  ;;  %v2564_v46 = vld.sshfl [vmem:[#allocation1 + $0x8] sm:$0xff pattern:$0x73625140]  ;;  %2713 = vmatpush.msrb.mxu0 %v2509_v48 }
 0x228   :  { %2405 = vst [vmem:[#allocation6 + $0x10] sm:$0x3] %v2404_v26  ;;  %2598 = vmatmul.f32.vlgmr.msra.gmra.mxu2 %v2563_v52  ;;  %2618 = vmatmul.f32.vlgmr.msra.gmra.mxu3 %v2564_v46  ;;  %v2565_v42 = vld.sshfl [vmem:[#allocation1 + $0x10] sm:$0xff pattern:$0x73625140]  ;;  %v1653_v11 = vpop.permute.xlu0 %1652  ;;  %v2524_v26 = vld [vmem:[%s5271_s8 + $0x398] sm:$0xff] }
 0x229   :  { %2662 = vmatpush.msra.mxu2 %v2488_v13  ;;  %v2566_v57 = vld.sshfl [vmem:[#allocation1 + $0x18] sm:$0xff pattern:$0x73625140]  ;;  %2682 = vmatpush.msra.mxu3 %v2504_v1  ;;  %1703 = vst.msk [vmem:[#allocation4 + $0xb0] sm:$0xff] %vm1680_vm2, %v1653_v11  ;;  %v2543_v52 = vld [vmem:[%s5271_s8 + $0x430] sm:$0xff] }
 0x22a   :  { %1848 = vst.msk [vmem:[#allocation4 + $0xb0] sm:$0xff] %vm1825_vm3, %v1798_v15  ;;  %v2507_v46 = vld [vmem:[%s5271_s8 + $0x310] sm:$0xff]  ;;  %2714 = vmatpush.msrb.mxu0 %v2508_v2  ;;  %2734 = vmatpush.msrb.mxu1 %v2524_v26 }
 0x22b   :  { %2663 = vmatpush.msra.mxu2 %v2487_v25  ;;  %2683 = vmatpush.msra.mxu3 %v2503_v34  ;;  %v2523_v13 = vld [vmem:[%s5271_s8 + $0x390] sm:$0xff]  ;;  %v2489_v25 = vld [vmem:[%s5271_s8 + $0x280] sm:$0xff] }
 0x22c   :  { %2715 = vmatpush.msrb.mxu0 %v2507_v46  ;;  %2735 = vmatpush.msrb.mxu1 %v2523_v13 }
 0x22d   :  { %2664 = vmatpush.msra.mxu2 %v2486_v55  ;;  %v2271_v18 = vpop.permute.xlu2 %2270  ;;  %2684 = vmatpush.msra.mxu3 %v2502_v6  ;;  %v2540_v55 = vld [vmem:[%s5271_s8 + $0x418] sm:$0xff] }
 0x22e   :  { %2273 = vst.msk [vmem:[#allocation6 + $0x8] sm:$0x3] %vm2120_vm10, %v2271_v18  ;;  %v2537_v18 = vld [vmem:[%s5271_s8 + $0x400] sm:$0xff] }
 0x22f   :  { %v2408_v56 = vld [vmem:[#allocation6 + $0x10] sm:$0x3]  ;;  %2665 = vmatpush.msra.mxu2 %v2485_v58  ;;  %2685 = vmatpush.msra.mxu3 %v2501_v17  ;;  %v2766_v17 = vld [vmem:[%s5273_s10 + $0x18] sm:$0xff] }
 0x230   :  { %2638 = vmatmul.f32.vlgmr.msrb.gmra.mxu2 %v2565_v42  ;;  %2571 = vst [vmem:[#allocation1] ss:$4 sm:$0xff] %v2408_v56  ;;  %2658 = vmatmul.f32.vlgmr.msrb.gmra.mxu3 %v2566_v57  ;;  %v2541_v42 = vld [vmem:[%s5271_s8 + $0x420] sm:$0xff]  ;;  %v2506_v56 = vld [vmem:[%s5271_s8 + $0x308] sm:$0xff]  ;;  %v2539_v57 = vld [vmem:[%s5271_s8 + $0x410] sm:$0xff] }
 0x231   :  { %2666 = vmatpush.msra.mxu2 %v2484_v59  ;;  %2686 = vmatpush.msra.mxu3 %v2500_v22  ;;  %v1971_v19 = vld [vmem:[#allocation4 + $0xb0] sm:$0xff]  ;;  %v2505_v59 = vld [vmem:[%s5271_s8 + $0x300] sm:$0xff] }
 0x232   :  { %2039 = vmatmul.f32.gmra.mxu1 %v1971_v19  ;;  %2716 = vmatpush.msrb.mxu0 %v2506_v56  ;;  %v2522_v58 = vld [vmem:[%s5271_s8 + $0x388] sm:$0xff] }
 0x233   :  { %2667 = vmatpush.msra.mxu2 %v2483_v60  ;;  %2687 = vmatpush.msra.mxu3 %v2499_v27  ;;  %v2538_v60 = vld [vmem:[%s5271_s8 + $0x408] sm:$0xff]  ;;  %v2834_v27 = vld [vmem:[%s5272_s9] ss:$0 sm:$0xff] }
 0x234   :  { %2736 = vmatpush.msrb.mxu1 %v2522_v58  ;;  %2717 = vmatpush.msrb.mxu0 %v2505_v59 }
 0x235   :  { %2668 = vmatpush.msra.mxu2 %v2482_v53  ;;  %2688 = vmatpush.msra.mxu3 %v2498_v30 }
 0x237   :  { %2669 = vmatpush.msra.mxu2 %v2481_v61  ;;  %2689 = vmatpush.msra.mxu3 %v2497_v32  ;;  %v2521_v61 = vld [vmem:[%s5271_s8 + $0x380] sm:$0xff] }
 0x238   :  { %2737 = vmatpush.msrb.mxu1 %v2521_v61  ;;  %v2572_v11 = vld.sshfl [vmem:[#allocation1] sm:$0xff pattern:$0x73625140] }
 0x239   :  { %2670 = vmatpush.msra.mxu2 %v2480_v62  ;;  %2690 = vmatpush.msra.mxu3 %v2496_v37 }
 0x23b   :  { %2671 = vmatpush.msra.mxu2 %v2479_v33  ;;  %2691 = vmatpush.msra.mxu3 %v2495_v40 }
 0x23d   :  { %2672 = vmatpush.msra.mxu2 %v2478_v20  ;;  %2692 = vmatpush.msra.mxu3 %v2494_v44 }
 0x23f   :  { %2673 = vmatpush.msra.mxu2 %v2477_v3  ;;  %2693 = vmatpush.msra.mxu3 %v2493_v47 }
 0x241   :  { %2674 = vmatpush.msra.mxu2 %v2476_v35  ;;  %2694 = vmatpush.msra.mxu3 %v2492_v10 }
 0x243   :  { %2675 = vmatpush.msra.mxu2 %v2475_v12  ;;  %2695 = vmatpush.msra.mxu3 %v2491_v43 }
 0x245   :  { %2676 = vmatpush.msra.mxu2 %v2474_v14  ;;  %2696 = vmatpush.msra.mxu3 %v2490_v54 }
 0x247   :  { %2677 = vmatpush.msra.mxu2 %v2473_v63  ;;  %2697 = vmatpush.msra.mxu3 %v2489_v25  ;;  %v2765_v63 = vld [vmem:[%s5273_s10 + $0x10] sm:$0xff] }
 0x249   :  { %2742 = vmatpush.msrb.mxu2 %v2552_v23  ;;  %2786 = vmatpush.msrb.mxu3 %v2766_v17  ;;  %v2764_v23 = vld [vmem:[%s5273_s10 + $0x8] sm:$0xff] }
 0x24b   :  { %2743 = vmatpush.msrb.mxu2 %v2551_v8  ;;  %2787 = vmatpush.msrb.mxu3 %v2765_v63 }
 0x24d   :  { %2744 = vmatpush.msrb.mxu2 %v2550_v28  ;;  %2788 = vmatpush.msrb.mxu3 %v2764_v23 }
 0x24f   :  { %2745 = vmatpush.msrb.mxu2 %v2549_v36  ;;  %2789 = vmatpush.msrb.mxu3 %v2763_v24 }
 0x251   :  { %2746 = vmatpush.msrb.mxu2 %v2548_v38 }
 0x253   :  { %2747 = vmatpush.msrb.mxu2 %v2547_v41 }
 0x255   :  { %2748 = vmatpush.msrb.mxu2 %v2546_v31  ;;  %v2303_v51 = vpop.permute.xlu0 %2302 }
 0x256   :  { %2305 = vst.msk [vmem:[#allocation6 + $0xa] sm:$0x3] %vm2120_vm10, %v2303_v51  ;;  %v2835_v51 = vld [vmem:[%s5274_s11] ss:$0 sm:$0xff] }
 0x257   :  { %2749 = vmatpush.msrb.mxu2 %v2545_v49 }
 0x259   :  { %2750 = vmatpush.msrb.mxu2 %v2544_v21 }
 0x25b   :  { %2751 = vmatpush.msrb.mxu2 %v2543_v52 }
 0x25d   :  { %2752 = vmatpush.msrb.mxu2 %v2542_v50  ;;  %v1631_v62 = vpop.permute.xlu0 %1630 }
 0x25f   :  { %2753 = vmatpush.msrb.mxu2 %v2541_v42 }
 0x261   :  { %2754 = vmatpush.msrb.mxu2 %v2540_v55  ;;  %v2379_v53 = vpop.permute.xlu2 %2378 }
 0x262   :  { %2381 = vst.msk [vmem:[#allocation6 + $0xe] sm:$0x3] %vm2120_vm10, %v2379_v53 }
 0x263   :  { %2755 = vmatpush.msrb.mxu2 %v2539_v57 }
 0x265   :  { %2756 = vmatpush.msrb.mxu2 %v2538_v60  ;;  %v1655_v3 = vpop.permute.xlu0 %1654 }
 0x267   :  { %2757 = vmatpush.msrb.mxu2 %v2537_v18 }
 0x269   :  { %v1486_v33 = vpop.permute.xlu2 %1485  ;;  %v2347_v20 = vpop.permute.xlu1 %2346 }
 0x26a   :  { %1547 = vst.msk [vmem:[#allocation4 + $0x58] sm:$0xff] %vm1535_vm1, %v1486_v33 }
 0x26b   :  { %2349 = vst.msk [vmem:[#allocation6 + $0xc] sm:$0x3] %vm2120_vm10, %v2347_v20 }
 0x26c   :  { %1692 = vst.msk [vmem:[#allocation4 + $0x58] sm:$0xff] %vm1680_vm2, %v1631_v62 }
 0x271   :  { %v1776_v0 = vpop.permute.xlu2 %1775  ;;  %v1510_v1 = vpop.permute.xlu1 %1509 }
 0x272   :  { %v2407_v34 = vld [vmem:[#allocation6 + $0x8] sm:$0xff]  ;;  %1837 = vst.msk [vmem:[#allocation4 + $0x58] sm:$0xff] %vm1825_vm3, %v1776_v0 }
 0x273   :  { %2562 = vst [vmem:[#allocation1 + $0x20] ss:$4 sm:$0xff] %v2407_v34 }
 0x274   :  { %1559 = vst.msk [vmem:[#allocation4 + $0xb8] sm:$0xff] %vm1535_vm1, %v1510_v1 }
 0x275   :  { %1704 = vst.msk [vmem:[#allocation4 + $0xb8] sm:$0xff] %vm1680_vm2, %v1655_v3 }
 0x279   :  { %v1800_v4 = vpop.permute.xlu1 %1799  ;;  %v1861_v5 = vld [vmem:[#allocation4 + $0x58] sm:$0xff] }
 0x27a   :  { %1849 = vst.msk [vmem:[#allocation4 + $0xb8] sm:$0xff] %vm1825_vm3, %v1800_v4  ;;  %1931 = vmatmul.f32.gmra.mxu0 %v1861_v5  ;;  %v2567_v6 = vld.sshfl [vmem:[#allocation1 + $0x20] sm:$0xff pattern:$0x73625140] }
 0x27b   :  { %2678 = vmatmul.f32.vlgmr.msra.gmra.mxu2 %v2567_v6  ;;  %v2568_v7 = vld.sshfl [vmem:[#allocation1 + $0x28] sm:$0xff pattern:$0x73625140]  ;;  %v2569_v9 = vld.sshfl [vmem:[#allocation1 + $0x30] sm:$0xff pattern:$0x73625140] }
 0x27c   :  { %2698 = vmatmul.f32.vlgmr.msra.gmra.mxu3 %v2568_v7  ;;  %v2570_v12 = vld.sshfl [vmem:[#allocation1 + $0x38] sm:$0xff pattern:$0x73625140] }
 0x281   :  { %v1972_v35 = vld [vmem:[#allocation4 + $0xb8] sm:$0xff] }
 0x282   :  { %2042 = vmatmul.f32.gmra.mxu1 %v1972_v35  ;;  %2718 = vmatmul.f32.vlgmr.msrb.gmra.mxu0 %v2569_v9 }
 0x283   :  { %2758 = vmatmul.f32.vlgmr.msrb.gmra.mxu2 %v2572_v11 }
 0x28a   :  { %2738 = vmatmul.f32.vlgmr.msrb.gmra.mxu1 %v2570_v12 }
 0x28c   :  { %v1929_v14 = vpop.f32.mrf.mxu0 }
 0x2ab   :  { %v2599_v22 = vpop.f32.mrf.mxu2  ;;  %v2619_v8 = vpop.f32.mrf.mxu3 }
 0x2ac   :  { %v2600_v16 = vadd.f32 %v2834_v27, %v2599_v22 }
 0x2ae   :  { %v2620_v29 = vadd.f32 %v2619_v8, %v2600_v16 }
 0x2af   :  { %v2040_v15 = vpop.f32.mrf.mxu1 }
 0x2b3   :  { %v2639_v28 = vpop.f32.mrf.mxu2  ;;  %v2659_v36 = vpop.f32.mrf.mxu3 }
 0x2b4   :  { %v2640_v32 = vadd.f32 %v2639_v28, %v2620_v29 }
 0x2b6   :  { %v2660_v19 = vadd.f32 %v2659_v36, %v2640_v32 }
 0x2f7   :  { %v1932_v30 = vpop.f32.mrf.mxu0 }
 0x2fe   :  { %v2679_v37 = vpop.f32.mrf.mxu2 }
 0x2ff   :  { %v2680_v38 = vadd.f32 %v2679_v37, %v2660_v19  ;;  %v2043_v40 = vpop.f32.mrf.mxu1  ;;  %v2699_v41 = vpop.f32.mrf.mxu3 }
 0x300   :  { %v2719_v31 = vpop.f32.mrf.mxu0 }
 0x301   :  { %v2700_v44 = vadd.f32 %v2699_v41, %v2680_v38 }
 0x303   :  { %v2720_v45 = vadd.f32 %v2719_v31, %v2700_v44 }
 0x306   :  { %v2759_v48 = vpop.f32.mrf.mxu2 }
 0x307   :  { %v2739_v47 = vpop.f32.mrf.mxu1 }
 0x308   :  { %v2740_v49 = vadd.f32 %v2739_v47, %v2720_v45 }
 0x30a   :  { %v2760_v39 = vadd.f32 %v2759_v48, %v2740_v49 }
 0x30c   :  { %v2762_v2 = vmax.f32 %v2760_v39, 0.0 }
 0x30e   :  { %2813 = vmatmul.msk.f32.vlgmr.msrb.gmra.mxu3 %vm1068_vm0, %v2762_v2 }
 0x391   :  { %v2791_v26 = vpop.f32.mrf.mxu3 }
 0x392   :  { %v2792_v10 = vadd.f32 %v2835_v51, %v2791_v26 }
 0x394   :  { %2836 = vtanh.f32 %v2792_v10 }
 0x39a   :  { %v2837_v21 = vpop.eup %2836 }
 0x39b   :  { %2796 = vst.msk [vmem:[#allocation7] sm:$0x3] %vm2795_vm11, %v2837_v21 }
 0x39c   :  { %2807 = dma.vmem_to_hbm [thread:$0]  %s2803_s18, 32, %s2805_s3, [#allocation8]  }
 0x39d   :  { %2874 = dma.done.wait [#allocation8], 32  }
 0x39e   :  { %2875 = vsyncadd [#allocation8], 4294967264 }
 0x39f   :  { %2812 = vsyncpa [#allocation8], 1 }

</bundles_post_ra>
